<compile_context>
chip_gen: v7x
topology: tpu7x:2x2x1
jax: 0.10.0
libtpu: 0.0.40
codegen_flags: <defaults>
</compile_context>

<pallas_src>
import functools

import jax
import jax.numpy as jnp
import numpy as np
from jax.experimental import pallas as pl
from jax.experimental.pallas import tpu as pltpu

C1, C2, C3 = 64, 32, 16   # conv1 / conv2 / spacing-encoder hidden channels


def _wshift(v, dx):
    """Shift along W (sublane axis): result[:, w, :] = v[:, w + dx - 1, :],
    zero-filled at the image edge.  XLU roll + mask instead of unaligned
    sublane slicing (which would force relayout copies)."""
    if dx == 1:
        return v
    Wdim = v.shape[1]
    col = jax.lax.broadcasted_iota(jnp.int32, (1, Wdim, 1), 1)
    if dx == 0:                                    # needs v[:, w-1, :]
        r = pltpu.roll(v, shift=1, axis=1)
        return jnp.where(col == 0, 0.0, r)
    r = pltpu.roll(v, shift=Wdim - 1, axis=1)      # needs v[:, w+1, :]
    return jnp.where(col == Wdim - 1, 0.0, r)


def _im2col_3x3(x3, W, C, bf16):
    """x3: (H, W, C) f32 -> (H*W, 9*C) bf16 im2col slab, K order (dy, dx, ci)."""
    H = x3.shape[0]
    zr = jnp.zeros((1, W, C), x3.dtype)
    xp = jnp.concatenate([zr, x3, zr], axis=0)                     # (H+2, W, C)
    xv = [_wshift(xp, dx).astype(bf16) for dx in range(3)]         # dx variants
    return jnp.concatenate(
        [xv[dx][dy:dy + H] for dy in range(3) for dx in range(3)],
        axis=-1).reshape(H * W, 9 * C)


def _staff_kernel(x_ref, w1_ref, b1_ref, w2_ref, b2_ref,
                  w3_ref, b3_ref, w4_ref, b4_ref, out_ref, *, W, Cin):
    f32, bf16 = jnp.float32, jnp.bfloat16
    H = x_ref.shape[1]

    x_flat = x_ref[0]                               # (H, W*Cin) lane-dense load
    x3 = x_flat.reshape(H, W, Cin)                  # channels-last image, f32

    # ---- conv1: 3x3, pad 1, ReLU  (one MXU dot, K = 9*Cin) ------------------
    slab = _im2col_3x3(x3, W, Cin, bf16)                           # (H*W, 36)
    f1 = jnp.maximum(
        jnp.dot(slab, w1_ref[...], preferred_element_type=f32) + b1_ref[...],
        0.0)                                                       # (H*W, 64) f32

    # ---- conv2: 3x3, pad 1, ReLU  (one MXU dot, K = 576) --------------------
    slab = _im2col_3x3(f1.reshape(H, W, C1), W, C1, bf16)          # (H*W, 576)
    f2 = jnp.maximum(
        jnp.dot(slab, w2_ref[...], preferred_element_type=f32) + b2_ref[...],
        0.0)                                                       # (H*W, 32) f32

    # ---- spacing encoder conv3: (15,1), pad (7,0), ReLU  (one dot, K=480) ---
    zr = jnp.zeros((7, W, C2), bf16)
    f2p = jnp.concatenate([zr, f2.astype(bf16).reshape(H, W, C2), zr], axis=0)
    slab = jnp.concatenate([f2p[dy:dy + H] for dy in range(15)],
                           axis=-1).reshape(H * W, 15 * C2)        # (H*W, 480)
    f3 = jnp.maximum(
        jnp.dot(slab, w3_ref[...], preferred_element_type=f32) + b3_ref[...],
        0.0)                                                       # (H*W, 16) f32

    # ---- spacing encoder conv4: (5,1), pad (2,0), Sigmoid -- VPU/EUP path ---
    # Accumulate the 5 taps in channel space, then a single cross-lane reduce.
    zr = jnp.zeros((2, W, C3), f32)
    f3p = jnp.concatenate([zr, f3.reshape(H, W, C3), zr], axis=0)  # (H+4, W, 16)
    w4_all = w4_ref[...]                                           # (5, 16) f32
    acc = f3p[0:H] * w4_all[0].reshape(1, 1, C3)
    for dy in range(1, 5):
        acc = acc + f3p[dy:dy + H] * w4_all[dy].reshape(1, 1, C3)
    z = jnp.sum(acc, axis=-1) + b4_ref[...]                        # (H, W)
    spacing = pl.reciprocal(1.0 + jnp.exp(-z), approx=True)        # EUP exp+rcp

    # ---- gating + lane-dense store ------------------------------------------
    enhanced = x3 * spacing[:, :, None]                            # (H, W, Cin) f32
    out_ref[0] = enhanced.reshape(H, W * Cin).astype(out_ref.dtype)


def staff_line_constraint(x_nchw, params):
    """x_nchw: (N, Cin, H, W) float32 -> (N, Cin, H, W).

    params = (w1, b1, w2, b2, w3, b3, w4, b4) with HWIO conv weights:
      w1 (3,3,Cin,64)  w2 (3,3,64,32)  w3 (15,1,32,16)  w4 (5,1,16,1),
    biases b* of shape (1, cout).
    """
    w1, b1, w2, b2, w3, b3, w4, b4 = params
    N, Cin, H, W = x_nchw.shape

    # Lane-dense I/O slab (N, H, W*Cin).
    x_slab = jnp.transpose(x_nchw, (0, 2, 3, 1)).reshape(N, H, W * Cin)

    # im2col-reshaped weights; MXU operands in bf16, K-order = (dy, dx, ci).
    w1s = w1.reshape(9 * Cin, C1).astype(jnp.bfloat16)
    w2s = w2.reshape(9 * C1, C2).astype(jnp.bfloat16)
    w3s = w3.reshape(15 * C2, C3).astype(jnp.bfloat16)
    w4s = w4.reshape(5, C3).astype(jnp.float32)       # VPU path stays f32
    b4s = b4.reshape(1, 1).astype(jnp.float32)

    kernel = functools.partial(_staff_kernel, W=W, Cin=Cin)

    flops = 2 * N * H * W * (9 * Cin * C1 + 9 * C1 * C2 + 15 * C2 * C3 + 5 * C3)
    bytes_accessed = (2 * N * H * W * Cin * 4
                      + 2 * (w1s.size + w2s.size + w3s.size)
                      + 4 * (w4s.size + b1.size + b2.size + b3.size + b4s.size))
    cost = pl.CostEstimate(flops=flops, transcendentals=N * H * W,
                           bytes_accessed=bytes_accessed)

    out = pl.pallas_call(
        kernel,
        out_shape=jax.ShapeDtypeStruct((N, H, W * Cin), x_slab.dtype),
        grid=(N,),
        in_specs=[
            pl.BlockSpec((1, H, W * Cin), lambda n: (n, 0, 0)),
            pl.BlockSpec(w1s.shape, lambda n: (0, 0)),
            pl.BlockSpec(b1.shape, lambda n: (0, 0)),
            pl.BlockSpec(w2s.shape, lambda n: (0, 0)),
            pl.BlockSpec(b2.shape, lambda n: (0, 0)),
            pl.BlockSpec(w3s.shape, lambda n: (0, 0)),
            pl.BlockSpec(b3.shape, lambda n: (0, 0)),
            pl.BlockSpec(w4s.shape, lambda n: (0, 0)),
            pl.BlockSpec(b4s.shape, lambda n: (0, 0)),
        ],
        out_specs=pl.BlockSpec((1, H, W * Cin), lambda n: (n, 0, 0)),
        compiler_params=pltpu.CompilerParams(
            dimension_semantics=("parallel",)),
        cost_estimate=cost,
    )(x_slab, w1s, b1, w2s, b2, w3s, b3, w4s, b4s)

    return jnp.transpose(out.reshape(N, H, W, Cin), (0, 3, 1, 2))


def _reference_forward(x_nchw, params):
    """Pure-JAX reference (lax.conv) mirroring the PyTorch module."""
    w1, b1, w2, b2, w3, b3, w4, b4 = params
    x = jnp.transpose(x_nchw, (0, 2, 3, 1))

    def conv(inp, w, b, pad):
        y = jax.lax.conv_general_dilated(
            inp, w, (1, 1), pad, dimension_numbers=("NHWC", "HWIO", "NHWC"))
        return y + b.reshape(1, 1, 1, -1)

    f1 = jax.nn.relu(conv(x, w1, b1, ((1, 1), (1, 1))))
    f2 = jax.nn.relu(conv(f1, w2, b2, ((1, 1), (1, 1))))
    f3 = jax.nn.relu(conv(f2, w3, b3, ((7, 7), (0, 0))))
    sw = jax.nn.sigmoid(conv(f3, w4, b4, ((2, 2), (0, 0))))
    return jnp.transpose(x * sw, (0, 3, 1, 2))


def _init_conv(key, kh, kw, cin, cout):
    kw_, kb = jax.random.split(key)
    bound = 1.0 / np.sqrt(cin * kh * kw)
    w = jax.random.uniform(kw_, (kh, kw, cin, cout), jnp.float32, -bound, bound)
    b = jax.random.uniform(kb, (1, cout), jnp.float32, -bound, bound)
    return w, b


if __name__ == "__main__":
    N, Cin, H, W = 2, 4, 16, 16

    key = jax.random.PRNGKey(0)
    k1, k2, k3, k4, kx = jax.random.split(key, 5)

    w1, b1 = _init_conv(k1, 3, 3, Cin, C1)        # conv1
    w2, b2 = _init_conv(k2, 3, 3, C1, C2)         # conv2
    w3, b3 = _init_conv(k3, 15, 1, C2, C3)        # spacing conv (15,1)
    w4, b4 = _init_conv(k4, 5, 1, C3, 1)          # spacing conv (5,1)
    params = (w1, b1, w2, b2, w3, b3, w4, b4)

    x = jax.random.normal(kx, (N, Cin, H, W), jnp.float32)

    out = jax.block_until_ready(staff_line_constraint(x, params))

    ref = jax.block_until_ready(_reference_forward(x, params))
    # bf16 MXU operands (f32 accumulation) + approx reciprocal -> looser
    # tolerance than pure f32.
    np.testing.assert_allclose(np.asarray(out), np.asarray(ref),
                               rtol=2e-2, atol=2e-2)

    print("KERNEL_OK")
</pallas_src>

<mosaic_0001>
module attributes {stable_mosaic.version = 11 : i64} {
  func.func @_staff_kernel(%arg0: i32, %arg1: memref<1x16x64xf32, #tpu.memory_space<vmem>>, %arg2: memref<36x64xbf16, #tpu.memory_space<vmem>>, %arg3: memref<1x64xf32, #tpu.memory_space<vmem>>, %arg4: memref<576x32xbf16, #tpu.memory_space<vmem>>, %arg5: memref<1x32xf32, #tpu.memory_space<vmem>>, %arg6: memref<480x16xbf16, #tpu.memory_space<vmem>>, %arg7: memref<1x16xf32, #tpu.memory_space<vmem>>, %arg8: memref<5x16xf32, #tpu.memory_space<vmem>>, %arg9: memref<1x1xf32, #tpu.memory_space<vmem>>, %arg10: memref<1x16x64xf32, #tpu.memory_space<vmem>>) attributes {dimension_semantics = [#tpu.dimension_semantics<parallel>], iteration_bounds = array<i64: 2>, scalar_prefetch = 0 : i64, scratch_operands = 0 : i64, tpu.core_type = #tpu.core_type<tc>, window_params = [{transform_indices = @transform_0, window_bounds = array<i64: 1, 16, 64>}, {pipeline_mode = #tpu.pipeline_mode<synchronous>, transform_indices = @transform_1, window_bounds = array<i64: 36, 64>}, {pipeline_mode = #tpu.pipeline_mode<synchronous>, transform_indices = @transform_2, window_bounds = array<i64: 1, 64>}, {pipeline_mode = #tpu.pipeline_mode<synchronous>, transform_indices = @transform_3, window_bounds = array<i64: 576, 32>}, {pipeline_mode = #tpu.pipeline_mode<synchronous>, transform_indices = @transform_4, window_bounds = array<i64: 1, 32>}, {pipeline_mode = #tpu.pipeline_mode<synchronous>, transform_indices = @transform_5, window_bounds = array<i64: 480, 16>}, {pipeline_mode = #tpu.pipeline_mode<synchronous>, transform_indices = @transform_6, window_bounds = array<i64: 1, 16>}, {pipeline_mode = #tpu.pipeline_mode<synchronous>, transform_indices = @transform_7, window_bounds = array<i64: 5, 16>}, {pipeline_mode = #tpu.pipeline_mode<synchronous>, transform_indices = @transform_8, window_bounds = array<i64: 1, 1>}, {transform_indices = @transform_9, window_bounds = array<i64: 1, 16, 64>}]} {
    %c0 = arith.constant 0 : index
    %c0_0 = arith.constant 0 : index
    %c0_1 = arith.constant 0 : index
    %0 = vector.load %arg1[%c0, %c0_0, %c0_1] : memref<1x16x64xf32, #tpu.memory_space<vmem>>, vector<1x16x64xf32>
    %1 = vector.shape_cast %0 : vector<1x16x64xf32> to vector<16x64xf32>
    %2 = vector.shape_cast %1 : vector<16x64xf32> to vector<16x16x4xf32>
    %cst = arith.constant 0.000000e+00 : f32
    %3 = vector.broadcast %cst : f32 to vector<1x16x4xf32>
    %4 = tpu.concatenate %3, %2, %3 in 0 : vector<1x16x4xf32>, vector<16x16x4xf32>, vector<1x16x4xf32> -> vector<18x16x4xf32>
    %5 = tpu.iota {dimensions = array<i32: 1>} : vector<1x16x1xi32>
    %c1_i32 = arith.constant 1 : i32
    %6 = tpu.dynamic_rotate %4 by %c1_i32 dim 1 : vector<18x16x4xf32>, i32 -> vector<18x16x4xf32>
    %c0_i32 = arith.constant 0 : i32
    %7 = vector.broadcast %c0_i32 : i32 to vector<1x16x1xi32>
    %8 = arith.cmpi eq, %5, %7 : vector<1x16x1xi32>
    %cst_2 = arith.constant 0.000000e+00 : f32
    %9 = vector.shape_cast %8 : vector<1x16x1xi1> to vector<1x16x1xi1>
    %10 = vector.broadcast %9 : vector<1x16x1xi1> to vector<18x16x4xi1>
    %11 = vector.broadcast %cst_2 : f32 to vector<18x16x4xf32>
    %12 = arith.select %10, %11, %6 : vector<18x16x4xi1>, vector<18x16x4xf32>
    %13 = arith.truncf %12 : vector<18x16x4xf32> to vector<18x16x4xbf16>
    %14 = arith.truncf %4 : vector<18x16x4xf32> to vector<18x16x4xbf16>
    %15 = tpu.iota {dimensions = array<i32: 1>} : vector<1x16x1xi32>
    %c15_i32 = arith.constant 15 : i32
    %16 = tpu.dynamic_rotate %4 by %c15_i32 dim 1 : vector<18x16x4xf32>, i32 -> vector<18x16x4xf32>
    %c15_i32_3 = arith.constant 15 : i32
    %17 = vector.broadcast %c15_i32_3 : i32 to vector<1x16x1xi32>
    %18 = arith.cmpi eq, %15, %17 : vector<1x16x1xi32>
    %cst_4 = arith.constant 0.000000e+00 : f32
    %19 = vector.shape_cast %18 : vector<1x16x1xi1> to vector<1x16x1xi1>
    %20 = vector.broadcast %19 : vector<1x16x1xi1> to vector<18x16x4xi1>
    %21 = vector.broadcast %cst_4 : f32 to vector<18x16x4xf32>
    %22 = arith.select %20, %21, %16 : vector<18x16x4xi1>, vector<18x16x4xf32>
    %23 = arith.truncf %22 : vector<18x16x4xf32> to vector<18x16x4xbf16>
    %24 = vector.extract_strided_slice %13 {offsets = [0, 0, 0], sizes = [16, 16, 4], strides = [1, 1, 1]} : vector<18x16x4xbf16> to vector<16x16x4xbf16>
    %25 = vector.extract_strided_slice %14 {offsets = [0, 0, 0], sizes = [16, 16, 4], strides = [1, 1, 1]} : vector<18x16x4xbf16> to vector<16x16x4xbf16>
    %26 = vector.extract_strided_slice %23 {offsets = [0, 0, 0], sizes = [16, 16, 4], strides = [1, 1, 1]} : vector<18x16x4xbf16> to vector<16x16x4xbf16>
    %27 = vector.extract_strided_slice %13 {offsets = [1, 0, 0], sizes = [16, 16, 4], strides = [1, 1, 1]} : vector<18x16x4xbf16> to vector<16x16x4xbf16>
    %28 = vector.extract_strided_slice %14 {offsets = [1, 0, 0], sizes = [16, 16, 4], strides = [1, 1, 1]} : vector<18x16x4xbf16> to vector<16x16x4xbf16>
    %29 = vector.extract_strided_slice %23 {offsets = [1, 0, 0], sizes = [16, 16, 4], strides = [1, 1, 1]} : vector<18x16x4xbf16> to vector<16x16x4xbf16>
    %30 = vector.extract_strided_slice %13 {offsets = [2, 0, 0], sizes = [16, 16, 4], strides = [1, 1, 1]} : vector<18x16x4xbf16> to vector<16x16x4xbf16>
    %31 = vector.extract_strided_slice %14 {offsets = [2, 0, 0], sizes = [16, 16, 4], strides = [1, 1, 1]} : vector<18x16x4xbf16> to vector<16x16x4xbf16>
    %32 = vector.extract_strided_slice %23 {offsets = [2, 0, 0], sizes = [16, 16, 4], strides = [1, 1, 1]} : vector<18x16x4xbf16> to vector<16x16x4xbf16>
    %33 = tpu.concatenate %24, %25, %26, %27, %28, %29, %30, %31, %32 in 2 : vector<16x16x4xbf16>, vector<16x16x4xbf16>, vector<16x16x4xbf16>, vector<16x16x4xbf16>, vector<16x16x4xbf16>, vector<16x16x4xbf16>, vector<16x16x4xbf16>, vector<16x16x4xbf16>, vector<16x16x4xbf16> -> vector<16x16x36xbf16>
    %34 = vector.shape_cast %33 : vector<16x16x36xbf16> to vector<256x36xbf16>
    %c0_5 = arith.constant 0 : index
    %c0_6 = arith.constant 0 : index
    %35 = vector.load %arg2[%c0_5, %c0_6] : memref<36x64xbf16, #tpu.memory_space<vmem>>, vector<36x64xbf16>
    %cst_7 = arith.constant dense<0.000000e+00> : vector<256x64xf32>
    %36 = tpu.matmul %34, %35, %cst_7 {dimension_numbers = #tpu.dot_dimension_numbers<[1], [0], [0], [1], [0, 0, 1, 1], [], []>} : vector<256x36xbf16>, vector<36x64xbf16>, vector<256x64xf32> -> vector<256x64xf32>
    %c0_8 = arith.constant 0 : index
    %c0_9 = arith.constant 0 : index
    %37 = vector.load %arg3[%c0_8, %c0_9] : memref<1x64xf32, #tpu.memory_space<vmem>>, vector<1x64xf32>
    %38 = vector.broadcast %37 : vector<1x64xf32> to vector<256x64xf32>
    %39 = arith.addf %36, %38 : vector<256x64xf32>
    %cst_10 = arith.constant 0.000000e+00 : f32
    %40 = vector.broadcast %cst_10 : f32 to vector<256x64xf32>
    %41 = arith.maximumf %39, %40 : vector<256x64xf32>
    %42 = vector.shape_cast %41 : vector<256x64xf32> to vector<16x16x64xf32>
    %cst_11 = arith.constant 0.000000e+00 : f32
    %43 = vector.broadcast %cst_11 : f32 to vector<1x16x64xf32>
    %44 = tpu.concatenate %43, %42, %43 in 0 : vector<1x16x64xf32>, vector<16x16x64xf32>, vector<1x16x64xf32> -> vector<18x16x64xf32>
    %45 = tpu.iota {dimensions = array<i32: 1>} : vector<1x16x1xi32>
    %c1_i32_12 = arith.constant 1 : i32
    %46 = tpu.dynamic_rotate %44 by %c1_i32_12 dim 1 : vector<18x16x64xf32>, i32 -> vector<18x16x64xf32>
    %c0_i32_13 = arith.constant 0 : i32
    %47 = vector.broadcast %c0_i32_13 : i32 to vector<1x16x1xi32>
    %48 = arith.cmpi eq, %45, %47 : vector<1x16x1xi32>
    %cst_14 = arith.constant 0.000000e+00 : f32
    %49 = vector.shape_cast %48 : vector<1x16x1xi1> to vector<1x16x1xi1>
    %50 = vector.broadcast %49 : vector<1x16x1xi1> to vector<18x16x64xi1>
    %51 = vector.broadcast %cst_14 : f32 to vector<18x16x64xf32>
    %52 = arith.select %50, %51, %46 : vector<18x16x64xi1>, vector<18x16x64xf32>
    %53 = arith.truncf %52 : vector<18x16x64xf32> to vector<18x16x64xbf16>
    %54 = arith.truncf %44 : vector<18x16x64xf32> to vector<18x16x64xbf16>
    %55 = tpu.iota {dimensions = array<i32: 1>} : vector<1x16x1xi32>
    %c15_i32_15 = arith.constant 15 : i32
    %56 = tpu.dynamic_rotate %44 by %c15_i32_15 dim 1 : vector<18x16x64xf32>, i32 -> vector<18x16x64xf32>
    %c15_i32_16 = arith.constant 15 : i32
    %57 = vector.broadcast %c15_i32_16 : i32 to vector<1x16x1xi32>
    %58 = arith.cmpi eq, %55, %57 : vector<1x16x1xi32>
    %cst_17 = arith.constant 0.000000e+00 : f32
    %59 = vector.shape_cast %58 : vector<1x16x1xi1> to vector<1x16x1xi1>
    %60 = vector.broadcast %59 : vector<1x16x1xi1> to vector<18x16x64xi1>
    %61 = vector.broadcast %cst_17 : f32 to vector<18x16x64xf32>
    %62 = arith.select %60, %61, %56 : vector<18x16x64xi1>, vector<18x16x64xf32>
    %63 = arith.truncf %62 : vector<18x16x64xf32> to vector<18x16x64xbf16>
    %64 = vector.extract_strided_slice %53 {offsets = [0, 0, 0], sizes = [16, 16, 64], strides = [1, 1, 1]} : vector<18x16x64xbf16> to vector<16x16x64xbf16>
    %65 = vector.extract_strided_slice %54 {offsets = [0, 0, 0], sizes = [16, 16, 64], strides = [1, 1, 1]} : vector<18x16x64xbf16> to vector<16x16x64xbf16>
    %66 = vector.extract_strided_slice %63 {offsets = [0, 0, 0], sizes = [16, 16, 64], strides = [1, 1, 1]} : vector<18x16x64xbf16> to vector<16x16x64xbf16>
    %67 = vector.extract_strided_slice %53 {offsets = [1, 0, 0], sizes = [16, 16, 64], strides = [1, 1, 1]} : vector<18x16x64xbf16> to vector<16x16x64xbf16>
    %68 = vector.extract_strided_slice %54 {offsets = [1, 0, 0], sizes = [16, 16, 64], strides = [1, 1, 1]} : vector<18x16x64xbf16> to vector<16x16x64xbf16>
    %69 = vector.extract_strided_slice %63 {offsets = [1, 0, 0], sizes = [16, 16, 64], strides = [1, 1, 1]} : vector<18x16x64xbf16> to vector<16x16x64xbf16>
    %70 = vector.extract_strided_slice %53 {offsets = [2, 0, 0], sizes = [16, 16, 64], strides = [1, 1, 1]} : vector<18x16x64xbf16> to vector<16x16x64xbf16>
    %71 = vector.extract_strided_slice %54 {offsets = [2, 0, 0], sizes = [16, 16, 64], strides = [1, 1, 1]} : vector<18x16x64xbf16> to vector<16x16x64xbf16>
    %72 = vector.extract_strided_slice %63 {offsets = [2, 0, 0], sizes = [16, 16, 64], strides = [1, 1, 1]} : vector<18x16x64xbf16> to vector<16x16x64xbf16>
    %73 = tpu.concatenate %64, %65, %66, %67, %68, %69, %70, %71, %72 in 2 : vector<16x16x64xbf16>, vector<16x16x64xbf16>, vector<16x16x64xbf16>, vector<16x16x64xbf16>, vector<16x16x64xbf16>, vector<16x16x64xbf16>, vector<16x16x64xbf16>, vector<16x16x64xbf16>, vector<16x16x64xbf16> -> vector<16x16x576xbf16>
    %74 = vector.shape_cast %73 : vector<16x16x576xbf16> to vector<256x576xbf16>
    %c0_18 = arith.constant 0 : index
    %c0_19 = arith.constant 0 : index
    %75 = vector.load %arg4[%c0_18, %c0_19] : memref<576x32xbf16, #tpu.memory_space<vmem>>, vector<576x32xbf16>
    %cst_20 = arith.constant dense<0.000000e+00> : vector<256x32xf32>
    %76 = tpu.matmul %74, %75, %cst_20 {dimension_numbers = #tpu.dot_dimension_numbers<[1], [0], [0], [1], [0, 0, 1, 1], [], []>} : vector<256x576xbf16>, vector<576x32xbf16>, vector<256x32xf32> -> vector<256x32xf32>
    %c0_21 = arith.constant 0 : index
    %c0_22 = arith.constant 0 : index
    %77 = vector.load %arg5[%c0_21, %c0_22] : memref<1x32xf32, #tpu.memory_space<vmem>>, vector<1x32xf32>
    %78 = vector.broadcast %77 : vector<1x32xf32> to vector<256x32xf32>
    %79 = arith.addf %76, %78 : vector<256x32xf32>
    %cst_23 = arith.constant 0.000000e+00 : f32
    %80 = vector.broadcast %cst_23 : f32 to vector<256x32xf32>
    %81 = arith.maximumf %79, %80 : vector<256x32xf32>
    %cst_24 = arith.constant 0.000000e+00 : bf16
    %82 = vector.broadcast %cst_24 : bf16 to vector<7x16x32xbf16>
    %83 = arith.truncf %81 : vector<256x32xf32> to vector<256x32xbf16>
    %84 = vector.shape_cast %83 : vector<256x32xbf16> to vector<16x16x32xbf16>
    %85 = tpu.concatenate %82, %84, %82 in 0 : vector<7x16x32xbf16>, vector<16x16x32xbf16>, vector<7x16x32xbf16> -> vector<30x16x32xbf16>
    %86 = vector.extract_strided_slice %85 {offsets = [0, 0, 0], sizes = [16, 16, 32], strides = [1, 1, 1]} : vector<30x16x32xbf16> to vector<16x16x32xbf16>
    %87 = vector.extract_strided_slice %85 {offsets = [1, 0, 0], sizes = [16, 16, 32], strides = [1, 1, 1]} : vector<30x16x32xbf16> to vector<16x16x32xbf16>
    %88 = vector.extract_strided_slice %85 {offsets = [2, 0, 0], sizes = [16, 16, 32], strides = [1, 1, 1]} : vector<30x16x32xbf16> to vector<16x16x32xbf16>
    %89 = vector.extract_strided_slice %85 {offsets = [3, 0, 0], sizes = [16, 16, 32], strides = [1, 1, 1]} : vector<30x16x32xbf16> to vector<16x16x32xbf16>
    %90 = vector.extract_strided_slice %85 {offsets = [4, 0, 0], sizes = [16, 16, 32], strides = [1, 1, 1]} : vector<30x16x32xbf16> to vector<16x16x32xbf16>
    %91 = vector.extract_strided_slice %85 {offsets = [5, 0, 0], sizes = [16, 16, 32], strides = [1, 1, 1]} : vector<30x16x32xbf16> to vector<16x16x32xbf16>
    %92 = vector.extract_strided_slice %85 {offsets = [6, 0, 0], sizes = [16, 16, 32], strides = [1, 1, 1]} : vector<30x16x32xbf16> to vector<16x16x32xbf16>
    %93 = vector.extract_strided_slice %85 {offsets = [7, 0, 0], sizes = [16, 16, 32], strides = [1, 1, 1]} : vector<30x16x32xbf16> to vector<16x16x32xbf16>
    %94 = vector.extract_strided_slice %85 {offsets = [8, 0, 0], sizes = [16, 16, 32], strides = [1, 1, 1]} : vector<30x16x32xbf16> to vector<16x16x32xbf16>
    %95 = vector.extract_strided_slice %85 {offsets = [9, 0, 0], sizes = [16, 16, 32], strides = [1, 1, 1]} : vector<30x16x32xbf16> to vector<16x16x32xbf16>
    %96 = vector.extract_strided_slice %85 {offsets = [10, 0, 0], sizes = [16, 16, 32], strides = [1, 1, 1]} : vector<30x16x32xbf16> to vector<16x16x32xbf16>
    %97 = vector.extract_strided_slice %85 {offsets = [11, 0, 0], sizes = [16, 16, 32], strides = [1, 1, 1]} : vector<30x16x32xbf16> to vector<16x16x32xbf16>
    %98 = vector.extract_strided_slice %85 {offsets = [12, 0, 0], sizes = [16, 16, 32], strides = [1, 1, 1]} : vector<30x16x32xbf16> to vector<16x16x32xbf16>
    %99 = vector.extract_strided_slice %85 {offsets = [13, 0, 0], sizes = [16, 16, 32], strides = [1, 1, 1]} : vector<30x16x32xbf16> to vector<16x16x32xbf16>
    %100 = vector.extract_strided_slice %85 {offsets = [14, 0, 0], sizes = [16, 16, 32], strides = [1, 1, 1]} : vector<30x16x32xbf16> to vector<16x16x32xbf16>
    %101 = tpu.concatenate %86, %87, %88, %89, %90, %91, %92, %93, %94, %95, %96, %97, %98, %99, %100 in 2 : vector<16x16x32xbf16>, vector<16x16x32xbf16>, vector<16x16x32xbf16>, vector<16x16x32xbf16>, vector<16x16x32xbf16>, vector<16x16x32xbf16>, vector<16x16x32xbf16>, vector<16x16x32xbf16>, vector<16x16x32xbf16>, vector<16x16x32xbf16>, vector<16x16x32xbf16>, vector<16x16x32xbf16>, vector<16x16x32xbf16>, vector<16x16x32xbf16>, vector<16x16x32xbf16> -> vector<16x16x480xbf16>
    %102 = vector.shape_cast %101 : vector<16x16x480xbf16> to vector<256x480xbf16>
    %c0_25 = arith.constant 0 : index
    %c0_26 = arith.constant 0 : index
    %103 = vector.load %arg6[%c0_25, %c0_26] : memref<480x16xbf16, #tpu.memory_space<vmem>>, vector<480x16xbf16>
    %cst_27 = arith.constant dense<0.000000e+00> : vector<256x16xf32>
    %104 = tpu.matmul %102, %103, %cst_27 {dimension_numbers = #tpu.dot_dimension_numbers<[1], [0], [0], [1], [0, 0, 1, 1], [], []>} : vector<256x480xbf16>, vector<480x16xbf16>, vector<256x16xf32> -> vector<256x16xf32>
    %c0_28 = arith.constant 0 : index
    %c0_29 = arith.constant 0 : index
    %105 = vector.load %arg7[%c0_28, %c0_29] : memref<1x16xf32, #tpu.memory_space<vmem>>, vector<1x16xf32>
    %106 = vector.broadcast %105 : vector<1x16xf32> to vector<256x16xf32>
    %107 = arith.addf %104, %106 : vector<256x16xf32>
    %cst_30 = arith.constant 0.000000e+00 : f32
    %108 = vector.broadcast %cst_30 : f32 to vector<256x16xf32>
    %109 = arith.maximumf %107, %108 : vector<256x16xf32>
    %cst_31 = arith.constant 0.000000e+00 : f32
    %110 = vector.broadcast %cst_31 : f32 to vector<2x16x16xf32>
    %111 = vector.shape_cast %109 : vector<256x16xf32> to vector<16x16x16xf32>
    %112 = tpu.concatenate %110, %111, %110 in 0 : vector<2x16x16xf32>, vector<16x16x16xf32>, vector<2x16x16xf32> -> vector<20x16x16xf32>
    %c0_32 = arith.constant 0 : index
    %c0_33 = arith.constant 0 : index
    %113 = vector.load %arg8[%c0_32, %c0_33] : memref<5x16xf32, #tpu.memory_space<vmem>>, vector<5x16xf32>
    %114 = vector.extract_strided_slice %112 {offsets = [0, 0, 0], sizes = [16, 16, 16], strides = [1, 1, 1]} : vector<20x16x16xf32> to vector<16x16x16xf32>
    %115 = vector.extract_strided_slice %113 {offsets = [0, 0], sizes = [1, 16], strides = [1, 1]} : vector<5x16xf32> to vector<1x16xf32>
    %116 = vector.shape_cast %115 : vector<1x16xf32> to vector<16xf32>
    %117 = vector.shape_cast %116 : vector<16xf32> to vector<1x1x16xf32>
    %118 = vector.broadcast %117 : vector<1x1x16xf32> to vector<16x16x16xf32>
    %119 = arith.mulf %114, %118 : vector<16x16x16xf32>
    %120 = vector.extract_strided_slice %112 {offsets = [1, 0, 0], sizes = [16, 16, 16], strides = [1, 1, 1]} : vector<20x16x16xf32> to vector<16x16x16xf32>
    %121 = vector.extract_strided_slice %113 {offsets = [1, 0], sizes = [1, 16], strides = [1, 1]} : vector<5x16xf32> to vector<1x16xf32>
    %122 = vector.shape_cast %121 : vector<1x16xf32> to vector<16xf32>
    %123 = vector.shape_cast %122 : vector<16xf32> to vector<1x1x16xf32>
    %124 = vector.broadcast %123 : vector<1x1x16xf32> to vector<16x16x16xf32>
    %125 = arith.mulf %120, %124 : vector<16x16x16xf32>
    %126 = arith.addf %119, %125 : vector<16x16x16xf32>
    %127 = vector.extract_strided_slice %112 {offsets = [2, 0, 0], sizes = [16, 16, 16], strides = [1, 1, 1]} : vector<20x16x16xf32> to vector<16x16x16xf32>
    %128 = vector.extract_strided_slice %113 {offsets = [2, 0], sizes = [1, 16], strides = [1, 1]} : vector<5x16xf32> to vector<1x16xf32>
    %129 = vector.shape_cast %128 : vector<1x16xf32> to vector<16xf32>
    %130 = vector.shape_cast %129 : vector<16xf32> to vector<1x1x16xf32>
    %131 = vector.broadcast %130 : vector<1x1x16xf32> to vector<16x16x16xf32>
    %132 = arith.mulf %127, %131 : vector<16x16x16xf32>
    %133 = arith.addf %126, %132 : vector<16x16x16xf32>
    %134 = vector.extract_strided_slice %112 {offsets = [3, 0, 0], sizes = [16, 16, 16], strides = [1, 1, 1]} : vector<20x16x16xf32> to vector<16x16x16xf32>
    %135 = vector.extract_strided_slice %113 {offsets = [3, 0], sizes = [1, 16], strides = [1, 1]} : vector<5x16xf32> to vector<1x16xf32>
    %136 = vector.shape_cast %135 : vector<1x16xf32> to vector<16xf32>
    %137 = vector.shape_cast %136 : vector<16xf32> to vector<1x1x16xf32>
    %138 = vector.broadcast %137 : vector<1x1x16xf32> to vector<16x16x16xf32>
    %139 = arith.mulf %134, %138 : vector<16x16x16xf32>
    %140 = arith.addf %133, %139 : vector<16x16x16xf32>
    %141 = vector.extract_strided_slice %112 {offsets = [4, 0, 0], sizes = [16, 16, 16], strides = [1, 1, 1]} : vector<20x16x16xf32> to vector<16x16x16xf32>
    %142 = vector.extract_strided_slice %113 {offsets = [4, 0], sizes = [1, 16], strides = [1, 1]} : vector<5x16xf32> to vector<1x16xf32>
    %143 = vector.shape_cast %142 : vector<1x16xf32> to vector<16xf32>
    %144 = vector.shape_cast %143 : vector<16xf32> to vector<1x1x16xf32>
    %145 = vector.broadcast %144 : vector<1x1x16xf32> to vector<16x16x16xf32>
    %146 = arith.mulf %141, %145 : vector<16x16x16xf32>
    %147 = arith.addf %140, %146 : vector<16x16x16xf32>
    %cst_34 = arith.constant dense<0.000000e+00> : vector<16x16xf32>
    %148 = vector.multi_reduction <add>, %147, %cst_34 [2] : vector<16x16x16xf32> to vector<16x16xf32>
    %c0_35 = arith.constant 0 : index
    %c0_36 = arith.constant 0 : index
    %149 = vector.load %arg9[%c0_35, %c0_36] : memref<1x1xf32, #tpu.memory_space<vmem>>, vector<1x1xf32>
    %150 = vector.broadcast %149 : vector<1x1xf32> to vector<16x16xf32>
    %151 = arith.addf %148, %150 : vector<16x16xf32>
    %cst_37 = arith.constant 0.000000e+00 : f32
    %152 = vector.broadcast %cst_37 : f32 to vector<16x16xf32>
    %153 = arith.subf %152, %151 : vector<16x16xf32>
    %154 = math.exp %153 : vector<16x16xf32>
    %cst_38 = arith.constant 1.000000e+00 : f32
    %155 = vector.broadcast %cst_38 : f32 to vector<16x16xf32>
    %156 = arith.addf %155, %154 : vector<16x16xf32>
    %157 = tpu.reciprocal %156 {approx = true} : vector<16x16xf32> -> vector<16x16xf32>
    %158 = vector.shape_cast %157 : vector<16x16xf32> to vector<16x16x1xf32>
    %159 = vector.broadcast %158 : vector<16x16x1xf32> to vector<16x16x4xf32>
    %160 = arith.mulf %2, %159 : vector<16x16x4xf32>
    %161 = vector.shape_cast %160 : vector<16x16x4xf32> to vector<16x64xf32>
    %c0_39 = arith.constant 0 : index
    %c0_40 = arith.constant 0 : index
    %c0_41 = arith.constant 0 : index
    %162 = vector.load %arg10[%c0_39, %c0_40, %c0_41] : memref<1x16x64xf32, #tpu.memory_space<vmem>>, vector<1x16x64xf32>
    %163 = vector.shape_cast %162 : vector<1x16x64xf32> to vector<16x64xf32>
    %164 = vector.shape_cast %161 : vector<16x64xf32> to vector<1x16x64xf32>
    tpu.vector_store %arg10[%c0_39, %c0_40, %c0_41], %164 {strides = array<i32>} : memref<1x16x64xf32, #tpu.memory_space<vmem>>, vector<1x16x64xf32>,
    return
  }
  func.func @transform_0(%arg0: i32) -> (i32, i32, i32) {
    %c0_i32 = arith.constant 0 : i32
    %c0_i32_0 = arith.constant 0 : i32
    %c0_i32_1 = arith.constant 0 : i32
    return %arg0, %c0_i32, %c0_i32_0 : i32, i32, i32
  }
  func.func @transform_1(%arg0: i32) -> (i32, i32) {
    %c0_i32 = arith.constant 0 : i32
    %c0_i32_0 = arith.constant 0 : i32
    %c0_i32_1 = arith.constant 0 : i32
    return %c0_i32, %c0_i32_0 : i32, i32
  }
  func.func @transform_2(%arg0: i32) -> (i32, i32) {
    %c0_i32 = arith.constant 0 : i32
    %c0_i32_0 = arith.constant 0 : i32
    %c0_i32_1 = arith.constant 0 : i32
    return %c0_i32, %c0_i32_0 : i32, i32
  }
  func.func @transform_3(%arg0: i32) -> (i32, i32) {
    %c0_i32 = arith.constant 0 : i32
    %c0_i32_0 = arith.constant 0 : i32
    %c0_i32_1 = arith.constant 0 : i32
    return %c0_i32, %c0_i32_0 : i32, i32
  }
  func.func @transform_4(%arg0: i32) -> (i32, i32) {
    %c0_i32 = arith.constant 0 : i32
    %c0_i32_0 = arith.constant 0 : i32
    %c0_i32_1 = arith.constant 0 : i32
    return %c0_i32, %c0_i32_0 : i32, i32
  }
  func.func @transform_5(%arg0: i32) -> (i32, i32) {
    %c0_i32 = arith.constant 0 : i32
    %c0_i32_0 = arith.constant 0 : i32
    %c0_i32_1 = arith.constant 0 : i32
    return %c0_i32, %c0_i32_0 : i32, i32
  }
  func.func @transform_6(%arg0: i32) -> (i32, i32) {
    %c0_i32 = arith.constant 0 : i32
    %c0_i32_0 = arith.constant 0 : i32
    %c0_i32_1 = arith.constant 0 : i32
    return %c0_i32, %c0_i32_0 : i32, i32
  }
  func.func @transform_7(%arg0: i32) -> (i32, i32) {
    %c0_i32 = arith.constant 0 : i32
    %c0_i32_0 = arith.constant 0 : i32
    %c0_i32_1 = arith.constant 0 : i32
    return %c0_i32, %c0_i32_0 : i32, i32
  }
  func.func @transform_8(%arg0: i32) -> (i32, i32) {
    %c0_i32 = arith.constant 0 : i32
    %c0_i32_0 = arith.constant 0 : i32
    %c0_i32_1 = arith.constant 0 : i32
    return %c0_i32, %c0_i32_0 : i32, i32
  }
  func.func @transform_9(%arg0: i32) -> (i32, i32, i32) {
    %c0_i32 = arith.constant 0 : i32
    %c0_i32_0 = arith.constant 0 : i32
    %c0_i32_1 = arith.constant 0 : i32
    return %arg0, %c0_i32, %c0_i32_0 : i32, i32, i32
  }
}

</mosaic_0001>

<bundles_post_ra>
// kernel: tpu_custom_call.1
= control target key start
LH: loop header
LB: loop body
LE: loop exit
PB: predicated region body
PF: predicated region fallthrough
CT: control target
= control target key end

     0   :  { %s10378_s0 = inlined_call_operand.vmem [shape: f32[2,16,64], index: 0, kind: input, shape index: {}]   ;;  %s10379_s1 = inlined_call_operand.vmem [shape: bf16[36,64], index: 1, kind: input, shape index: {}]   ;;  %s10380_s2 = inlined_call_operand.vmem [shape: f32[1,64], index: 2, kind: input, shape index: {}]   ;;  %s10381_s3 = inlined_call_operand.vmem [shape: bf16[576,32], index: 3, kind: input, shape index: {}]   ;;  %s10382_s4 = inlined_call_operand.vmem [shape: f32[1,32], index: 4, kind: input, shape index: {}]   ;;  %s10383_s5 = inlined_call_operand.vmem [shape: bf16[480,16], index: 5, kind: input, shape index: {}]   ;;  %s10384_s6 = inlined_call_operand.vmem [shape: f32[1,16], index: 6, kind: input, shape index: {}]   ;;  %s10385_s7 = inlined_call_operand.vmem [shape: f32[5,16], index: 7, kind: input, shape index: {}]   ;;  %s10386_s8 = inlined_call_operand.<no memory space> [shape: f32[1,1], index: 8, kind: input, shape index: {}]   ;;  %s10387_s9 = inlined_call_operand.hbm [shape: f32[2,16,64], index: 9, kind: output, shape index: {}]  }
   0x1   :  { %10442 = sst [smem:[#allocation43_spill]] %s10378_s0  ;;  %v14_v0 = vstv %s10386_s8 }
   0x2   :  { %15 = vst [vmem:[#allocation2] sm:$0x1] %v14_v0 }
   0x3   :  { %16 = vsyncpa [#allocation4], 0 }
   0x4   :  { %18 = vsyncpa [#allocation4 + $0x1], 0  ;;  %s6863_s11 = smov 0   ;;  %s6865_s12 = smov 0  }
   0x5   :  { %s6867_s13 = smov 0   ;;  %s6869_s14 = smov 0  }
   0x6 LB: > { %s6884_s8 = sadd.s32 4294967295, %s6771_s14   ;;  %s5819_s15 = sadd.s32 4294967294, %s6771_s14   ;;  %s6771_s14 = sphi %s6869_s14, %s10532_s14   ;;  %s6767_s13 = sphi %s6867_s13, %s10531_s13   ;;  %s6763_s12 = sphi %s6865_s12, %s10530_s12   ;;  %s6759_s11 = sphi %s6863_s11, %s10529_s11  }
   0x7   : > { %s6888_s16 = sadd.s32 1, %s6771_s14   ;;  %s225_s17 = sadd.s32 1, %s6767_s13 }
   0x8   : > { %s222_s18 = ssub.s32 %s6771_s14, %s6888_s16  ;;  %p235_p0 = scmp.ne.s32.totalorder %s6767_s13, %s6763_s12 }
   0x9   : > { %p223_p1 = scmp.eq.s32.totalorder %s222_s18, 0  ;;  %p236_p2 = scmp.eq.s32.totalorder %s6884_s8, 1 }
   0xa   : > { %p241_p3 = scmp.ne.s32.totalorder %s6763_s12, %s6759_s11  ;;  %p242_p4 = scmp.eq.s32.totalorder %s5819_s15, 1 }
   0xb   : > { %s6899_s19 = scalar_select %p223_p1, %s6767_s13, %s225_s17  }
   0xc   : > { %p6901_p5 = por %p236_p2, %p235_p0  ;;  %p6905_p6 = por %p242_p4, %p241_p3 }
   0xd   : > { %10443 = sst [smem:[#allocation6_spill]] %s6899_s19  ;;  %p5822_p7 = scmp.ge.s32.totalorder %s6771_s14, 1 }
   0xe   : > { %p292_p8 = scmp.lt.s32.totalorder %s6771_s14, 3 }
  0x10   : > { %p293_p9 = pnand %p5822_p7, %p292_p8 }
  0x12   : > { %296 = sbr.rel (%p293_p9) target bundleno = 2059 (0x80b), region = 56 }
  0x19   : > { %p328_p10 = scmp.lt.s32.totalorder %s6884_s8, 1  ;;  %s10446_s0 = sld [smem:[#allocation43_spill]]  ;;  %v10392_v3 = vmov 0.0|0.0   ;;  %v6791_v12 = vmov 1983009808   ;;  %v433_v14 = vlaneseq  ;;  %vm1883_vm4 = vcmask 1041408  }
  0x1a   : > { %s10391_s27 = smov 116   ;;  %s6774_s28 = smov 124   ;;  %v431_v13 = vunpack.c.l.s4 %v6791_v12  ;;  %v6792_v22 = vmov 1934713408   ;;  %vm1543_vm5 = vcmask 31744   ;;  %vm1592_vm6 = vcmask 64512  }
  0x1b   : > { %s329_s22 = scalar_select %p328_p10, %s6884_s8, 1  ;;  %v6980_v18 = vshrl.u32 %v433_v14, 7  ;;  %v495_v23 = vunpack.c.l.s4 %v6792_v22  ;;  %vm1625_vm7 = vcmask 97280   ;;  %vm1658_vm8 = vcmask 130048  }
  0x1c   : > { %s10388_s29 = smov 112   ;;  %s6776_s30 = smov 120   ;;  %v432_v17 = vunpack.c.0.s8 %v431_v13  ;;  %vm1691_vm9 = vcmask 162816   ;;  %vm1724_vm10 = vcmask 195584   ;;  %vm1757_vm11 = vcmask 228352  }
  0x1d   : > { %s5951_s23 = sshll.u32 %s329_s22, 4  ;;  %s6777_s10 = smov 104   ;;  %v496_v33 = vunpack.c.0.s8 %v495_v23  ;;  %vm1007_vm0 = vcmp.lt.s32.totalorder %v6980_v18, 1  ;;  %vm1040_vm1 = vcmp.eq.s32.totalorder %v6980_v18, 0  ;;  %vm1146_vm2 = vcmp.lt.s32.totalorder %v6980_v18, 7 }
  0x1e   : > { %s6778_s15 = smov 108   ;;  %s10389_s17 = smov 96   ;;  %v6989_v24 = vsub.s32 %v432_v17, %v6980_v18  ;;  %vm1790_vm12 = vcmask 261120   ;;  %vm1850_vm13 = vcmask 293888   ;;  %vm2466_vm14 = vcmask 523264  }
  0x1f   : > { %s332_s26 = scalar_lea.vmem %s10446_s0, %s5951_s23  ;;  %s6780_s18 = smov 100   ;;  %v7009_v43 = vsub.s32 %v496_v33, %v6980_v18  ;;  %vm3696_vm15 = vcmask 785408  }
  0x20   : > { %v6916_v1 = vld [vmem:[%s332_s26] sm:$0xff]  ;;  %s6781_s22 = smov 88   ;;  %s6782_s23 = smov 92   ;;  %v6933_v2 = vld [vmem:[%s332_s26 + $0x8] sm:$0xff]  ;;  %10450 = vst [vmem:[#allocation7_spill] sm:$0xff] %v6989_v24 }
  0x21   : > { %350 = vrot.lane.b32.xlu1 %v6916_v1, %s10391_s27  ;;  %338 = vrot.lane.b32.xlu0 %v6916_v1, %s6774_s28  ;;  %s6783_s24 = smov 80   ;;  %s6784_s25 = smov 84   ;;  %10451 = vst [vmem:[#allocation8_spill] sm:$0xff] %v7009_v43 }
  0x22   : > { %s6787_s27 = smov 68   ;;  %s10447_s0 = smov 116  }
  0x23   : > { %s10448_s26 = smov 112   ;;  %s10449_s19 = smov 96  }
  0x25   : > { %356 = vrot.lane.b32.xlu1 %v6916_v1, %s10388_s29  ;;  %344 = vrot.lane.b32.xlu0 %v6916_v1, %s6776_s30  ;;  %s6785_s29 = smov 72  }
  0x29   : > { %368 = vrot.lane.b32.xlu1 %v6916_v1, %s6777_s10  ;;  %362 = vrot.lane.b32.xlu0 %v6916_v1, %s6778_s15 }
  0x2d   : > { %380 = vrot.lane.b32.xlu1 %v6916_v1, %s10389_s17  ;;  %374 = vrot.lane.b32.xlu0 %v6916_v1, %s6780_s18  ;;  %s6786_s17 = smov 76  }
  0x31   : > { %392 = vrot.lane.b32.xlu1 %v6916_v1, %s6781_s22  ;;  %386 = vrot.lane.b32.xlu0 %v6916_v1, %s6782_s23 }
  0x35   : > { %404 = vrot.lane.b32.xlu1 %v6916_v1, %s6783_s24  ;;  %398 = vrot.lane.b32.xlu0 %v6916_v1, %s6784_s25 }
  0x39   : > { %416 = vrot.lane.b32.xlu1 %v6916_v1, %s6785_s29  ;;  %410 = vrot.lane.b32.xlu0 %v6916_v1, %s6786_s17 }
  0x3d   : > { %422 = vrot.lane.b32.xlu0 %v6916_v1, %s6787_s27  ;;  %340 = vrot.lane.b32.xlu1 %v6933_v2, %s6774_s28  ;;  %s6790_s28 = smov 8  }
  0x41   : > { %352 = vrot.lane.b32.xlu1 %v6933_v2, %s10447_s0  ;;  %346 = vrot.lane.b32.xlu0 %v6933_v2, %s6776_s30  ;;  %s6789_s0 = smov 4   ;;  %s6799_s30 = smov 64  }
  0x45   : > { %364 = vrot.lane.b32.xlu1 %v6933_v2, %s6778_s15  ;;  %358 = vrot.lane.b32.xlu0 %v6933_v2, %s10448_s26  ;;  %s6801_s15 = smov 36  }
  0x49   : > { %376 = vrot.lane.b32.xlu1 %v6933_v2, %s6780_s18  ;;  %370 = vrot.lane.b32.xlu0 %v6933_v2, %s6777_s10  ;;  %s10424_s18 = smov 12   ;;  %s10506_s10 = smov 12  }
  0x4d   : > { %388 = vrot.lane.b32.xlu1 %v6933_v2, %s6782_s23  ;;  %382 = vrot.lane.b32.xlu0 %v6933_v2, %s10449_s19  ;;  %s10418_s23 = smov 24  }
  0x51   : > { %400 = vrot.lane.b32.xlu1 %v6933_v2, %s6784_s25  ;;  %394 = vrot.lane.b32.xlu0 %v6933_v2, %s6781_s22  ;;  %s10420_s22 = smov 20   ;;  %s325_s25 = sand.u32 1, %s6763_s12  }
  0x52   : > { %s5823_s26 = sshll.u32 %s325_s25, 4 }
  0x55   : > { %412 = vrot.lane.b32.xlu1 %v6933_v2, %s6786_s17  ;;  %406 = vrot.lane.b32.xlu0 %v6933_v2, %s6783_s24  ;;  %s6798_s24 = smov 32   ;;  %s6803_s17 = smov 44  }
  0x59   : > { %424 = vrot.lane.b32.xlu1 %v6933_v2, %s6787_s27  ;;  %418 = vrot.lane.b32.xlu0 %v6933_v2, %s6785_s29  ;;  %s10422_s27 = smov 16   ;;  %s10416_s29 = smov 28  }
  0x5d   : > { %1252 = vrot.lane.b32.xlu0 %v10392_v3, %s6789_s0 }
  0x61   : > { %1300 = vrot.lane.b32.xlu0 %v10392_v3, %s6790_s28 }
  0x93   : > { %v6960_v4 = vpop.permute.xlu1 %350  ;;  %v6962_v5 = vpop.permute.xlu0 %338 }
  0x94   : > { %v444_v30 = vcombine.low %v6962_v5, %v6960_v4  ;;  %v445_v23 = vcombine.high %v6962_v5, %v6960_v4 }
  0x96   : > { %v452_v39 = vrot.slane %v444_v30, %v6989_v24 }
  0x97   : > { %v6964_v6 = vpop.permute.xlu1 %356  ;;  %v6966_v7 = vpop.permute.xlu0 %344 }
  0x98   : > { %v428_v25 = vcombine.low %v6916_v1, %v6966_v7 }
  0x9a   : > { %v436_v34 = vrot.slane %v428_v25, %v6989_v24 }
  0x9b   : > { %v6968_v8 = vpop.permute.xlu1 %368  ;;  %v6970_v9 = vpop.permute.xlu0 %362 }
  0x9c   : > { %v460_v26 = vcombine.low %v6964_v6, %v6968_v8  ;;  %v492_v44 = vcombine.low %v436_v34, %v452_v39  ;;  %v493_v58 = vcombine.high %v436_v34, %v452_v39 }
  0x9e   : > { %v468_v35 = vrot.slane %v460_v26, %v6989_v24  ;;  %v500_v50 = vrot.slane %v492_v44, %v7009_v43  ;;  %v7080_v26 = vrot.slane %v445_v23, %v6989_v24  ;;  %v7119_v44 = vadd.s32 8, %v6980_v18 }
  0x9f   : > { %v6972_v10 = vpop.permute.xlu1 %380  ;;  %v6974_v11 = vpop.permute.xlu0 %374 }
  0xa0   : > { %v476_v21 = vcombine.low %v6970_v9, %v6974_v11  ;;  %v477_v63 = vcombine.high %v6970_v9, %v6974_v11  ;;  %v507_v9 = vrot.slane %v493_v58, %v7009_v43  ;;  %v461_v11 = vcombine.high %v6964_v6, %v6968_v8 }
  0xa1   : > { %vm1180_vm3 = vcmp.eq.s32.totalorder %v7119_v44, 15 }
  0xa2   : > { %v484_v31 = vrot.slane %v476_v21, %v6989_v24  ;;  %v429_v21 = vcombine.high %v6916_v1, %v6966_v7  ;;  %v7054_v1 = vrot.slane %v477_v63, %v6989_v24  ;;  %v7070_v4 = vrot.slane %v461_v11, %v6989_v24 }
  0xa3   : > { %v6976_v15 = vpop.permute.xlu1 %392  ;;  %v6978_v16 = vpop.permute.xlu0 %386 }
  0xa4   : > { %v564_v32 = vcombine.low %v6972_v10, %v6976_v15  ;;  %v524_v40 = vcombine.low %v468_v35, %v484_v31  ;;  %v525_v54 = vcombine.high %v468_v35, %v484_v31 }
  0xa6   : > { %v572_v41 = vrot.slane %v564_v32, %v6989_v24  ;;  %v532_v48 = vrot.slane %v524_v40, %v7009_v43  ;;  %v539_v0 = vrot.slane %v525_v54, %v7009_v43 }
  0xa7   : > { %v6982_v19 = vpop.permute.xlu1 %404  ;;  %v6984_v20 = vpop.permute.xlu0 %398 }
  0xa8   : > { %v580_v27 = vcombine.low %v6978_v16, %v6984_v20  ;;  %v7017_v55 = vcombine.low %v500_v50, %v532_v48  ;;  %v7029_v12 = vcombine.high %v500_v50, %v532_v48  ;;  %v581_v13 = vcombine.high %v6978_v16, %v6984_v20  ;;  %v6512_v50 = vld [vmem:[%s10379_s1] sm:$0xff]  }
  0xa9   : > { %v565_v16 = vcombine.high %v6972_v10, %v6976_v15  ;;  %v7056_v7 = vcombine.low %v507_v9, %v539_v0  ;;  %v7067_v10 = vrot.slane %v429_v21, %v6989_v24  ;;  %v7094_v33 = vcombine.high %v507_v9, %v539_v0  ;;  %6328 = vmatprep.subr.bf16.mxu0 %v6512_v50 }
  0xaa   : > { %v588_v36 = vrot.slane %v580_v27, %v6989_v24  ;;  %10452 = vst [vmem:[#allocation9_spill] sm:$0xff] %v7017_v55  ;;  %10455 = vst [vmem:[#allocation12_spill] sm:$0xff] %v7029_v12  ;;  %v7059_v6 = vrot.slane %v581_v13, %v6989_v24  ;;  %v540_v27 = vcombine.low %v7070_v4, %v7054_v1  ;;  %v976_v58 = vrot.slane %v7029_v12, 7 }
  0xab   : > { %v411_v28 = vpop.permute.xlu0 %410  ;;  %v417_v29 = vpop.permute.xlu1 %416  ;;  %10457 = vst [vmem:[#allocation14_spill] sm:$0xff] %v7056_v7  ;;  %v7073_v5 = vrot.slane %v565_v16, %v6989_v24  ;;  %10459 = vst [vmem:[#allocation16_spill] sm:$0xff] %v7094_v33  ;;  %6329 = vmatpush3.bf16.msra.mxu0 %v6512_v50 }
  0xac   : > { %v596_v37 = vcombine.low %v6982_v19, %v417_v29  ;;  %v628_v45 = vcombine.low %v572_v41, %v588_v36  ;;  %v629_v56 = vcombine.high %v572_v41, %v588_v36  ;;  %v597_v17 = vcombine.high %v6982_v19, %v417_v29 }
  0xad   : > { %v508_v29 = vcombine.low %v7067_v10, %v7080_v26  ;;  %v548_v32 = vrot.slane %v540_v27, %v7009_v43  ;;  %v975_v41 = vrot.slane %v7017_v55, 7 }
  0xae   : > { %v604_v46 = vrot.slane %v596_v37, %v6989_v24  ;;  %v636_v51 = vrot.slane %v628_v45, %v7009_v43  ;;  %v643_v14 = vrot.slane %v629_v56, %v7009_v43  ;;  %v7062_v8 = vrot.slane %v597_v17, %v6989_v24 }
  0xaf   : > { %v423_v38 = vpop.permute.xlu0 %422  ;;  %v516_v35 = vrot.slane %v508_v29, %v7009_v43  ;;  %v1116_v29 = vrot.slane %v7056_v7, 1 }
  0xb0   : > { %v612_v42 = vcombine.low %v411_v28, %v423_v38  ;;  %v613_v59 = vcombine.high %v411_v28, %v423_v38  ;;  %v644_v28 = vcombine.low %v7073_v5, %v7059_v6 }
  0xb1   : > { %v7104_v38 = vcombine.low %v516_v35, %v548_v32 }
  0xb2   : > { %v620_v47 = vrot.slane %v612_v42, %v6989_v24  ;;  %v7045_v20 = vrot.slane %v613_v59, %v6989_v24  ;;  %v652_v34 = vrot.slane %v644_v28, %v7009_v43 }
  0xb3   : > { %10461 = vst [vmem:[#allocation18_spill] sm:$0xff] %v7104_v38 }
  0xb4   : > { %v660_v49 = vcombine.low %v604_v46, %v620_v47  ;;  %v661_v52 = vcombine.high %v604_v46, %v620_v47  ;;  %v676_v15 = vcombine.low %v7062_v8, %v7045_v20  ;;  %v1114_v47 = vrot.slane %v7017_v55, 1 }
  0xb6   : > { %v668_v53 = vrot.slane %v660_v49, %v7009_v43  ;;  %v675_v60 = vrot.slane %v661_v52, %v7009_v43  ;;  %v684_v30 = vrot.slane %v676_v15, %v7009_v43 }
  0xb8   : > { %v7019_v57 = vcombine.low %v636_v51, %v668_v53  ;;  %v7022_v61 = vcombine.high %v636_v51, %v668_v53  ;;  %v7047_v19 = vcombine.low %v643_v14, %v675_v60  ;;  %v7091_v31 = vcombine.high %v643_v14, %v675_v60 }
  0xb9   : > { %v7100_v36 = vcombine.low %v652_v34, %v684_v30  ;;  %v7123_v46 = vcombine.high %v652_v34, %v684_v30  ;;  %v7133_v51 = vcombine.high %v516_v35, %v548_v32  ;;  %v1115_v14 = vrot.slane %v7029_v12, 1  ;;  %v7187_v30 = vpop.permute.xlu1 %340 }
  0xba   : > { %10453 = vst [vmem:[#allocation10_spill] sm:$0xff] %v7019_v57  ;;  %10454 = vst [vmem:[#allocation11_spill] sm:$0xff] %v7022_v61  ;;  %v1098_v62 = vpack.c.bf16 %v7019_v57, %v7017_v55  ;;  %v1099_v22 = vpack.c.bf16 %v7022_v61, %v7029_v12  ;;  %v1100_v25 = vpack.c.bf16 %v7047_v19, %v7056_v7  ;;  %v991_v39 = vrot.slane %v7019_v57, 7 }
  0xbb   : > { %10456 = vst [vmem:[#allocation13_spill] sm:$0xff] %v7047_v19  ;;  %10458 = vst [vmem:[#allocation15_spill] sm:$0xff] %v7091_v31  ;;  %v1101_v37 = vpack.c.bf16 %v7091_v31, %v7094_v33  ;;  %v1102_v40 = vpack.c.bf16 %v7100_v36, %v7104_v38  ;;  %v1130_v45 = vrot.slane %v7019_v57, 1  ;;  %v992_v53 = vrot.slane %v7022_v61, 7 }
  0xbc   : > { %1381 = vrot.lane.b32.xlu0 %v1098_v62, %s10422_s27  ;;  %1254 = vrot.lane.b32.xlu1 %v1098_v62, %s6789_s0  ;;  %10460 = vst [vmem:[#allocation17_spill] sm:$0xff] %v7100_v36  ;;  %v1024_v42 = vsel %vm1007_vm0, %v991_v39, %v975_v41  ;;  %10462 = vst [vmem:[#allocation19_spill] sm:$0xff] %v7123_v46  ;;  %v1008_v48 = vsel %vm1007_vm0, %v975_v41, %v991_v39  ;;  %v6513_v62 = vld [vmem:[%s10379_s1 + $0x8] sm:$0xff]   ;;  %v1131_v0 = vrot.slane %v7022_v61, 1 }
  0xbd   : > { %v1048_v49 = vsel %vm1040_vm1, 0.0, %v1024_v42  ;;  %10463 = vst [vmem:[#allocation20_spill] sm:$0xff] %v7133_v51  ;;  %v1163_v52 = vsel %vm1146_vm2, %v1130_v45, %v1114_v47  ;;  %v7143_v54 = vpack.c.bf16 %v7123_v46, %v7133_v51  ;;  %v1147_v59 = vsel %vm1146_vm2, %v1114_v47, %v1130_v45  ;;  %6330 = vmatprep.subr.bf16.mxu0 %v6513_v62  ;;  %v7207_v42 = vpop.permute.xlu1 %352  ;;  %v7209_v45 = vpop.permute.xlu0 %346  ;;  %v6514_v47 = vld [vmem:[%s10379_s1 + $0x10] ss:$0 sps:$4 sm:$0x33]  }
  0xbe   : > { %v7145_v56 = vpack.c.bf16 %v1008_v48, %v1048_v49  ;;  %v1188_v60 = vsel %vm1180_vm3, 0.0, %v1163_v52  ;;  %v1025_v63 = vsel %vm1007_vm0, %v992_v53, %v976_v58  ;;  %6331 = vmatpush3.bf16.msra.mxu0 %v6513_v62  ;;  %v1009_v17 = vsel %vm1007_vm0, %v976_v58, %v992_v53 }
  0xbf   : > { %v1220_v13 = vpack.c.bf16 %v1188_v60, %v1147_v59  ;;  %v1050_v21 = vsel %vm1040_vm1, 0.0, %v1025_v63  ;;  %v1164_v9 = vsel %vm1146_vm2, %v1131_v0, %v1115_v14  ;;  %v993_v11 = vrot.slane %v7047_v19, 7  ;;  %6434 = vmatprep.subr.msk.bf16.mxu0 %vm1883_vm4, %v6514_v47 }
  0xc0   : > { %1479 = vrot.lane.b32.xlu0 %v1099_v22, %s10416_s29  ;;  %1383 = vrot.lane.b32.xlu1 %v1099_v22, %s10422_s27  ;;  %v7172_v16 = vpack.c.bf16 %v1009_v17, %v1050_v21  ;;  %v1148_v23 = vsel %vm1146_vm2, %v1115_v14, %v1131_v0  ;;  %v1190_v15 = vsel %vm1180_vm3, 0.0, %v1164_v9  ;;  %v1132_v27 = vrot.slane %v7047_v19, 1 }
  0xc1   : > { %v1221_v28 = vpack.c.bf16 %v1190_v15, %v1148_v23  ;;  %v994_v41 = vrot.slane %v7091_v31, 7  ;;  %v978_v49 = vrot.slane %v7094_v33, 7  ;;  %v1133_v52 = vrot.slane %v7091_v31, 1  ;;  %v7222_v59 = vpop.permute.xlu1 %364  ;;  %v7224_v60 = vpop.permute.xlu0 %358 }
  0xc2   : > { %v1165_v35 = vsel %vm1146_vm2, %v1132_v27, %v1116_v29  ;;  %v1149_v39 = vsel %vm1146_vm2, %v1116_v29, %v1132_v27  ;;  %v1885_v53 = vsel %vm1883_vm4, %v6514_v47, 0  ;;  %v1117_v58 = vrot.slane %v7094_v33, 1 }
  0xc3   : > { %v1027_v50 = vsel %vm1007_vm0, %v994_v41, %v978_v49  ;;  %6333 = vmatpush3.bf16.msra.mxu0 %v1885_v53  ;;  %v1011_v62 = vsel %vm1007_vm0, %v978_v49, %v994_v41  ;;  %v979_v17 = vrot.slane %v7104_v38, 7  ;;  %v1118_v27 = vrot.slane %v7104_v38, 1 }
  0xc4   : > { %1256 = vrot.lane.b32.xlu0 %v1099_v22, %s6789_s0  ;;  %1481 = vrot.lane.b32.xlu1 %v1100_v25, %s10416_s29  ;;  %v977_v22 = vrot.slane %v7056_v7, 7  ;;  %v1054_v63 = vsel %vm1040_vm1, 0.0, %v1027_v50  ;;  %v1166_v0 = vsel %vm1146_vm2, %v1133_v52, %v1117_v58  ;;  %v1150_v21 = vsel %vm1146_vm2, %v1117_v58, %v1133_v52 }
  0xc5   : > { %v7235_v14 = vpack.c.bf16 %v1011_v62, %v1054_v63  ;;  %v1194_v9 = vsel %vm1180_vm3, 0.0, %v1166_v0  ;;  %v7249_v23 = vpop.permute.xlu1 %376  ;;  %v7251_v15 = vpop.permute.xlu0 %370  ;;  %v980_v50 = vrot.slane %v7133_v51, 7  ;;  %v1135_v53 = vrot.slane %v7123_v46, 1 }
  0xc6   : > { %v1010_v32 = vsel %vm1007_vm0, %v977_v22, %v993_v11  ;;  %v1119_v0 = vrot.slane %v7133_v51, 1  ;;  %v717_v55 = vcombine.high %v7187_v30, %v7207_v42  ;;  %vm5735_vm4 = vcmask 457728  }
  0xc8   : > { %1385 = vrot.lane.b32.xlu0 %v1100_v25, %s10422_s27  ;;  %1258 = vrot.lane.b32.xlu1 %v1100_v25, %s6789_s0  ;;  %v1026_v25 = vsel %vm1007_vm0, %v993_v11, %v977_v22  ;;  %v1134_v22 = vrot.slane %v7100_v36, 1 }
  0xc9   : > { %v1052_v34 = vsel %vm1040_vm1, 0.0, %v1026_v25  ;;  %v1223_v25 = vpack.c.bf16 %v1194_v9, %v1150_v21  ;;  %v7270_v41 = vpop.permute.xlu1 %388  ;;  %v7272_v47 = vpop.permute.xlu0 %382  ;;  %v1168_v21 = vsel %vm1146_vm2, %v1135_v53, %v1119_v0 }
  0xcc   : > { %1483 = vrot.lane.b32.xlu0 %v1101_v37, %s10416_s29  ;;  %1387 = vrot.lane.b32.xlu1 %v1101_v37, %s10422_s27 }
  0xcd   : > { %v7299_v58 = vpop.permute.xlu1 %400  ;;  %v7301_v62 = vpop.permute.xlu0 %394 }
  0xd0   : > { %1260 = vrot.lane.b32.xlu0 %v1101_v37, %s6789_s0  ;;  %1485 = vrot.lane.b32.xlu1 %v1102_v40, %s10416_s29  ;;  %v7197_v37 = vpack.c.bf16 %v1010_v32, %v1052_v34  ;;  %v677_v32 = vcombine.high %v7062_v8, %v7045_v20  ;;  %v1167_v34 = vsel %vm1146_vm2, %v1134_v22, %v1118_v27 }
  0xd1   : > { %v1151_v20 = vsel %vm1146_vm2, %v1118_v27, %v1134_v22  ;;  %v1196_v8 = vsel %vm1180_vm3, 0.0, %v1167_v34  ;;  %v7321_v27 = vpop.permute.xlu0 %406 }
  0xd2   : > { %v1224_v49 = vpack.c.bf16 %v1196_v8, %v1151_v20  ;;  %v716_v8 = vcombine.low %v7187_v30, %v7207_v42  ;;  %v749_v30 = vcombine.high %v7222_v59, %v7249_v23 }
  0xd4   : > { %1389 = vrot.lane.b32.xlu0 %v1102_v40, %s10422_s27  ;;  %1262 = vrot.lane.b32.xlu1 %v1102_v40, %s6789_s0  ;;  %v1192_v40 = vsel %vm1180_vm3, 0.0, %v1165_v35  ;;  %v541_v35 = vcombine.high %v7070_v4, %v7054_v1  ;;  %v691_v1 = vrot.slane %v677_v32, %v7009_v43 }
  0xd5   : > { %v1222_v48 = vpack.c.bf16 %v1192_v40, %v1149_v39  ;;  %v645_v39 = vcombine.high %v7073_v5, %v7059_v6  ;;  %v996_v6 = vrot.slane %v7123_v46, 7 }
  0xd6   : > { %v7286_v4 = vrot.slane %v541_v35, %v7009_v43 }
  0xd7   : > { %v659_v5 = vrot.slane %v645_v39, %v7009_v43 }
  0xd8   : > { %1391 = vrot.lane.b32.xlu1 %v7143_v54, %s10422_s27  ;;  %1348 = vrot.lane.b32.xlu0 %v7145_v56, %s10424_s18 }
  0xdc   : > { %1302 = vrot.lane.b32.xlu1 %v1220_v13, %s6790_s28  ;;  %1414 = vrot.lane.b32.xlu0 %v1220_v13, %s10420_s22  ;;  %v995_v13 = vrot.slane %v7100_v36, 7 }
  0xde   : > { %v1028_v11 = vsel %vm1007_vm0, %v995_v13, %v979_v17 }
  0xdf   : > { %v1056_v29 = vsel %vm1040_vm1, 0.0, %v1028_v11 }
  0xe0   : > { %1350 = vrot.lane.b32.xlu1 %v7172_v16, %s10424_s18  ;;  %1447 = vrot.lane.b32.xlu0 %v7172_v16, %s10418_s23 }
  0xe4   : > { %1416 = vrot.lane.b32.xlu1 %v1221_v28, %s10420_s22  ;;  %1511 = vrot.lane.b32.xlu0 %v1221_v28, %s6798_s24 }
  0xe8   : > { %1449 = vrot.lane.b32.xlu1 %v7197_v37, %s10418_s23  ;;  %1304 = vrot.lane.b32.xlu0 %v1221_v28, %s6790_s28  ;;  %v1012_v28 = vsel %vm1007_vm0, %v979_v17, %v995_v13  ;;  %v1013_v13 = vsel %vm1007_vm0, %v980_v50, %v996_v6 }
  0xe9   : > { %v7268_v40 = vpack.c.bf16 %v1012_v28, %v1056_v29  ;;  %v1152_v28 = vsel %vm1146_vm2, %v1119_v0, %v1135_v53  ;;  %v1198_v29 = vsel %vm1180_vm3, 0.0, %v1168_v21  ;;  %v732_v0 = vcombine.low %v7224_v60, %v7251_v15 }
  0xea   : > { %v1225_v34 = vpack.c.bf16 %v1198_v29, %v1152_v28  ;;  %v7370_v28 = vrot.slane %v716_v8, %v6989_v24  ;;  %v7372_v29 = vcombine.high %v659_v5, %v691_v1 }
  0xeb   : > { %v7383_v3 = vrot.slane %v732_v0, %v6989_v24 }
  0xec   : > { %1513 = vrot.lane.b32.xlu1 %v1222_v48, %s6798_s24  ;;  %1352 = vrot.lane.b32.xlu0 %v7197_v37, %s10424_s18  ;;  %10466 = vst [vmem:[#allocation23_spill] sm:$0xff] %v7372_v29 }
  0xf0   : > { %1306 = vrot.lane.b32.xlu1 %v1222_v48, %s6790_s28  ;;  %1418 = vrot.lane.b32.xlu0 %v1222_v48, %s10420_s22  ;;  %v509_v48 = vcombine.high %v7067_v10, %v7080_v26  ;;  %v7291_v10 = vcombine.low %v659_v5, %v691_v1  ;;  %v1029_v26 = vsel %vm1007_vm0, %v996_v6, %v980_v50  ;;  %v7345_v6 = vpop.permute.xlu0 %418 }
  0xf1   : > { %v1058_v17 = vsel %vm1040_vm1, 0.0, %v1029_v26  ;;  %v748_v50 = vcombine.low %v7222_v59, %v7249_v23 }
  0xf2   : > { %v523_v52 = vrot.slane %v509_v48, %v7009_v43  ;;  %10464 = vst [vmem:[#allocation21_spill] sm:$0xff] %v7291_v10  ;;  %v997_v9 = vrot.slane %v7291_v10, 7  ;;  %v7316_v11 = vpack.c.bf16 %v1013_v13, %v1058_v17  ;;  %v1136_v20 = vrot.slane %v7291_v10, 1 }
  0xf3   : > { %v852_v13 = vcombine.low %v7270_v41, %v7299_v58  ;;  %v836_v17 = vcombine.low %v7272_v47, %v7301_v62 }
  0xf4   : > { %1354 = vrot.lane.b32.xlu1 %v7235_v14, %s10424_s18  ;;  %1451 = vrot.lane.b32.xlu0 %v7235_v14, %s10418_s23  ;;  %v7304_v63 = vcombine.low %v523_v52, %v7286_v4  ;;  %v7405_v0 = vcombine.high %v523_v52, %v7286_v4  ;;  %v7441_v36 = vpop.permute.xlu0 %1252 }
  0xf5   : > { %v7386_v46 = vrot.slane %v852_v13, %v6989_v24  ;;  %v7393_v5 = vrot.slane %v836_v17, %v6989_v24 }
  0xf6   : > { %10465 = vst [vmem:[#allocation22_spill] sm:$0xff] %v7304_v63  ;;  %v981_v22 = vrot.slane %v7304_v63, 7  ;;  %v1120_v53 = vrot.slane %v7304_v63, 1  ;;  %10467 = vst [vmem:[#allocation24_spill] sm:$0xff] %v7405_v0  ;;  %v982_v4 = vrot.slane %v7405_v0, 7  ;;  %v1121_v31 = vrot.slane %v7405_v0, 1 }
  0xf7   : > { %v900_v17 = vcombine.low %v7393_v5, %v7386_v46 }
  0xf8   : > { %1420 = vrot.lane.b32.xlu1 %v1223_v25, %s10420_s22  ;;  %1515 = vrot.lane.b32.xlu0 %v1223_v25, %s6798_s24  ;;  %v1030_v32 = vsel %vm1007_vm0, %v997_v9, %v981_v22  ;;  %v1014_v35 = vsel %vm1007_vm0, %v981_v22, %v997_v9  ;;  %v868_v9 = vcombine.low %v7321_v27, %v7345_v6 }
  0xf9   : > { %v1060_v39 = vsel %vm1040_vm1, 0.0, %v1030_v32  ;;  %v1169_v22 = vsel %vm1146_vm2, %v1136_v20, %v1120_v53  ;;  %v1153_v8 = vsel %vm1146_vm2, %v1120_v53, %v1136_v20 }
  0xfa   : > { %v7351_v26 = vpack.c.bf16 %v1014_v35, %v1060_v39  ;;  %v7378_v35 = vrot.slane %v748_v50, %v6989_v24  ;;  %v1104_v39 = vpack.c.bf16 %v7291_v10, %v7304_v63  ;;  %v1200_v1 = vsel %vm1180_vm3, 0.0, %v1169_v22 }
  0xfb   : > { %v7399_v50 = vrot.slane %v868_v9, %v6989_v24  ;;  %v1226_v20 = vpack.c.bf16 %v1200_v1, %v1153_v8  ;;  %v908_v22 = vrot.slane %v900_v17, %v7009_v43  ;;  %v1137_v17 = vrot.slane %v7372_v29, 1 }
  0xfc   : > { %1453 = vrot.lane.b32.xlu1 %v7268_v40, %s10418_s23  ;;  %1308 = vrot.lane.b32.xlu0 %v1223_v25, %s6790_s28  ;;  %v7319_v25 = vpop.permute.xlu1 %412  ;;  %v796_v13 = vcombine.low %v7383_v3, %v7378_v35 }
  0xfe   : > { %v804_v9 = vrot.slane %v796_v13, %v7009_v43 }
 0x100   : > { %1517 = vrot.lane.b32.xlu1 %v1224_v49, %s6798_s24  ;;  %1356 = vrot.lane.b32.xlu0 %v7268_v40, %s10424_s18  ;;  %v7343_v48 = vpop.permute.xlu1 %424 }
 0x101   : > { %v884_v21 = vcombine.low %v7319_v25, %v7343_v48  ;;  %v885_v23 = vcombine.high %v7319_v25, %v7343_v48 }
 0x104   : > { %1310 = vrot.lane.b32.xlu1 %v1224_v49, %s6790_s28  ;;  %1422 = vrot.lane.b32.xlu0 %v1224_v49, %s10420_s22  ;;  %v700_v49 = vcombine.low %v6933_v2, %v7209_v45 }
 0x106   : > { %v7375_v32 = vrot.slane %v700_v49, %v6989_v24  ;;  %v7396_v49 = vrot.slane %v884_v21, %v6989_v24 }
 0x108   : > { %1358 = vrot.lane.b32.xlu1 %v7316_v11, %s10424_s18  ;;  %1455 = vrot.lane.b32.xlu0 %v7316_v11, %s10418_s23  ;;  %v764_v53 = vcombine.low %v7375_v32, %v7370_v28  ;;  %v932_v21 = vcombine.low %v7399_v50, %v7396_v49 }
 0x10a   : > { %v772_v52 = vrot.slane %v764_v53, %v7009_v43  ;;  %v940_v8 = vrot.slane %v932_v21, %v7009_v43 }
 0x10c   : > { %1424 = vrot.lane.b32.xlu1 %v1225_v34, %s10420_s22  ;;  %1487 = vrot.lane.b32.xlu0 %v7143_v54, %s10416_s29  ;;  %v7432_v10 = vcombine.low %v772_v52, %v804_v9  ;;  %v7434_v13 = vcombine.low %v908_v22, %v940_v8  ;;  %v7495_v51 = vcombine.high %v908_v22, %v940_v8 }
 0x10e   : > { %10468 = vst [vmem:[#allocation25_spill] sm:$0xff] %v7432_v10  ;;  %10469 = vst [vmem:[#allocation26_spill] sm:$0xff] %v7434_v13  ;;  %v1000_v8 = vrot.slane %v7495_v51, 7 }
 0x10f   : > { %10472 = vst [vmem:[#allocation29_spill] sm:$0xff] %v7495_v51 }
 0x110   : > { %1457 = vrot.lane.b32.xlu1 %v7351_v26, %s10418_s23  ;;  %1519 = vrot.lane.b32.xlu0 %v1225_v34, %s6798_s24 }
 0x114   : > { %1489 = vrot.lane.b32.xlu1 %v1104_v39, %s10416_s29  ;;  %1264 = vrot.lane.b32.xlu0 %v7143_v54, %s6789_s0  ;;  %v998_v54 = vrot.slane %v7372_v29, 7 }
 0x116   : > { %v1015_v1 = vsel %vm1007_vm0, %v982_v4, %v998_v54 }
 0x118   : > { %1521 = vrot.lane.b32.xlu1 %v1226_v20, %s6798_s24  ;;  %1312 = vrot.lane.b32.xlu0 %v1225_v34, %s6790_s28  ;;  %v1031_v34 = vsel %vm1007_vm0, %v998_v54, %v982_v4  ;;  %v1170_v54 = vsel %vm1146_vm2, %v1137_v17, %v1121_v31  ;;  %v983_v4 = vrot.slane %v7432_v10, 7 }
 0x119   : > { %v1062_v53 = vsel %vm1040_vm1, 0.0, %v1031_v34  ;;  %v1105_v34 = vpack.c.bf16 %v7372_v29, %v7405_v0 }
 0x11a   : > { %v7439_v21 = vpack.c.bf16 %v1015_v1, %v1062_v53  ;;  %v1154_v1 = vsel %vm1146_vm2, %v1121_v31, %v1137_v17  ;;  %v1202_v53 = vsel %vm1180_vm3, 0.0, %v1170_v54  ;;  %v1122_v17 = vrot.slane %v7432_v10, 1 }
 0x11b   : > { %v1227_v61 = vpack.c.bf16 %v1202_v53, %v1154_v1  ;;  %v1138_v54 = vrot.slane %v7434_v13, 1  ;;  %v1106_v1 = vpack.c.bf16 %v7434_v13, %v7432_v10 }
 0x11c   : > { %1266 = vrot.lane.b32.xlu1 %v1104_v39, %s6789_s0  ;;  %1360 = vrot.lane.b32.xlu0 %v7351_v26, %s10424_s18 }
 0x11d   : > { %v1155_v53 = vsel %vm1146_vm2, %v1122_v17, %v1138_v54 }
 0x120   : > { %1314 = vrot.lane.b32.xlu1 %v1226_v20, %s6790_s28  ;;  %1393 = vrot.lane.b32.xlu0 %v1104_v39, %s10422_s27  ;;  %v999_v39 = vrot.slane %v7434_v13, 7  ;;  %v765_v13 = vcombine.high %v7375_v32, %v7370_v28 }
 0x122   : > { %v1032_v19 = vsel %vm1007_vm0, %v999_v39, %v983_v4  ;;  %v1016_v29 = vsel %vm1007_vm0, %v983_v4, %v999_v39 }
 0x123   : > { %v1064_v31 = vsel %vm1040_vm1, 0.0, %v1032_v19  ;;  %v1171_v19 = vsel %vm1146_vm2, %v1138_v54, %v1122_v17  ;;  %v797_v17 = vcombine.high %v7383_v3, %v7378_v35  ;;  %v7520_v3 = vrot.slane %v765_v13, %v7009_v43 }
 0x124   : > { %1362 = vrot.lane.b32.xlu1 %v7439_v21, %s10424_s18  ;;  %1426 = vrot.lane.b32.xlu0 %v1226_v20, %s10420_s22  ;;  %v7460_v20 = vpop.permute.xlu0 %1300  ;;  %v7476_v63 = vpack.c.bf16 %v1016_v29, %v1064_v31  ;;  %v1204_v29 = vsel %vm1180_vm3, 0.0, %v1171_v19  ;;  %v7493_v31 = vcombine.high %v772_v52, %v804_v9  ;;  %v901_v52 = vcombine.high %v7393_v5, %v7386_v46 }
 0x125   : > { %v1228_v7 = vpack.c.bf16 %v1204_v29, %v1155_v53  ;;  %v933_v9 = vcombine.high %v7399_v50, %v7396_v49  ;;  %v7523_v46 = vrot.slane %v797_v17, %v7009_v43  ;;  %v1139_v29 = vrot.slane %v7495_v51, 1 }
 0x126   : > { %10470 = vst [vmem:[#allocation27_spill] sm:$0xff] %v7476_v63  ;;  %10471 = vst [vmem:[#allocation28_spill] sm:$0xff] %v7493_v31  ;;  %v984_v22 = vrot.slane %v7493_v31, 7  ;;  %v7526_v32 = vrot.slane %v901_v52, %v7009_v43  ;;  %v1123_v53 = vrot.slane %v7493_v31, 1 }
 0x127   : > { %v7546_v54 = vcombine.low %v7520_v3, %v7523_v46 }
 0x128   : > { %1395 = vrot.lane.b32.xlu1 %v1105_v34, %s10422_s27  ;;  %1459 = vrot.lane.b32.xlu0 %v7439_v21, %s10418_s23  ;;  %v1033_v35 = vsel %vm1007_vm0, %v1000_v8, %v984_v22  ;;  %v1017_v50 = vsel %vm1007_vm0, %v984_v22, %v1000_v8 }
 0x129   : > { %v1066_v13 = vsel %vm1040_vm1, 0.0, %v1033_v35  ;;  %10473 = vst [vmem:[#allocation30_spill] sm:$0xff] %v7546_v54  ;;  %v985_v22 = vrot.slane %v7546_v54, 7 }
 0x12c   : > { %1428 = vrot.lane.b32.xlu1 %v1227_v61, %s10420_s22  ;;  %1491 = vrot.lane.b32.xlu0 %v1105_v34, %s10416_s29 }
 0x12e   : > { %v7472_v57 = vpop.permute.xlu1 %1254  ;;  %v7474_v0 = vpop.permute.xlu0 %1381 }
 0x130   : > { %1523 = vrot.lane.b32.xlu0 %v1227_v61, %s6798_s24  ;;  %1461 = vrot.lane.b32.xlu1 %v7476_v63, %s10418_s23 }
 0x132   : > { %v7483_v4 = vpop.permute.xlu1 %1383  ;;  %v7485_v39 = vpop.permute.xlu0 %1479 }
 0x134   : > { %1268 = vrot.lane.b32.xlu0 %v1105_v34, %s6789_s0  ;;  %1493 = vrot.lane.b32.xlu1 %v1106_v1, %s10416_s29 }
 0x136   : > { %v7499_v38 = vpop.permute.xlu1 %1481  ;;  %v7501_v33 = vpop.permute.xlu0 %1256 }
 0x138   : > { %1316 = vrot.lane.b32.xlu0 %v1227_v61, %s6790_s28  ;;  %1525 = vrot.lane.b32.xlu1 %v1228_v7, %s6798_s24  ;;  %v7529_v61 = vrot.slane %v933_v9, %v7009_v43  ;;  %v7560_v9 = vpack.c.bf16 %v1017_v50, %v1066_v13  ;;  %v1107_v50 = vpack.c.bf16 %v7495_v51, %v7493_v31  ;;  %v1546_v51 = vsel %vm1543_vm5, 0.0|0.0, %v7441_v36 }
 0x139   : > { %v1124_v36 = vrot.slane %v7546_v54, 1  ;;  %v1594_v59 = vsel %vm1592_vm6, %v1546_v51, %v7460_v20  ;;  %v869_v51 = vcombine.high %v7321_v27, %v7345_v6  ;;  %v7647_v27 = vrot.slane %v885_v23, %v6989_v24 }
 0x13a   : > { %v7515_v34 = vpop.permute.xlu1 %1258  ;;  %v7517_v28 = vpop.permute.xlu0 %1385  ;;  %v7550_v19 = vcombine.low %v7526_v32, %v7529_v61  ;;  %10475 = vst [vmem:[#allocation32_spill] sm:$0xff] %v7560_v9 }
 0x13c   : > { %1364 = vrot.lane.b32.xlu0 %v7476_v63, %s10424_s18  ;;  %1270 = vrot.lane.b32.xlu1 %v1106_v1, %s6789_s0  ;;  %10474 = vst [vmem:[#allocation31_spill] sm:$0xff] %v7550_v19  ;;  %v1001_v8 = vrot.slane %v7550_v19, 7  ;;  %v1140_v42 = vrot.slane %v7550_v19, 1 }
 0x13e   : > { %v7536_v5 = vpop.permute.xlu1 %1387  ;;  %v7538_v49 = vpop.permute.xlu0 %1483  ;;  %v1034_v12 = vsel %vm1007_vm0, %v1001_v8, %v985_v22 }
 0x13f   : > { %v1068_v63 = vsel %vm1040_vm1, 0.0, %v1034_v12  ;;  %v837_v12 = vcombine.high %v7272_v47, %v7301_v62 }
 0x140   : > { %1397 = vrot.lane.b32.xlu0 %v1106_v1, %s10422_s27  ;;  %1318 = vrot.lane.b32.xlu1 %v1228_v7, %s6790_s28  ;;  %v1172_v1 = vsel %vm1146_vm2, %v1139_v29, %v1123_v53 }
 0x141   : > { %v1206_v13 = vsel %vm1180_vm3, 0.0, %v1172_v1  ;;  %v701_v1 = vcombine.high %v6933_v2, %v7209_v45  ;;  %v733_v2 = vcombine.high %v7224_v60, %v7251_v15  ;;  %v853_v45 = vcombine.high %v7270_v41, %v7299_v58 }
 0x142   : > { %v7556_v17 = vpop.permute.xlu1 %1485  ;;  %v7558_v52 = vpop.permute.xlu0 %1260  ;;  %v7616_v60 = vrot.slane %v717_v55, %v6989_v24  ;;  %v7622_v41 = vrot.slane %v749_v30, %v6989_v24  ;;  %v1173_v55 = vsel %vm1146_vm2, %v1140_v42, %v1124_v36  ;;  %v7636_v58 = vcombine.high %v7520_v3, %v7523_v46 }
 0x143   : > { %v7619_v15 = vrot.slane %v701_v1, %v6989_v24  ;;  %v7632_v47 = vrot.slane %v733_v2, %v6989_v24  ;;  %v7639_v62 = vrot.slane %v853_v45, %v6989_v24  ;;  %v7644_v25 = vrot.slane %v837_v12, %v6989_v24 }
 0x144   : > { %1430 = vrot.lane.b32.xlu0 %v1228_v7, %s10420_s22  ;;  %1366 = vrot.lane.b32.xlu1 %v7560_v9, %s10424_s18  ;;  %v1156_v7 = vsel %vm1146_vm2, %v1123_v53, %v1139_v29  ;;  %10476 = vst [vmem:[#allocation33_spill] sm:$0xff] %v7636_v58  ;;  %v1108_v3 = vpack.c.bf16 %v7550_v19, %v7546_v54 }
 0x145   : > { %v1229_v29 = vpack.c.bf16 %v1206_v13, %v1156_v7  ;;  %v7662_v1 = vcombine.high %v7526_v32, %v7529_v61  ;;  %v1549_v30 = vsel %vm1543_vm5, %v7145_v56, %v7472_v57  ;;  %v780_v61 = vcombine.low %v7619_v15, %v7616_v60 }
 0x146   : > { %v7569_v35 = vpop.permute.xlu1 %1262  ;;  %v7571_v10 = vpop.permute.xlu0 %1389  ;;  %v812_v57 = vcombine.low %v7632_v47, %v7622_v41 }
 0x147   : > { %10477 = vst [vmem:[#allocation34_spill] sm:$0xff] %v7662_v1  ;;  %v1002_v23 = vrot.slane %v7662_v1, 7 }
 0x148   : > { %1463 = vrot.lane.b32.xlu0 %v7560_v9, %s10418_s23  ;;  %1399 = vrot.lane.b32.xlu1 %v1107_v50, %s10422_s27  ;;  %v1018_v9 = vsel %vm1007_vm0, %v985_v22, %v1001_v8 }
 0x149   : > { %v7613_v13 = vpack.c.bf16 %v1018_v9, %v1068_v63  ;;  %v1157_v9 = vsel %vm1146_vm2, %v1124_v36, %v1140_v42 }
 0x14a   : > { %v7588_v31 = vpop.permute.xlu1 %1391  ;;  %v1349_v53 = vpop.permute.xlu0 %1348 }
 0x14b   : > { %v1627_v22 = vsel %vm1625_vm7, %v1594_v59, %v1349_v53  ;;  %v7658_v53 = vrot.slane %v869_v51, %v6989_v24 }
 0x14c   : > { %1495 = vrot.lane.b32.xlu0 %v1107_v50, %s10416_s29  ;;  %1432 = vrot.lane.b32.xlu1 %v1229_v29, %s10420_s22  ;;  %v1660_v63 = vsel %vm1658_vm8, %v1627_v22, %v7474_v0  ;;  %v1208_v0 = vsel %vm1180_vm3, 0.0, %v1173_v55  ;;  %v7691_v55 = vrot.slane %v780_v61, %v7009_v43 }
 0x14d   : > { %v1230_v12 = vpack.c.bf16 %v1208_v0, %v1157_v9  ;;  %v948_v59 = vcombine.low %v7658_v53, %v7647_v27 }
 0x14e   : > { %v1303_v8 = vpop.permute.xlu1 %1302  ;;  %v1415_v7 = vpop.permute.xlu0 %1414 }
 0x14f   : > { %v1693_v48 = vsel %vm1691_vm9, %v1660_v63, %v1415_v7  ;;  %v1596_v36 = vsel %vm1592_vm6, %v1549_v30, %v1303_v8 }
 0x150   : > { %1527 = vrot.lane.b32.xlu0 %v1229_v29, %s6798_s24  ;;  %1465 = vrot.lane.b32.xlu1 %v7613_v13, %s10418_s23 }
 0x152   : > { %v1351_v6 = vpop.permute.xlu1 %1350  ;;  %v1448_v20 = vpop.permute.xlu0 %1447 }
 0x153   : > { %v1726_v46 = vsel %vm1724_vm10, %v1693_v48, %v1448_v20  ;;  %v1629_v42 = vsel %vm1625_vm7, %v1596_v36, %v1351_v6  ;;  %v7701_v6 = vrot.slane %v948_v59, %v7009_v43 }
 0x154   : > { %1272 = vrot.lane.b32.xlu0 %v1107_v50, %s6789_s0  ;;  %1497 = vrot.lane.b32.xlu1 %v1108_v3, %s10416_s29  ;;  %v1759_v32 = vsel %vm1757_vm11, %v1726_v46, %v7485_v39  ;;  %v916_v50 = vcombine.low %v7644_v25, %v7639_v62  ;;  %v986_v39 = vrot.slane %v7636_v58, 7  ;;  %v1662_v22 = vsel %vm1658_vm8, %v1629_v42, %v7483_v4 }
 0x156   : > { %v1417_v2 = vpop.permute.xlu1 %1416  ;;  %v1512_v45 = vpop.permute.xlu0 %1511  ;;  %v7698_v48 = vrot.slane %v916_v50, %v7009_v43  ;;  %v1035_v4 = vsel %vm1007_vm0, %v1002_v23, %v986_v39  ;;  %v1019_v36 = vsel %vm1007_vm0, %v986_v39, %v1002_v23 }
 0x157   : > { %v1792_v56 = vsel %vm1790_vm12, %v1759_v32, %v1512_v45  ;;  %v1695_v8 = vsel %vm1691_vm9, %v1662_v22, %v1417_v2  ;;  %v1070_v42 = vsel %vm1040_vm1, 0.0, %v1035_v4  ;;  %v1125_v45 = vrot.slane %v7636_v58, 1 }
 0x158   : > { %1320 = vrot.lane.b32.xlu0 %v1229_v29, %s6790_s28  ;;  %1529 = vrot.lane.b32.xlu1 %v1230_v12, %s6798_s24  ;;  %v7694_v29 = vrot.slane %v812_v57, %v7009_v43  ;;  %v7721_v2 = vcombine.low %v7698_v48, %v7701_v6  ;;  %v1141_v32 = vrot.slane %v7662_v1, 1  ;;  %v7733_v59 = vpack.c.bf16 %v1019_v36, %v1070_v42 }
 0x159   : > { %6334 = vmatprep.mubr.msk.bf16.mxu0 %vm1850_vm13, %v1792_v56  ;;  %v1555_v4 = vsel %vm1543_vm5, %v7197_v37, %v7515_v34 }
 0x15a   : > { %v1450_v7 = vpop.permute.xlu1 %1449  ;;  %v1305_v51 = vpop.permute.xlu0 %1304  ;;  %v7712_v0 = vcombine.low %v7691_v55, %v7694_v29  ;;  %10479 = vst [vmem:[#allocation36_spill] sm:$0xff] %v7721_v2 }
 0x15b   : > { %v1728_v63 = vsel %vm1724_vm10, %v1695_v8, %v1450_v7 }
 0x15c   : > { %1368 = vrot.lane.b32.xlu0 %v7613_v13, %s10424_s18  ;;  %1274 = vrot.lane.b32.xlu1 %v1108_v3, %s6789_s0  ;;  %v1761_v46 = vsel %vm1757_vm11, %v1728_v63, %v7499_v38  ;;  %10478 = vst [vmem:[#allocation35_spill] sm:$0xff] %v7712_v0  ;;  %v1552_v38 = vsel %vm1543_vm5, %v7172_v16, %v7501_v33  ;;  %v987_v16 = vrot.slane %v7712_v0, 7 }
 0x15d   : > { %v1598_v61 = vsel %vm1592_vm6, %v1552_v38, %v1305_v51  ;;  %v1174_v33 = vsel %vm1146_vm2, %v1141_v32, %v1125_v45  ;;  %v1158_v51 = vsel %vm1146_vm2, %v1125_v45, %v1141_v32  ;;  %v1126_v45 = vrot.slane %v7712_v0, 1 }
 0x15e   : > { %v1514_v20 = vpop.permute.xlu1 %1513  ;;  %v1353_v9 = vpop.permute.xlu0 %1352  ;;  %v1210_v63 = vsel %vm1180_vm3, 0.0, %v1174_v33  ;;  %v1142_v32 = vrot.slane %v7721_v2, 1 }
 0x15f   : > { %v1794_v30 = vsel %vm1790_vm12, %v1761_v46, %v1514_v20  ;;  %v1631_v57 = vsel %vm1625_vm7, %v1598_v61, %v1353_v9  ;;  %v1231_v42 = vpack.c.bf16 %v1210_v63, %v1158_v51  ;;  %v7796_v51 = vcombine.high %v7691_v55, %v7694_v29 }
 0x160   : > { %1401 = vrot.lane.b32.xlu0 %v1108_v3, %s10422_s27  ;;  %1322 = vrot.lane.b32.xlu1 %v1230_v12, %s6790_s28  ;;  %v1003_v3 = vrot.slane %v7721_v2, 7  ;;  %v1664_v39 = vsel %vm1658_vm8, %v1631_v57, %v7517_v28  ;;  %v813_v55 = vcombine.high %v7632_v47, %v7622_v41  ;;  %v917_v29 = vcombine.high %v7644_v25, %v7639_v62 }
 0x161   : > { %6335 = vmatmul.mubr.msk.bf16.vlgmr.msra.gmra.mrb[0].mxu0 %vm1850_vm13, %v1794_v30  ;;  %10480 = vst [vmem:[#allocation37_spill] sm:$0xff] %v7796_v51 }
 0x162   : > { %v1307_v56 = vpop.permute.xlu1 %1306  ;;  %v1419_v50 = vpop.permute.xlu0 %1418  ;;  %v1036_v28 = vsel %vm1007_vm0, %v1003_v3, %v987_v16  ;;  %v1020_v34 = vsel %vm1007_vm0, %v987_v16, %v1003_v3  ;;  %v1175_v16 = vsel %vm1146_vm2, %v1142_v32, %v1126_v45  ;;  %v7824_v62 = vrot.slane %v813_v55, %v7009_v43 }
 0x163   : > { %v1697_v23 = vsel %vm1691_vm9, %v1664_v39, %v1419_v50  ;;  %v1600_v20 = vsel %vm1592_vm6, %v1555_v4, %v1307_v56  ;;  %v1072_v38 = vsel %vm1040_vm1, 0.0, %v1036_v28  ;;  %v7827_v25 = vrot.slane %v917_v29, %v7009_v43 }
 0x164   : > { %1434 = vrot.lane.b32.xlu0 %v1230_v12, %s10420_s22  ;;  %1370 = vrot.lane.b32.xlu1 %v7733_v59, %s10424_s18  ;;  %v1109_v12 = vpack.c.bf16 %v7662_v1, %v7636_v58  ;;  %v7777_v50 = vpack.c.bf16 %v1020_v34, %v1072_v38 }
 0x166   : > { %v1355_v22 = vpop.permute.xlu1 %1354  ;;  %v1452_v8 = vpop.permute.xlu0 %1451 }
 0x167   : > { %v1730_v7 = vsel %vm1724_vm10, %v1697_v23, %v1452_v8  ;;  %v1633_v46 = vsel %vm1625_vm7, %v1600_v20, %v1355_v22  ;;  %v1110_v23 = vpack.c.bf16 %v7721_v2, %v7712_v0  ;;  %v1159_v8 = vsel %vm1146_vm2, %v1126_v45, %v1142_v32 }
 0x168   : > { %1467 = vrot.lane.b32.xlu0 %v7733_v59, %s10418_s23  ;;  %1403 = vrot.lane.b32.xlu1 %v1109_v12, %s10422_s27  ;;  %v1763_v30 = vsel %vm1757_vm11, %v1730_v7, %v7538_v49  ;;  %v1666_v49 = vsel %vm1658_vm8, %v1633_v46, %v7536_v5  ;;  %v1212_v7 = vsel %vm1180_vm3, 0.0, %v1175_v16  ;;  %v781_v20 = vcombine.high %v7619_v15, %v7616_v60 }
 0x169   : > { %v1232_v28 = vpack.c.bf16 %v1212_v7, %v1159_v8  ;;  %v1558_v60 = vsel %vm1543_vm5, %v7235_v14, %v7558_v52  ;;  %v1127_v45 = vrot.slane %v7796_v51, 1 }
 0x16a   : > { %v1421_v9 = vpop.permute.xlu1 %1420  ;;  %v1516_v36 = vpop.permute.xlu0 %1515  ;;  %v7821_v47 = vrot.slane %v781_v20, %v7009_v43 }
 0x16b   : > { %v1796_v37 = vsel %vm1790_vm12, %v1763_v30, %v1516_v36  ;;  %v1699_v61 = vsel %vm1691_vm9, %v1666_v49, %v1421_v9  ;;  %v1561_v49 = vsel %vm1543_vm5, %v7268_v40, %v7569_v35 }
 0x16c   : > { %1499 = vrot.lane.b32.xlu0 %v1109_v12, %s10416_s29  ;;  %1436 = vrot.lane.b32.xlu1 %v1231_v42, %s10420_s22  ;;  %v7841_v30 = vcombine.low %v7821_v47, %v7824_v62 }
 0x16d   : > { %6338 = vmatprep.mubr.msk.bf16.mxu0 %vm1850_vm13, %v1796_v37 }
 0x16e   : > { %v1454_v57 = vpop.permute.xlu1 %1453  ;;  %v1309_v56 = vpop.permute.xlu0 %1308  ;;  %10482 = vst [vmem:[#allocation39_spill] sm:$0xff] %v7841_v30  ;;  %v989_v35 = vrot.slane %v7841_v30, 7 }
 0x16f   : > { %v1732_v33 = vsel %vm1724_vm10, %v1699_v61, %v1454_v57 }
 0x170   : > { %1531 = vrot.lane.b32.xlu0 %v1231_v42, %s6798_s24  ;;  %1469 = vrot.lane.b32.xlu1 %v7777_v50, %s10418_s23  ;;  %v1765_v5 = vsel %vm1757_vm11, %v1732_v33, %v7556_v17  ;;  %v7800_v17 = vcombine.high %v7698_v48, %v7701_v6  ;;  %v949_v48 = vcombine.high %v7658_v53, %v7647_v27  ;;  %v988_v6 = vrot.slane %v7796_v51, 7 }
 0x171   : > { %v1602_v27 = vsel %vm1592_vm6, %v1558_v60, %v1309_v56 }
 0x172   : > { %v1518_v3 = vpop.permute.xlu1 %1517  ;;  %v1357_v39 = vpop.permute.xlu0 %1356  ;;  %10481 = vst [vmem:[#allocation38_spill] sm:$0xff] %v7800_v17  ;;  %v7831_v53 = vrot.slane %v949_v48, %v7009_v43  ;;  %v1111_v8 = vpack.c.bf16 %v7800_v17, %v7796_v51 }
 0x173   : > { %v1798_v22 = vsel %vm1790_vm12, %v1765_v5, %v1518_v3  ;;  %v1635_v46 = vsel %vm1625_vm7, %v1602_v27, %v1357_v39 }
 0x174   : > { %1276 = vrot.lane.b32.xlu0 %v1109_v12, %s6789_s0  ;;  %1501 = vrot.lane.b32.xlu1 %v1110_v23, %s10416_s29  ;;  %v1004_v12 = vrot.slane %v7800_v17, 7  ;;  %v1668_v36 = vsel %vm1658_vm8, %v1635_v46, %v7571_v10  ;;  %v7851_v34 = vcombine.low %v7827_v25, %v7831_v53  ;;  %v1143_v10 = vrot.slane %v7800_v17, 1 }
 0x175   : > { %6339 = vmatmul.mubr.msk.bf16.gmra.mrb[4].mxu0 %vm1850_vm13, %v1798_v22 }
 0x176   : > { %v1311_v63 = vpop.permute.xlu1 %1310  ;;  %v1423_v4 = vpop.permute.xlu0 %1422  ;;  %v1037_v14 = vsel %vm1007_vm0, %v1004_v12, %v988_v6  ;;  %10483 = vst [vmem:[#allocation40_spill] sm:$0xff] %v7851_v34  ;;  %v1176_v40 = vsel %vm1146_vm2, %v1143_v10, %v1127_v45  ;;  %v1005_v39 = vrot.slane %v7851_v34, 7  ;;  %v1144_v27 = vrot.slane %v7851_v34, 1 }
 0x177   : > { %v1074_v37 = vsel %vm1040_vm1, 0.0, %v1037_v14  ;;  %v1701_v38 = vsel %vm1691_vm9, %v1668_v36, %v1423_v4  ;;  %v1604_v16 = vsel %vm1592_vm6, %v1561_v49, %v1311_v63  ;;  %v1160_v63 = vsel %vm1146_vm2, %v1127_v45, %v1143_v10 }
 0x178   : > { %1533 = vrot.lane.b32.xlu1 %v1232_v28, %s6798_s24  ;;  %1324 = vrot.lane.b32.xlu0 %v1231_v42, %s6790_s28  ;;  %v1021_v42 = vsel %vm1007_vm0, %v988_v6, %v1004_v12  ;;  %v1214_v4 = vsel %vm1180_vm3, 0.0, %v1176_v40  ;;  %v1038_v20 = vsel %vm1007_vm0, %v1005_v39, %v989_v35  ;;  %v1022_v60 = vsel %vm1007_vm0, %v989_v35, %v1005_v39 }
 0x179   : > { %v7863_v33 = vpack.c.bf16 %v1021_v42, %v1074_v37  ;;  %v1233_v6 = vpack.c.bf16 %v1214_v4, %v1160_v63  ;;  %v1112_v37 = vpack.c.bf16 %v7851_v34, %v7841_v30  ;;  %v7917_v10 = vcombine.high %v7821_v47, %v7824_v62 }
 0x17a   : > { %v1359_v15 = vpop.permute.xlu1 %1358  ;;  %v1456_v41 = vpop.permute.xlu0 %1455 }
 0x17b   : > { %v1734_v32 = vsel %vm1724_vm10, %v1701_v38, %v1456_v41  ;;  %v1637_v3 = vsel %vm1625_vm7, %v1604_v16, %v1359_v15  ;;  %v1076_v15 = vsel %vm1040_vm1, 0.0, %v1038_v20  ;;  %v1128_v41 = vrot.slane %v7841_v30, 1  ;;  %10484 = vst [vmem:[#allocation41_spill] sm:$0xff] %v7917_v10 }
 0x17c   : > { %1278 = vrot.lane.b32.xlu1 %v1110_v23, %s6789_s0  ;;  %1372 = vrot.lane.b32.xlu0 %v7777_v50, %s10424_s18  ;;  %v1670_v7 = vsel %vm1658_vm8, %v1637_v3, %v7588_v31 }
 0x17d   : > { %v1161_v38 = vsel %vm1146_vm2, %v1128_v41, %v1144_v27 }
 0x17e   : > { %v1425_v52 = vpop.permute.xlu1 %1424  ;;  %v1488_v9 = vpop.permute.xlu0 %1487 }
 0x17f   : > { %v1767_v61 = vsel %vm1757_vm11, %v1734_v32, %v1488_v9  ;;  %v1177_v9 = vsel %vm1146_vm2, %v1144_v27, %v1128_v41  ;;  %v7921_v32 = vcombine.high %v7827_v25, %v7831_v53 }
 0x180   : > { %1326 = vrot.lane.b32.xlu1 %v1232_v28, %s6790_s28  ;;  %1405 = vrot.lane.b32.xlu0 %v1110_v23, %s10422_s27  ;;  %v1216_v45 = vsel %vm1180_vm3, 0.0, %v1177_v9 }
 0x181   : > { %10485 = vst [vmem:[#allocation42_spill] sm:$0xff] %v7921_v32  ;;  %v1006_v47 = vrot.slane %v7921_v32, 7  ;;  %v1113_v41 = vpack.c.bf16 %v7921_v32, %v7917_v10 }
 0x182   : > { %v1458_v57 = vpop.permute.xlu1 %1457  ;;  %v1520_v56 = vpop.permute.xlu0 %1519 }
 0x183   : > { %v1800_v5 = vsel %vm1790_vm12, %v1767_v61, %v1520_v56  ;;  %v990_v56 = vrot.slane %v7917_v10, 7 }
 0x184   : > { %1374 = vrot.lane.b32.xlu1 %v7863_v33, %s10424_s18  ;;  %1438 = vrot.lane.b32.xlu0 %v1232_v28, %s10420_s22  ;;  %v1703_v28 = vsel %vm1691_vm9, %v1670_v7, %v1425_v52  ;;  %v7902_v52 = vpack.c.bf16 %v1022_v60, %v1076_v15  ;;  %v1145_v7 = vrot.slane %v7921_v32, 1 }
 0x185   : > { %6342 = vmatprep.mubr.msk.bf16.mxu0 %vm1850_vm13, %v1800_v5  ;;  %v1736_v55 = vsel %vm1724_vm10, %v1703_v28, %v1458_v57  ;;  %v1234_v57 = vpack.c.bf16 %v1216_v45, %v1161_v38  ;;  %v1039_v53 = vsel %vm1007_vm0, %v1006_v47, %v990_v56 }
 0x186   : > { %v1490_v23 = vpop.permute.xlu1 %1489  ;;  %v1265_v22 = vpop.permute.xlu0 %1264 }
 0x187   : > { %v1769_v31 = vsel %vm1757_vm11, %v1736_v55, %v1490_v23  ;;  %v1564_v25 = vsel %vm1543_vm5, %v7316_v11, %v1265_v22  ;;  %v1023_v23 = vsel %vm1007_vm0, %v990_v56, %v1006_v47  ;;  %v1078_v11 = vsel %vm1040_vm1, 0.0, %v1039_v53 }
 0x188   : > { %1407 = vrot.lane.b32.xlu1 %v1111_v8, %s10422_s27  ;;  %1471 = vrot.lane.b32.xlu0 %v7863_v33, %s10418_s23  ;;  %v1096_v55 = vpack.c.bf16 %v1023_v23, %v1078_v11 }
 0x18a   : > { %v1522_v29 = vpop.permute.xlu1 %1521  ;;  %v1313_v48 = vpop.permute.xlu0 %1312 }
 0x18b   : > { %v1802_v12 = vsel %vm1790_vm12, %v1769_v31, %v1522_v29  ;;  %v1606_v5 = vsel %vm1592_vm6, %v1564_v25, %v1313_v48 }
 0x18c   : > { %1440 = vrot.lane.b32.xlu1 %v1233_v6, %s10420_s22  ;;  %1503 = vrot.lane.b32.xlu0 %v1111_v8, %s10416_s29 }
 0x18d   : > { %6343 = vmatmul.mubr.msk.bf16.gmra.mrb[8].mxu0 %vm1850_vm13, %v1802_v12 }
 0x18e   : > { %v1267_v46 = vpop.permute.xlu1 %1266  ;;  %v1361_v14 = vpop.permute.xlu0 %1360 }
 0x18f   : > { %v1639_v3 = vsel %vm1625_vm7, %v1606_v5, %v1361_v14  ;;  %v1567_v29 = vsel %vm1543_vm5, %v7351_v26, %v1267_v46 }
 0x190   : > { %1473 = vrot.lane.b32.xlu1 %v7902_v52, %s10418_s23  ;;  %1535 = vrot.lane.b32.xlu0 %v1233_v6, %s6798_s24 }
 0x192   : > { %v1315_v36 = vpop.permute.xlu1 %1314  ;;  %v1394_v42 = vpop.permute.xlu0 %1393 }
 0x193   : > { %v1672_v39 = vsel %vm1658_vm8, %v1639_v3, %v1394_v42 }
 0x194   : > { %1505 = vrot.lane.b32.xlu1 %v1112_v37, %s10416_s29  ;;  %1280 = vrot.lane.b32.xlu0 %v1111_v8, %s6789_s0  ;;  %v1129_v8 = vrot.slane %v7917_v10, 1 }
 0x196   : > { %v1363_v49 = vpop.permute.xlu1 %1362  ;;  %v1427_v61 = vpop.permute.xlu0 %1426  ;;  %v1178_v48 = vsel %vm1146_vm2, %v1145_v7, %v1129_v8  ;;  %v1162_v27 = vsel %vm1146_vm2, %v1129_v8, %v1145_v7 }
 0x197   : > { %v1705_v22 = vsel %vm1691_vm9, %v1672_v39, %v1427_v61  ;;  %v1218_v46 = vsel %vm1180_vm3, 0.0, %v1178_v48 }
 0x198   : > { %1537 = vrot.lane.b32.xlu1 %v1234_v57, %s6798_s24  ;;  %1328 = vrot.lane.b32.xlu0 %v1233_v6, %s6790_s28  ;;  %v1608_v6 = vsel %vm1592_vm6, %v1567_v29, %v1315_v36  ;;  %v1235_v38 = vpack.c.bf16 %v1218_v46, %v1162_v27 }
 0x199   : > { %v1641_v12 = vsel %vm1625_vm7, %v1608_v6, %v1363_v49 }
 0x19a   : > { %v1396_v62 = vpop.permute.xlu1 %1395  ;;  %v1460_v16 = vpop.permute.xlu0 %1459 }
 0x19b   : > { %v1738_v63 = vsel %vm1724_vm10, %v1705_v22, %v1460_v16  ;;  %v1674_v26 = vsel %vm1658_vm8, %v1641_v12, %v1396_v62 }
 0x19c   : > { %1282 = vrot.lane.b32.xlu1 %v1112_v37, %s6789_s0  ;;  %1376 = vrot.lane.b32.xlu0 %v7902_v52, %s10424_s18 }
 0x19e   : > { %v1429_v40 = vpop.permute.xlu1 %1428  ;;  %v1492_v35 = vpop.permute.xlu0 %1491 }
 0x19f   : > { %v1771_v4 = vsel %vm1757_vm11, %v1738_v63, %v1492_v35  ;;  %v1707_v14 = vsel %vm1691_vm9, %v1674_v26, %v1429_v40 }
 0x1a0   : > { %1330 = vrot.lane.b32.xlu1 %v1234_v57, %s6790_s28  ;;  %1409 = vrot.lane.b32.xlu0 %v1112_v37, %s10422_s27 }
 0x1a2   : > { %v1462_v28 = vpop.permute.xlu1 %1461  ;;  %v1524_v20 = vpop.permute.xlu0 %1523 }
 0x1a3   : > { %v1804_v31 = vsel %vm1790_vm12, %v1771_v4, %v1524_v20  ;;  %v1740_v9 = vsel %vm1724_vm10, %v1707_v14, %v1462_v28  ;;  %v10487_v4 = vld [vmem:[#allocation27_spill] sm:$0xff] }
 0x1a4   : > { %1378 = vrot.lane.b32.xlu1 %v1096_v55, %s10424_s18  ;;  %1442 = vrot.lane.b32.xlu0 %v1234_v57, %s10420_s22  ;;  %v10486_v57 = vmov 0.0|0.0   ;;  %s6802_s18 = smov 40  }
 0x1a5   : > { %6346 = vmatprep.mubr.msk.bf16.mxu0 %vm1850_vm13, %v1804_v31 }
 0x1a6   : > { %v1494_v60 = vpop.permute.xlu1 %1493  ;;  %v1269_v15 = vpop.permute.xlu0 %1268 }
 0x1a7   : > { %v1773_v36 = vsel %vm1757_vm11, %v1740_v9, %v1494_v60  ;;  %v1570_v5 = vsel %vm1543_vm5, %v7439_v21, %v1269_v15 }
 0x1a8   : > { %1411 = vrot.lane.b32.xlu1 %v1113_v41, %s10422_s27  ;;  %1475 = vrot.lane.b32.xlu0 %v1096_v55, %s10418_s23  ;;  %s10508_s27 = smov 16  }
 0x1aa   : > { %v1526_v42 = vpop.permute.xlu1 %1525  ;;  %v1317_v37 = vpop.permute.xlu0 %1316 }
 0x1ab   : > { %v1806_v45 = vsel %vm1790_vm12, %v1773_v36, %v1526_v42  ;;  %v1610_v3 = vsel %vm1592_vm6, %v1570_v5, %v1317_v37 }
 0x1ac   : > { %1444 = vrot.lane.b32.xlu1 %v1235_v38, %s10420_s22  ;;  %1507 = vrot.lane.b32.xlu0 %v1113_v41, %s10416_s29  ;;  %s10510_s22 = smov 24  }
 0x1ad   : > { %6347 = vmatmul.mubr.msk.bf16.gmra.mrb[12].mxu0 %vm1850_vm13, %v1806_v45  ;;  %v10488_v45 = vld [vmem:[#allocation32_spill] sm:$0xff] }
 0x1ae   : > { %v1271_v49 = vpop.permute.xlu1 %1270  ;;  %v1365_v61 = vpop.permute.xlu0 %1364 }
 0x1af   : > { %v1643_v40 = vsel %vm1625_vm7, %v1610_v3, %v1365_v61  ;;  %v1573_v28 = vsel %vm1543_vm5, %v10487_v4, %v1271_v49 }
 0x1b0   : > { %1477 = vrot.lane.b32.xlu1 %v10486_v57, %s10418_s23  ;;  %1539 = vrot.lane.b32.xlu0 %v1235_v38, %s6798_s24  ;;  %s10513_s23 = smov 28  }
 0x1b2   : > { %v1319_v56 = vpop.permute.xlu1 %1318  ;;  %v1398_v47 = vpop.permute.xlu0 %1397 }
 0x1b3   : > { %v1676_v23 = vsel %vm1658_vm8, %v1643_v40, %v1398_v47  ;;  %v1612_v20 = vsel %vm1592_vm6, %v1573_v28, %v1319_v56 }
 0x1b4   : > { %1509 = vrot.lane.b32.xlu1 %v10486_v57, %s10416_s29  ;;  %s10509_s29 = smov 20  }
 0x1b6   : > { %v1367_v62 = vpop.permute.xlu1 %1366  ;;  %v1431_v16 = vpop.permute.xlu0 %1430 }
 0x1b7   : > { %v1709_v11 = vsel %vm1691_vm9, %v1676_v23, %v1431_v16  ;;  %v1645_v55 = vsel %vm1625_vm7, %v1612_v20, %v1367_v62 }
 0x1b8   : > { %1541 = vrot.lane.b32.xlu1 %v10486_v57, %s6798_s24 }
 0x1ba   : > { %v1400_v25 = vpop.permute.xlu1 %1399  ;;  %v1464_v53 = vpop.permute.xlu0 %1463 }
 0x1bb   : > { %v1742_v22 = vsel %vm1724_vm10, %v1709_v11, %v1464_v53  ;;  %v1678_v48 = vsel %vm1658_vm8, %v1645_v55, %v1400_v25 }
 0x1bc   : > { %2335 = vrot.lane.b32.xlu1 %v10486_v57, %s6799_s30 }
 0x1be   : > { %v1433_v35 = vpop.permute.xlu1 %1432  ;;  %v1496_v39 = vpop.permute.xlu0 %1495 }
 0x1bf   : > { %v1775_v8 = vsel %vm1757_vm11, %v1742_v22, %v1496_v39  ;;  %v1711_v6 = vsel %vm1691_vm9, %v1678_v48, %v1433_v35 }
 0x1c2   : > { %v1466_v7 = vpop.permute.xlu1 %1465  ;;  %v1528_v21 = vpop.permute.xlu0 %1527 }
 0x1c3   : > { %v1808_v63 = vsel %vm1790_vm12, %v1775_v8, %v1528_v21  ;;  %v1744_v12 = vsel %vm1724_vm10, %v1711_v6, %v1466_v7 }
 0x1c4   : > { %6350 = vmatprep.mubr.msk.bf16.mxu0 %vm1850_vm13, %v1808_v63 }
 0x1c6   : > { %v1498_v31 = vpop.permute.xlu1 %1497  ;;  %v1273_v29 = vpop.permute.xlu0 %1272 }
 0x1c7   : > { %v1777_v60 = vsel %vm1757_vm11, %v1744_v12, %v1498_v31  ;;  %v1576_v49 = vsel %vm1543_vm5, %v10488_v45, %v1273_v29 }
 0x1ca   : > { %v1530_v15 = vpop.permute.xlu1 %1529  ;;  %v1321_v41 = vpop.permute.xlu0 %1320 }
 0x1cb   : > { %v1810_v26 = vsel %vm1790_vm12, %v1777_v60, %v1530_v15  ;;  %v1614_v61 = vsel %vm1592_vm6, %v1576_v49, %v1321_v41 }
 0x1cc   : > { %6351 = vmatmul.mubr.msk.bf16.gmra.mrb[16].mxu0 %vm1850_vm13, %v1810_v26 }
 0x1ce   : > { %v1275_v27 = vpop.permute.xlu1 %1274  ;;  %v1369_v46 = vpop.permute.xlu0 %1368 }
 0x1cf   : > { %v1647_v56 = vsel %vm1625_vm7, %v1614_v61, %v1369_v46  ;;  %v1579_v39 = vsel %vm1543_vm5, %v7613_v13, %v1275_v27 }
 0x1d2   : > { %v1323_v14 = vpop.permute.xlu1 %1322  ;;  %v1402_v9 = vpop.permute.xlu0 %1401 }
 0x1d3   : > { %v1680_v16 = vsel %vm1658_vm8, %v1647_v56, %v1402_v9  ;;  %v1616_v23 = vsel %vm1592_vm6, %v1579_v39, %v1323_v14 }
 0x1d6   : > { %v1371_v36 = vpop.permute.xlu1 %1370  ;;  %v1435_v42 = vpop.permute.xlu0 %1434 }
 0x1d7   : > { %v1713_v25 = vsel %vm1691_vm9, %v1680_v16, %v1435_v42  ;;  %v1649_v11 = vsel %vm1625_vm7, %v1616_v23, %v1371_v36 }
 0x1da   : > { %v1404_v37 = vpop.permute.xlu1 %1403  ;;  %v1468_v38 = vpop.permute.xlu0 %1467 }
 0x1db   : > { %v1746_v53 = vsel %vm1724_vm10, %v1713_v25, %v1468_v38  ;;  %v1682_v7 = vsel %vm1658_vm8, %v1649_v11, %v1404_v37 }
 0x1de   : > { %v1437_v47 = vpop.permute.xlu1 %1436  ;;  %v1500_v62 = vpop.permute.xlu0 %1499 }
 0x1df   : > { %v1779_v5 = vsel %vm1757_vm11, %v1746_v53, %v1500_v62  ;;  %v1715_v21 = vsel %vm1691_vm9, %v1682_v7, %v1437_v47  ;;  %v6517_v7 = vld [vmem:[%s10381_s3 + $0x48] sm:$0xff]  }
 0x1e2   : > { %v1470_v3 = vpop.permute.xlu1 %1469  ;;  %v1532_v40 = vpop.permute.xlu0 %1531 }
 0x1e3   : > { %v1812_v35 = vsel %vm1790_vm12, %v1779_v5, %v1532_v40  ;;  %v1748_v63 = vsel %vm1724_vm10, %v1715_v21, %v1470_v3  ;;  %v6518_v21 = vld [vmem:[%s10381_s3 + $0x8] sm:$0xff]  }
 0x1e4   : > { %6354 = vmatprep.mubr.msk.bf16.mxu0 %vm1850_vm13, %v1812_v35 }
 0x1e6   : > { %v1502_v22 = vpop.permute.xlu1 %1501  ;;  %v1277_v8 = vpop.permute.xlu0 %1276 }
 0x1e7   : > { %v1781_v4 = vsel %vm1757_vm11, %v1748_v63, %v1502_v22  ;;  %v1582_v41 = vsel %vm1543_vm5, %v7733_v59, %v1277_v8  ;;  %v6515_v22 = vld [vmem:[%s10381_s3 + $0x40] sm:$0xff]  }
 0x1e8   : > { %v6516_v8 = vld [vmem:[%s10381_s3] sm:$0xff]   ;;  %5972 = vmatprep.subr.bf16.mxu1 %v6515_v22  ;;  %v6530_v22 = vld [vmem:[%s10381_s3 + $0x38] sm:$0xff]  }
 0x1e9   : > { %5973 = vmatpush3.bf16.msra.mxu1 %v6516_v8 }
 0x1ea   : > { %v1534_v28 = vpop.permute.xlu1 %1533  ;;  %v1325_v20 = vpop.permute.xlu0 %1324  ;;  %5974 = vmatprep.subr.bf16.mxu1 %v6517_v7 }
 0x1eb   : > { %v1814_v13 = vsel %vm1790_vm12, %v1781_v4, %v1534_v28  ;;  %v1618_v26 = vsel %vm1592_vm6, %v1582_v41, %v1325_v20  ;;  %v6519_v28 = vld [vmem:[%s10381_s3 + $0x50] sm:$0xff]  }
 0x1ec   : > { %6355 = vmatmul.mubr.msk.bf16.gmra.mrb[20].mxu0 %vm1850_vm13, %v1814_v13 }
 0x1ed   : > { %5975 = vmatpush3.bf16.msra.mxu1 %v6518_v21 }
 0x1ee   : > { %v1279_v55 = vpop.permute.xlu1 %1278  ;;  %v1373_v31 = vpop.permute.xlu0 %1372  ;;  %5976 = vmatprep.subr.bf16.mxu1 %v6519_v28 }
 0x1ef   : > { %v1651_v27 = vsel %vm1625_vm7, %v1618_v26, %v1373_v31  ;;  %v1585_v59 = vsel %vm1543_vm5, %v7777_v50, %v1279_v55 }
 0x1f2   : > { %v1327_v29 = vpop.permute.xlu1 %1326  ;;  %v1406_v48 = vpop.permute.xlu0 %1405 }
 0x1f3   : > { %v1684_v9 = vsel %vm1658_vm8, %v1651_v27, %v1406_v48  ;;  %v1620_v61 = vsel %vm1592_vm6, %v1585_v59, %v1327_v29 }
 0x1f6   : > { %v1375_v6 = vpop.permute.xlu1 %1374  ;;  %v1439_v12 = vpop.permute.xlu0 %1438 }
 0x1f7   : > { %v1717_v36 = vsel %vm1691_vm9, %v1684_v9, %v1439_v12  ;;  %v1653_v56 = vsel %vm1625_vm7, %v1620_v61, %v1375_v6 }
 0x1fa   : > { %v1408_v60 = vpop.permute.xlu1 %1407  ;;  %v1472_v15 = vpop.permute.xlu0 %1471 }
 0x1fb   : > { %v1750_v42 = vsel %vm1724_vm10, %v1717_v36, %v1472_v15  ;;  %v1686_v16 = vsel %vm1658_vm8, %v1653_v56, %v1408_v60 }
 0x1fe   : > { %v1441_v46 = vpop.permute.xlu1 %1440  ;;  %v1504_v14 = vpop.permute.xlu0 %1503 }
 0x1ff   : > { %v1783_v37 = vsel %vm1757_vm11, %v1750_v42, %v1504_v14  ;;  %v1719_v25 = vsel %vm1691_vm9, %v1686_v16, %v1441_v46  ;;  %v6520_v14 = vld [vmem:[%s10381_s3 + $0x10] sm:$0xff]   ;;  %v6525_v16 = vld [vmem:[%s10381_s3 + $0x68] sm:$0xff]  }
 0x200   : > { %5977 = vmatpush3.bf16.msra.mxu1 %v6520_v14 }
 0x202   : > { %v1474_v38 = vpop.permute.xlu1 %1473  ;;  %v1536_v45 = vpop.permute.xlu0 %1535 }
 0x203   : > { %v1816_v49 = vsel %vm1790_vm12, %v1783_v37, %v1536_v45  ;;  %v1752_v53 = vsel %vm1724_vm10, %v1719_v25, %v1474_v38  ;;  %v6521_v38 = vld [vmem:[%s10381_s3 + $0x58] sm:$0xff]   ;;  %v6523_v45 = vld [vmem:[%s10381_s3 + $0x60] sm:$0xff]   ;;  %v6526_v25 = vld [vmem:[%s10381_s3 + $0x28] sm:$0xff]  }
 0x204   : > { %6358 = vmatprep.mubr.msk.bf16.mxu0 %vm1850_vm13, %v1816_v49  ;;  %5978 = vmatprep.subr.bf16.mxu1 %v6521_v38 }
 0x206   : > { %v1506_v47 = vpop.permute.xlu1 %1505  ;;  %v1281_v62 = vpop.permute.xlu0 %1280 }
 0x207   : > { %v1785_v5 = vsel %vm1757_vm11, %v1752_v53, %v1506_v47  ;;  %v1588_v55 = vsel %vm1543_vm5, %v7863_v33, %v1281_v62  ;;  %v6524_v47 = vld [vmem:[%s10381_s3 + $0x20] sm:$0xff]   ;;  %v6527_v53 = vld [vmem:[%s10381_s3 + $0x70] sm:$0xff]  }
 0x20a   : > { %v1538_v3 = vpop.permute.xlu1 %1537  ;;  %v1329_v40 = vpop.permute.xlu0 %1328 }
 0x20b   : > { %v1818_v50 = vsel %vm1790_vm12, %v1785_v5, %v1538_v3  ;;  %v1622_v31 = vsel %vm1592_vm6, %v1588_v55, %v1329_v40  ;;  %v8107_v5 = vld [vmem:[%s10380_s2] ss:$0 sm:$0xff]  ;;  %v6528_v3 = vld [vmem:[%s10381_s3 + $0x30] sm:$0xff]   ;;  %v6529_v40 = vld [vmem:[%s10381_s3 + $0x78] sm:$0xff]  }
 0x20c   : > { %6359 = vmatmul.mubr.msk.bf16.gmra.mrb[24].mxu0 %vm1850_vm13, %v1818_v50 }
 0x20e   : > { %v1283_v35 = vpop.permute.xlu1 %1282  ;;  %v1377_v39 = vpop.permute.xlu0 %1376 }
 0x20f   : > { %v1655_v29 = vsel %vm1625_vm7, %v1622_v31, %v1377_v39  ;;  %v1591_v33 = vsel %vm1543_vm5, %v7902_v52, %v1283_v35  ;;  %v6522_v52 = vld [vmem:[%s10381_s3 + $0x18] sm:$0xff]  }
 0x210   : > { %5979 = vmatpush3.bf16.msra.mxu1 %v6522_v52 }
 0x211   : > { %5980 = vmatprep.subr.bf16.mxu1 %v6523_v45 }
 0x212   : > { %v1331_v23 = vpop.permute.xlu1 %1330  ;;  %v1410_v11 = vpop.permute.xlu0 %1409 }
 0x213   : > { %v1688_v12 = vsel %vm1658_vm8, %v1655_v29, %v1410_v11  ;;  %v1624_v9 = vsel %vm1592_vm6, %v1591_v33, %v1331_v23 }
 0x214   : > { %5981 = vmatpush3.bf16.msra.mxu1 %v6524_v47 }
 0x215   : > { %5982 = vmatprep.subr.bf16.mxu1 %v6525_v16 }
 0x216   : > { %v1379_v63 = vpop.permute.xlu1 %1378  ;;  %v1443_v4 = vpop.permute.xlu0 %1442 }
 0x217   : > { %v1721_v60 = vsel %vm1691_vm9, %v1688_v12, %v1443_v4  ;;  %v1657_v36 = vsel %vm1625_vm7, %v1624_v9, %v1379_v63 }
 0x218   : > { %5983 = vmatpush3.bf16.msra.mxu1 %v6526_v25 }
 0x219   : > { %5984 = vmatprep.subr.bf16.mxu1 %v6527_v53 }
 0x21a   : > { %v1412_v20 = vpop.permute.xlu1 %1411  ;;  %v1476_v13 = vpop.permute.xlu0 %1475 }
 0x21b   : > { %v1754_v15 = vsel %vm1724_vm10, %v1721_v60, %v1476_v13  ;;  %v1690_v37 = vsel %vm1658_vm8, %v1657_v36, %v1412_v20 }
 0x21c   : > { %5985 = vmatpush3.bf16.msra.mxu1 %v6528_v3 }
 0x21d   : > { %5986 = vmatprep.subr.bf16.mxu1 %v6529_v40 }
 0x21e   : > { %v1445_v48 = vpop.permute.xlu1 %1444  ;;  %v1508_v6 = vpop.permute.xlu0 %1507 }
 0x21f   : > { %v1787_v41 = vsel %vm1757_vm11, %v1754_v15, %v1508_v6  ;;  %v1723_v49 = vsel %vm1691_vm9, %v1690_v37, %v1445_v48 }
 0x220   : > { %5987 = vmatpush3.bf16.msra.mxu1 %v6530_v22 }
 0x222   : > { %v1478_v26 = vpop.permute.xlu1 %1477  ;;  %v1540_v27 = vpop.permute.xlu0 %1539 }
 0x223   : > { %v1820_v46 = vsel %vm1790_vm12, %v1787_v41, %v1540_v27  ;;  %v1756_v59 = vsel %vm1724_vm10, %v1723_v49, %v1478_v26 }
 0x224   : > { %6362 = vmatprep.mubr.msk.bf16.mxu0 %vm1850_vm13, %v1820_v46 }
 0x226   : > { %v1510_v42 = vpop.permute.xlu1 %1509 }
 0x227   : > { %v1789_v61 = vsel %vm1757_vm11, %v1756_v59, %v1510_v42 }
 0x22a   : > { %v1542_v56 = vpop.permute.xlu1 %1541 }
 0x22b   : > { %v1822_v62 = vsel %vm1790_vm12, %v1789_v61, %v1542_v56 }
 0x22c   : > { %6363 = vmatmul.mubr.msk.bf16.gmra.mrb[28].mxu0 %vm1850_vm13, %v1822_v62 }
 0x234   : > { %v6336_v50 = vpop.f32.mrb[0].mxu0 }
 0x235   : > { %v1930_v35 = vadd.f32 %v6336_v50, %v8107_v5  ;;  %v1921_v39 = vpop.f32.mrb[1].mxu0 }
 0x236   : > { %v1922_v23 = vadd.f32 %v8107_v5, %v1921_v39  ;;  %v6337_v11 = vpop.f32.mrb[2].mxu0 }
 0x237   : > { %v2050_v8 = vmax.f32 %v1930_v35, 0.0  ;;  %v1933_v7 = vadd.f32 %v6337_v11, %v8107_v5  ;;  %v1924_v21 = vpop.f32.mrb[3].mxu0 }
 0x238   : > { %v2048_v63 = vmax.f32 %v1922_v23, 0.0  ;;  %v1925_v4 = vadd.f32 %v8107_v5, %v1924_v21 }
 0x239   : > { %v2051_v28 = vmax.f32 %v1933_v7, 0.0  ;;  %v2081_v20 = vrot.slane %v2050_v8, 7  ;;  %v2209_v13 = vrot.slane %v2050_v8, 1 }
 0x23a   : > { %v2049_v55 = vmax.f32 %v1925_v4, 0.0  ;;  %v2080_v31 = vrot.slane %v2048_v63, 7  ;;  %v2208_v12 = vrot.slane %v2048_v63, 1 }
 0x23b   : > { %v2097_v29 = vrot.slane %v2051_v28, 7  ;;  %v8122_v48 = vpack.c.bf16 %v2051_v28, %v2050_v8  ;;  %v2225_v6 = vrot.slane %v2051_v28, 1 }
 0x23c   : > { %v2096_v60 = vrot.slane %v2049_v55, 7  ;;  %v8124_v15 = vpack.c.bf16 %v2049_v55, %v2048_v63  ;;  %v2224_v41 = vrot.slane %v2049_v55, 1 }
 0x23d   : > { %v2113_v26 = vsel %vm1007_vm0, %v2081_v20, %v2097_v29  ;;  %v2129_v27 = vsel %vm1007_vm0, %v2097_v29, %v2081_v20  ;;  %v2241_v46 = vsel %vm1146_vm2, %v2209_v13, %v2225_v6  ;;  %v2257_v33 = vsel %vm1146_vm2, %v2225_v6, %v2209_v13 }
 0x23e   : > { %2337 = vrot.lane.b32.xlu1 %v8124_v15, %s6799_s30  ;;  %v2112_v14 = vsel %vm1007_vm0, %v2080_v31, %v2096_v60  ;;  %v2128_v9 = vsel %vm1007_vm0, %v2096_v60, %v2080_v31  ;;  %v2146_v36 = vsel %vm1040_vm1, 0.0, %v2129_v27  ;;  %v2240_v42 = vsel %vm1146_vm2, %v2208_v12, %v2224_v41 }
 0x23f   : > { %v2144_v37 = vsel %vm1040_vm1, 0.0, %v2128_v9  ;;  %v8146_v38 = vpack.c.bf16 %v2113_v26, %v2146_v36  ;;  %v2256_v52 = vsel %vm1146_vm2, %v2224_v41, %v2208_v12  ;;  %v2275_v45 = vsel %vm1180_vm3, 0.0, %v2257_v33 }
 0x240   : > { %v8152_v49 = vpack.c.bf16 %v2112_v14, %v2144_v37  ;;  %v2273_v59 = vsel %vm1180_vm3, 0.0, %v2256_v52  ;;  %v8156_v61 = vpack.c.bf16 %v2275_v45, %v2241_v46 }
 0x241   : > { %v8158_v56 = vpack.c.bf16 %v2273_v59, %v2240_v42 }
 0x242   : > { %2339 = vrot.lane.b32.xlu1 %v8122_v48, %s6799_s30  ;;  %2383 = vrot.lane.b32.xlu0 %v8152_v49, %s6799_s30 }
 0x246   : > { %2385 = vrot.lane.b32.xlu0 %v8146_v38, %s6799_s30 }
 0x248   : > { %v6340_v47 = vpop.f32.mrb[4].mxu0 }
 0x249   : > { %v1946_v62 = vadd.f32 %v6340_v47, %v8107_v5  ;;  %v1937_v16 = vpop.f32.mrb[5].mxu0 }
 0x24a   : > { %v1938_v25 = vadd.f32 %v8107_v5, %v1937_v16  ;;  %v6341_v53 = vpop.f32.mrb[6].mxu0 }
 0x24b   : > { %v2054_v3 = vmax.f32 %v1946_v62, 0.0  ;;  %v1949_v40 = vadd.f32 %v6341_v53, %v8107_v5  ;;  %v1940_v50 = vpop.f32.mrb[7].mxu0 }
 0x24c   : > { %v2052_v35 = vmax.f32 %v1938_v25, 0.0  ;;  %v1941_v39 = vadd.f32 %v8107_v5, %v1940_v50 }
 0x24d   : > { %v2055_v23 = vmax.f32 %v1949_v40, 0.0  ;;  %v2083_v11 = vrot.slane %v2054_v3, 7  ;;  %v2211_v22 = vrot.slane %v2054_v3, 1 }
 0x24e   : > { %v2053_v8 = vmax.f32 %v1941_v39, 0.0  ;;  %v2082_v7 = vrot.slane %v2052_v35, 7  ;;  %v2210_v28 = vrot.slane %v2052_v35, 1 }
 0x24f   : > { %v2099_v21 = vrot.slane %v2055_v23, 7  ;;  %v8170_v63 = vpack.c.bf16 %v2055_v23, %v2054_v3  ;;  %v2227_v4 = vrot.slane %v2055_v23, 1 }
 0x250   : > { %v2098_v20 = vrot.slane %v2053_v8, 7  ;;  %v8172_v13 = vpack.c.bf16 %v2053_v8, %v2052_v35  ;;  %v2226_v55 = vrot.slane %v2053_v8, 1 }
 0x251   : > { %v2115_v31 = vsel %vm1007_vm0, %v2083_v11, %v2099_v21  ;;  %v2131_v29 = vsel %vm1007_vm0, %v2099_v21, %v2083_v11  ;;  %v2243_v6 = vsel %vm1146_vm2, %v2211_v22, %v2227_v4  ;;  %v2259_v12 = vsel %vm1146_vm2, %v2227_v4, %v2211_v22 }
 0x252   : > { %2341 = vrot.lane.b32.xlu1 %v8172_v13, %s6799_s30  ;;  %v2114_v60 = vsel %vm1007_vm0, %v2082_v7, %v2098_v20  ;;  %v2130_v41 = vsel %vm1007_vm0, %v2098_v20, %v2082_v7  ;;  %v2150_v26 = vsel %vm1040_vm1, 0.0, %v2131_v29  ;;  %v2242_v27 = vsel %vm1146_vm2, %v2210_v28, %v2226_v55 }
 0x253   : > { %v2148_v46 = vsel %vm1040_vm1, 0.0, %v2130_v41  ;;  %v8194_v33 = vpack.c.bf16 %v2115_v31, %v2150_v26  ;;  %v2258_v14 = vsel %vm1146_vm2, %v2226_v55, %v2210_v28  ;;  %v2279_v9 = vsel %vm1180_vm3, 0.0, %v2259_v12 }
 0x254   : > { %v8200_v36 = vpack.c.bf16 %v2114_v60, %v2148_v46  ;;  %v2277_v42 = vsel %vm1180_vm3, 0.0, %v2258_v14  ;;  %v8204_v37 = vpack.c.bf16 %v2279_v9, %v2243_v6 }
 0x255   : > { %v8206_v52 = vpack.c.bf16 %v2277_v42, %v2242_v27 }
 0x256   : > { %2343 = vrot.lane.b32.xlu1 %v8170_v63, %s6799_s30  ;;  %2387 = vrot.lane.b32.xlu0 %v8200_v36, %s6799_s30 }
 0x25a   : > { %2389 = vrot.lane.b32.xlu0 %v8194_v33, %s6799_s30 }
 0x260   : > { %v6344_v45 = vpop.f32.mrb[8].mxu0 }
 0x261   : > { %v1962_v59 = vadd.f32 %v6344_v45, %v8107_v5  ;;  %v1953_v47 = vpop.f32.mrb[9].mxu0 }
 0x262   : > { %v1954_v62 = vadd.f32 %v8107_v5, %v1953_v47  ;;  %v6345_v16 = vpop.f32.mrb[10].mxu0 }
 0x263   : > { %v2058_v25 = vmax.f32 %v1962_v59, 0.0  ;;  %v1965_v53 = vadd.f32 %v6345_v16, %v8107_v5  ;;  %v1956_v3 = vpop.f32.mrb[11].mxu0 }
 0x264   : > { %v2056_v40 = vmax.f32 %v1954_v62, 0.0  ;;  %v1957_v50 = vadd.f32 %v8107_v5, %v1956_v3 }
 0x265   : > { %v2059_v35 = vmax.f32 %v1965_v53, 0.0  ;;  %v2085_v39 = vrot.slane %v2058_v25, 7  ;;  %v2213_v23 = vrot.slane %v2058_v25, 1 }
 0x266   : > { %v2057_v11 = vmax.f32 %v1957_v50, 0.0  ;;  %v2084_v22 = vrot.slane %v2056_v40, 7  ;;  %v2212_v4 = vrot.slane %v2056_v40, 1 }
 0x267   : > { %v2101_v8 = vrot.slane %v2059_v35, 7  ;;  %v8218_v7 = vpack.c.bf16 %v2059_v35, %v2058_v25  ;;  %v2229_v21 = vrot.slane %v2059_v35, 1 }
 0x268   : > { %v2100_v28 = vrot.slane %v2057_v11, 7  ;;  %v8220_v20 = vpack.c.bf16 %v2057_v11, %v2056_v40  ;;  %v2228_v55 = vrot.slane %v2057_v11, 1 }
 0x269   : > { %v2117_v31 = vsel %vm1007_vm0, %v2085_v39, %v2101_v8  ;;  %v2133_v29 = vsel %vm1007_vm0, %v2101_v8, %v2085_v39  ;;  %v2245_v6 = vsel %vm1146_vm2, %v2213_v23, %v2229_v21  ;;  %v2261_v12 = vsel %vm1146_vm2, %v2229_v21, %v2213_v23 }
 0x26a   : > { %2345 = vrot.lane.b32.xlu1 %v8220_v20, %s6799_s30  ;;  %v2116_v60 = vsel %vm1007_vm0, %v2084_v22, %v2100_v28  ;;  %v2132_v41 = vsel %vm1007_vm0, %v2100_v28, %v2084_v22  ;;  %v2154_v26 = vsel %vm1040_vm1, 0.0, %v2133_v29  ;;  %v2244_v27 = vsel %vm1146_vm2, %v2212_v4, %v2228_v55 }
 0x26b   : > { %v2152_v46 = vsel %vm1040_vm1, 0.0, %v2132_v41  ;;  %v8242_v14 = vpack.c.bf16 %v2117_v31, %v2154_v26  ;;  %v2260_v9 = vsel %vm1146_vm2, %v2228_v55, %v2212_v4  ;;  %v2283_v42 = vsel %vm1180_vm3, 0.0, %v2261_v12 }
 0x26c   : > { %v8248_v45 = vpack.c.bf16 %v2116_v60, %v2152_v46  ;;  %v2281_v59 = vsel %vm1180_vm3, 0.0, %v2260_v9  ;;  %v8252_v47 = vpack.c.bf16 %v2283_v42, %v2245_v6 }
 0x26d   : > { %v8254_v62 = vpack.c.bf16 %v2281_v59, %v2244_v27 }
 0x26e   : > { %2347 = vrot.lane.b32.xlu1 %v8218_v7, %s6799_s30  ;;  %2391 = vrot.lane.b32.xlu0 %v8248_v45, %s6799_s30 }
 0x272   : > { %2393 = vrot.lane.b32.xlu0 %v8242_v14, %s6799_s30 }
 0x280   : > { %v6348_v16 = vpop.f32.mrb[12].mxu0 }
 0x281   : > { %v1978_v25 = vadd.f32 %v6348_v16, %v8107_v5  ;;  %v1969_v53 = vpop.f32.mrb[13].mxu0 }
 0x282   : > { %v1970_v3 = vadd.f32 %v8107_v5, %v1969_v53  ;;  %v6349_v40 = vpop.f32.mrb[14].mxu0 }
 0x283   : > { %v2062_v50 = vmax.f32 %v1978_v25, 0.0  ;;  %v1981_v35 = vadd.f32 %v6349_v40, %v8107_v5  ;;  %v1972_v39 = vpop.f32.mrb[15].mxu0 }
 0x284   : > { %v2060_v23 = vmax.f32 %v1970_v3, 0.0  ;;  %v1973_v11 = vadd.f32 %v8107_v5, %v1972_v39 }
 0x285   : > { %v2063_v22 = vmax.f32 %v1981_v35, 0.0  ;;  %v2087_v8 = vrot.slane %v2062_v50, 7  ;;  %v2215_v21 = vrot.slane %v2062_v50, 1 }
 0x286   : > { %v2061_v4 = vmax.f32 %v1973_v11, 0.0  ;;  %v2086_v28 = vrot.slane %v2060_v23, 7  ;;  %v2214_v6 = vrot.slane %v2060_v23, 1 }
 0x287   : > { %v2103_v55 = vrot.slane %v2063_v22, 7  ;;  %v8266_v31 = vpack.c.bf16 %v2063_v22, %v2062_v50  ;;  %v2231_v29 = vrot.slane %v2063_v22, 1  ;;  %v8313_v22 = vld [vmem:[%s10381_s3 + $0x100] sm:$0xff]  }
 0x288   : > { %v2102_v12 = vrot.slane %v2061_v4, 7  ;;  %v8268_v60 = vpack.c.bf16 %v2061_v4, %v2060_v23  ;;  %v2230_v41 = vrot.slane %v2061_v4, 1  ;;  %6366 = vmatprep.subr.bf16.mxu1 %v8313_v22 }
 0x289   : > { %v2119_v26 = vsel %vm1007_vm0, %v2087_v8, %v2103_v55  ;;  %v2135_v27 = vsel %vm1007_vm0, %v2103_v55, %v2087_v8  ;;  %v2247_v46 = vsel %vm1146_vm2, %v2215_v21, %v2231_v29  ;;  %v2263_v9 = vsel %vm1146_vm2, %v2231_v29, %v2215_v21 }
 0x28a   : > { %2349 = vrot.lane.b32.xlu1 %v8268_v60, %s6799_s30  ;;  %v2118_v42 = vsel %vm1007_vm0, %v2086_v28, %v2102_v12  ;;  %v2134_v59 = vsel %vm1007_vm0, %v2102_v12, %v2086_v28  ;;  %v2158_v16 = vsel %vm1040_vm1, 0.0, %v2135_v27  ;;  %v2246_v25 = vsel %vm1146_vm2, %v2214_v6, %v2230_v41 }
 0x28b   : > { %v2156_v53 = vsel %vm1040_vm1, 0.0, %v2134_v59  ;;  %v8290_v3 = vpack.c.bf16 %v2119_v26, %v2158_v16  ;;  %v2262_v40 = vsel %vm1146_vm2, %v2230_v41, %v2214_v6  ;;  %v2287_v50 = vsel %vm1180_vm3, 0.0, %v2263_v9 }
 0x28c   : > { %v8296_v35 = vpack.c.bf16 %v2118_v42, %v2156_v53  ;;  %v2285_v39 = vsel %vm1180_vm3, 0.0, %v2262_v40  ;;  %v8300_v23 = vpack.c.bf16 %v2287_v50, %v2247_v46 }
 0x28d   : > { %v8302_v11 = vpack.c.bf16 %v2285_v39, %v2246_v25 }
 0x28e   : > { %2351 = vrot.lane.b32.xlu1 %v8266_v31, %s6799_s30  ;;  %2395 = vrot.lane.b32.xlu0 %v8296_v35, %s6799_s30 }
 0x292   : > { %2397 = vrot.lane.b32.xlu0 %v8290_v3, %s6799_s30 }
 0x29f   : > { %v6352_v8 = vpop.f32.mrb[16].mxu0 }
 0x2a0   : > { %v1994_v21 = vadd.f32 %v6352_v8, %v8107_v5  ;;  %v1985_v4 = vpop.f32.mrb[17].mxu0 }
 0x2a1   : > { %v1986_v28 = vadd.f32 %v8107_v5, %v1985_v4  ;;  %v6353_v55 = vpop.f32.mrb[18].mxu0 }
 0x2a2   : > { %v2066_v29 = vmax.f32 %v1994_v21, 0.0  ;;  %v1997_v6 = vadd.f32 %v6353_v55, %v8107_v5  ;;  %v1988_v12 = vpop.f32.mrb[19].mxu0 }
 0x2a3   : > { %v2064_v41 = vmax.f32 %v1986_v28, 0.0  ;;  %v1989_v26 = vadd.f32 %v8107_v5, %v1988_v12 }
 0x2a4   : > { %v2067_v27 = vmax.f32 %v1997_v6, 0.0  ;;  %v2089_v46 = vrot.slane %v2066_v29, 7  ;;  %v2217_v9 = vrot.slane %v2066_v29, 1 }
 0x2a5   : > { %v2065_v42 = vmax.f32 %v1989_v26, 0.0  ;;  %v2088_v59 = vrot.slane %v2064_v41, 7  ;;  %v2216_v40 = vrot.slane %v2064_v41, 1  ;;  %v6532_v26 = vld [vmem:[%s10381_s3 + $0xc0] sm:$0xff]  }
 0x2a6   : > { %v2105_v16 = vrot.slane %v2067_v27, 7  ;;  %v8320_v25 = vpack.c.bf16 %v2067_v27, %v2066_v29  ;;  %v2233_v53 = vrot.slane %v2067_v27, 1  ;;  %v2336_v27 = vpop.permute.xlu1 %2335  ;;  %6084 = vmatprep.subr.bf16.mxu0 %v6532_v26 }
 0x2a7   : > { %v2104_v50 = vrot.slane %v2065_v42, 7  ;;  %v8322_v39 = vpack.c.bf16 %v2065_v42, %v2064_v41  ;;  %v2232_v8 = vrot.slane %v2065_v42, 1  ;;  %v8386_v26 = vsel %vm2466_vm14, 0.0|0.0, %v2336_v27  ;;  %v6541_v27 = vld [vmem:[%s10381_s3 + $0x108] sm:$0xff]  }
 0x2a8   : > { %v2121_v21 = vsel %vm1007_vm0, %v2089_v46, %v2105_v16  ;;  %v2137_v4 = vsel %vm1007_vm0, %v2105_v16, %v2089_v46  ;;  %v2249_v28 = vsel %vm1146_vm2, %v2217_v9, %v2233_v53  ;;  %v2265_v55 = vsel %vm1146_vm2, %v2233_v53, %v2217_v9  ;;  %v6533_v16 = vld [vmem:[%s10381_s3 + $0x80] sm:$0xff]   ;;  %v6534_v53 = vld [vmem:[%s10381_s3 + $0xc8] sm:$0xff]  }
 0x2a9   : > { %2353 = vrot.lane.b32.xlu1 %v8322_v39, %s6799_s30  ;;  %v2120_v29 = vsel %vm1007_vm0, %v2088_v59, %v2104_v50  ;;  %v2136_v6 = vsel %vm1007_vm0, %v2104_v50, %v2088_v59  ;;  %v2162_v12 = vsel %vm1040_vm1, 0.0, %v2137_v4  ;;  %v2248_v41 = vsel %vm1146_vm2, %v2216_v40, %v2232_v8  ;;  %6085 = vmatpush3.bf16.msra.mxu0 %v6533_v16  ;;  %v6540_v16 = vld [vmem:[%s10381_s3 + $0xe0] sm:$0xff]  }
 0x2aa   : > { %v2160_v46 = vsel %vm1040_vm1, 0.0, %v2136_v6  ;;  %v8347_v9 = vpack.c.bf16 %v2121_v21, %v2162_v12  ;;  %v2264_v42 = vsel %vm1146_vm2, %v2232_v8, %v2216_v40  ;;  %v2291_v59 = vsel %vm1180_vm3, 0.0, %v2265_v55  ;;  %6086 = vmatprep.subr.bf16.mxu0 %v6534_v53  ;;  %v6535_v8 = vld [vmem:[%s10381_s3 + $0x88] sm:$0xff]   ;;  %v6538_v6 = vld [vmem:[%s10381_s3 + $0xd8] sm:$0xff]  }
 0x2ab   : > { %v8359_v50 = vpack.c.bf16 %v2120_v29, %v2160_v46  ;;  %v2289_v21 = vsel %vm1180_vm3, 0.0, %v2264_v42  ;;  %v8363_v4 = vpack.c.bf16 %v2291_v59, %v2249_v28  ;;  %v6536_v28 = vld [vmem:[%s10381_s3 + $0xd0] sm:$0xff]   ;;  %v6539_v46 = vld [vmem:[%s10381_s3 + $0x98] sm:$0xff]  }
 0x2ac   : > { %v8365_v40 = vpack.c.bf16 %v2289_v21, %v2248_v41  ;;  %v6537_v29 = vld [vmem:[%s10381_s3 + $0x90] sm:$0xff]  }
 0x2ad   : > { %2355 = vrot.lane.b32.xlu1 %v8320_v25, %s6799_s30  ;;  %2399 = vrot.lane.b32.xlu0 %v8359_v50, %s6799_s30 }
 0x2ae   : > { %6087 = vmatpush3.bf16.msra.mxu0 %v6535_v8  ;;  %v6543_v8 = vld [vmem:[%s10381_s3 + $0xe8] sm:$0xff]  }
 0x2af   : > { %6088 = vmatprep.subr.bf16.mxu0 %v6536_v28 }
 0x2b0   : > { %v2338_v55 = vpop.permute.xlu1 %2337 }
 0x2b1   : > { %2401 = vrot.lane.b32.xlu0 %v8347_v9, %s6799_s30  ;;  %v2472_v28 = vsel %vm2466_vm14, %v8152_v49, %v2338_v55  ;;  %v6546_v49 = vld [vmem:[%s10381_s3 + $0xb0] sm:$0xff]  }
 0x2b2   : > { %6089 = vmatpush3.bf16.msra.mxu0 %v6537_v29 }
 0x2b3   : > { %6090 = vmatprep.subr.bf16.mxu0 %v6538_v6 }
 0x2b4   : > { %v2340_v12 = vpop.permute.xlu1 %2339  ;;  %v2384_v41 = vpop.permute.xlu0 %2383 }
 0x2b5   : > { %v2532_v42 = vsel %vm2466_vm14, 0.0|0.0, %v2384_v41  ;;  %v8394_v59 = vsel %vm2466_vm14, %v8146_v38, %v2340_v12  ;;  %v6542_v38 = vld [vmem:[%s10381_s3 + $0xa0] sm:$0xff]  }
 0x2b6   : > { %3022 = vmatprep.mubr.bf16.mxu1 %v2532_v42  ;;  %3183 = vmatprep.mubr.bf16.mxu0 %v8394_v59  ;;  %v6545_v42 = vld [vmem:[%s10381_s3 + $0xf0] sm:$0xff]  }
 0x2b7   : > { %3023 = vmatmul.mubr.bf16.vlgmr.msra.gmra.mrb[0].mxu1 %v8386_v26  ;;  %6091 = vmatpush3.bf16.msra.mxu0 %v6539_v46 }
 0x2b8   : > { %v2386_v53 = vpop.permute.xlu0 %2385  ;;  %6367 = vmatpush3.bf16.msra.mxu1 %v8313_v22  ;;  %6092 = vmatprep.subr.bf16.mxu0 %v6540_v16  ;;  %v6544_v22 = vld [vmem:[%s10381_s3 + $0xa8] sm:$0xff]  }
 0x2b9   : > { %v2536_v21 = vsel %vm2466_vm14, %v8158_v56, %v2386_v53  ;;  %6368 = vmatprep.subr.bf16.mxu1 %v6541_v27 }
 0x2ba   : > { %3030 = vmatprep.mubr.bf16.mxu1 %v2536_v21 }
 0x2bb   : > { %6093 = vmatpush3.bf16.msra.mxu0 %v6542_v38 }
 0x2bc   : > { %6369 = vmatpush3.bf16.msra.mxu1 %v6541_v27  ;;  %6094 = vmatprep.subr.bf16.mxu0 %v6543_v8 }
 0x2bf   : > { %3031 = vmatmul.mubr.bf16.gmra.mrb[4].mxu1 %v2472_v28  ;;  %v6356_v29 = vpop.f32.mrb[20].mxu0  ;;  %6095 = vmatpush3.bf16.msra.mxu0 %v6544_v22 }
 0x2c0   : > { %v2010_v6 = vadd.f32 %v6356_v29, %v8107_v5  ;;  %v2001_v12 = vpop.f32.mrb[21].mxu0  ;;  %6096 = vmatprep.subr.bf16.mxu0 %v6545_v42  ;;  %v6547_v29 = vld [vmem:[%s10381_s3 + $0xf8] sm:$0xff]  }
 0x2c1   : > { %v2002_v41 = vadd.f32 %v8107_v5, %v2001_v12  ;;  %v6357_v46 = vpop.f32.mrb[22].mxu0 }
 0x2c2   : > { %v2070_v16 = vmax.f32 %v2010_v6, 0.0  ;;  %v2013_v27 = vadd.f32 %v6357_v46, %v8107_v5  ;;  %v2004_v53 = vpop.f32.mrb[23].mxu0  ;;  %v6548_v6 = vld [vmem:[%s10381_s3 + $0xb8] sm:$0xff]  }
 0x2c3   : > { %v2068_v55 = vmax.f32 %v2002_v41, 0.0  ;;  %v2005_v38 = vadd.f32 %v8107_v5, %v2004_v53  ;;  %6097 = vmatpush3.bf16.msra.mxu0 %v6546_v49 }
 0x2c4   : > { %v2071_v21 = vmax.f32 %v2013_v27, 0.0  ;;  %v2091_v8 = vrot.slane %v2070_v16, 7  ;;  %v2219_v22 = vrot.slane %v2070_v16, 1  ;;  %6098 = vmatprep.subr.bf16.mxu0 %v6547_v29 }
 0x2c5   : > { %v2069_v28 = vmax.f32 %v2005_v38, 0.0  ;;  %v2090_v12 = vrot.slane %v2068_v55, 7  ;;  %v2218_v53 = vrot.slane %v2068_v55, 1 }
 0x2c6   : > { %v2107_v46 = vrot.slane %v2071_v21, 7  ;;  %v8434_v32 = vpack.c.bf16 %v2071_v21, %v2070_v16  ;;  %v2235_v41 = vrot.slane %v2071_v21, 1 }
 0x2c7   : > { %v2106_v42 = vrot.slane %v2069_v28, 7  ;;  %v8436_v27 = vpack.c.bf16 %v2069_v28, %v2068_v55  ;;  %v2234_v49 = vrot.slane %v2069_v28, 1  ;;  %6099 = vmatpush3.bf16.msra.mxu0 %v6548_v6 }
 0x2c8   : > { %v2388_v38 = vpop.permute.xlu0 %2387  ;;  %v2123_v34 = vsel %vm1007_vm0, %v2091_v8, %v2107_v46  ;;  %v2139_v17 = vsel %vm1007_vm0, %v2107_v46, %v2091_v8  ;;  %v2251_v2 = vsel %vm1146_vm2, %v2219_v22, %v2235_v41  ;;  %v2267_v16 = vsel %vm1146_vm2, %v2235_v41, %v2219_v22 }
 0x2c9   : > { %2357 = vrot.lane.b32.xlu1 %v8436_v27, %s6799_s30  ;;  %v2540_v55 = vsel %vm2466_vm14, %v8156_v61, %v2388_v38  ;;  %v2122_v21 = vsel %vm1007_vm0, %v2090_v12, %v2106_v42  ;;  %v2138_v28 = vsel %vm1007_vm0, %v2106_v42, %v2090_v12  ;;  %v2166_v8 = vsel %vm1040_vm1, 0.0, %v2139_v17  ;;  %v6549_v17 = vld [vmem:[%s10381_s3 + $0x110] sm:$0xff]  }
 0x2ca   : > { %3038 = vmatprep.mubr.bf16.mxu1 %v2540_v55  ;;  %v2164_v22 = vsel %vm1040_vm1, 0.0, %v2138_v28  ;;  %v8458_v29 = vpack.c.bf16 %v2123_v34, %v2166_v8  ;;  %v2250_v6 = vsel %vm1146_vm2, %v2218_v53, %v2234_v49  ;;  %v2266_v41 = vsel %vm1146_vm2, %v2234_v49, %v2218_v53  ;;  %6370 = vmatprep.subr.bf16.mxu1 %v6549_v17  ;;  %v2342_v49 = vpop.permute.xlu1 %2341 }
 0x2cb   : > { %3039 = vmatmul.mubr.bf16.gmra.mrb[8].mxu1 %v8394_v59  ;;  %v8463_v46 = vpack.c.bf16 %v2122_v21, %v2164_v22  ;;  %v2295_v12 = vsel %vm1180_vm3, 0.0, %v2267_v16  ;;  %v2293_v34 = vsel %vm1180_vm3, 0.0, %v2266_v41  ;;  %v8486_v16 = vsel %vm2466_vm14, %v8200_v36, %v2342_v49 }
 0x2cc   : > { %v2390_v42 = vpop.permute.xlu0 %2389  ;;  %v8474_v38 = vpack.c.bf16 %v2295_v12, %v2251_v2  ;;  %v8480_v53 = vpack.c.bf16 %v2293_v34, %v2250_v6  ;;  %6371 = vmatpush3.bf16.msra.mxu1 %v6549_v17 }
 0x2cd   : > { %2403 = vrot.lane.b32.xlu0 %v8463_v46, %s6799_s30  ;;  %v2544_v59 = vsel %vm2466_vm14, %v8206_v52, %v2390_v42 }
 0x2ce   : > { %3046 = vmatprep.mubr.bf16.mxu1 %v2544_v59  ;;  %v2344_v2 = vpop.permute.xlu1 %2343 }
 0x2d1   : > { %2405 = vrot.lane.b32.xlu0 %v8458_v29, %s6799_s30 }
 0x2d3   : > { %3047 = vmatmul.mubr.bf16.gmra.mrb[12].mxu1 %v8486_v16 }
 0x2d5   : > { %2431 = vrot.lane.b32.xlu0 %v8158_v56, %s6799_s30  ;;  %v8499_v56 = vsel %vm2466_vm14, %v8194_v33, %v2344_v2 }
 0x2d9   : > { %2359 = vrot.lane.b32.xlu0 %v8434_v32, %s6799_s30 }
 0x2dc   : > { %v2346_v12 = vpop.permute.xlu1 %2345 }
 0x2dd   : > { %v8508_v33 = vsel %vm2466_vm14, %v8248_v45, %v2346_v12 }
 0x2df   : > { %v6360_v55 = vpop.f32.mrb[24].mxu0 }
 0x2e0   : > { %v2026_v21 = vadd.f32 %v6360_v55, %v8107_v5  ;;  %v2392_v28 = vpop.permute.xlu0 %2391  ;;  %v2017_v8 = vpop.f32.mrb[25].mxu0 }
 0x2e1   : > { %v2548_v22 = vsel %vm2466_vm14, %v8204_v37, %v2392_v28  ;;  %v2018_v36 = vadd.f32 %v8107_v5, %v2017_v8  ;;  %v6361_v41 = vpop.f32.mrb[26].mxu0 }
 0x2e2   : > { %v2074_v6 = vmax.f32 %v2026_v21, 0.0  ;;  %3054 = vmatprep.mubr.bf16.mxu1 %v2548_v22  ;;  %v2029_v17 = vadd.f32 %v6361_v41, %v8107_v5  ;;  %v2020_v42 = vpop.f32.mrb[27].mxu0 }
 0x2e3   : > { %3055 = vmatmul.mubr.bf16.gmra.mrb[16].mxu1 %v8499_v56  ;;  %v2072_v34 = vmax.f32 %v2018_v36, 0.0  ;;  %v2021_v59 = vadd.f32 %v8107_v5, %v2020_v42 }
 0x2e4   : > { %v2394_v49 = vpop.permute.xlu0 %2393  ;;  %v2075_v55 = vmax.f32 %v2029_v17, 0.0  ;;  %v2093_v28 = vrot.slane %v2074_v6, 7  ;;  %v2221_v8 = vrot.slane %v2074_v6, 1 }
 0x2e5   : > { %v2552_v21 = vsel %vm2466_vm14, %v8254_v62, %v2394_v49  ;;  %v2073_v22 = vmax.f32 %v2021_v59, 0.0  ;;  %v2092_v2 = vrot.slane %v2072_v34, 7  ;;  %v2220_v19 = vrot.slane %v2072_v34, 1 }
 0x2e6   : > { %3062 = vmatprep.mubr.bf16.mxu1 %v2552_v21  ;;  %v2109_v41 = vrot.slane %v2075_v55, 7  ;;  %v8510_v1 = vpack.c.bf16 %v2075_v55, %v2074_v6  ;;  %v2237_v36 = vrot.slane %v2075_v55, 1 }
 0x2e7   : > { %v2108_v42 = vrot.slane %v2073_v22, 7  ;;  %v8512_v10 = vpack.c.bf16 %v2073_v22, %v2072_v34  ;;  %v2236_v17 = vrot.slane %v2073_v22, 1 }
 0x2e8   : > { %v2125_v49 = vsel %vm1007_vm0, %v2093_v28, %v2109_v41  ;;  %v2141_v59 = vsel %vm1007_vm0, %v2109_v41, %v2093_v28  ;;  %v2253_v45 = vsel %vm1146_vm2, %v2221_v8, %v2237_v36  ;;  %v2269_v12 = vsel %vm1146_vm2, %v2237_v36, %v2221_v8 }
 0x2e9   : > { %v2170_v6 = vsel %vm1040_vm1, 0.0, %v2141_v59  ;;  %v2124_v34 = vsel %vm1007_vm0, %v2092_v2, %v2108_v42  ;;  %v2140_v55 = vsel %vm1007_vm0, %v2108_v42, %v2092_v2  ;;  %v2252_v21 = vsel %vm1146_vm2, %v2220_v19, %v2236_v17 }
 0x2ea   : > { %v8531_v28 = vpack.c.bf16 %v2125_v49, %v2170_v6  ;;  %v2168_v22 = vsel %vm1040_vm1, 0.0, %v2140_v55  ;;  %v2268_v8 = vsel %vm1146_vm2, %v2236_v17, %v2220_v19  ;;  %v2299_v41 = vsel %vm1180_vm3, 0.0, %v2269_v12  ;;  %v6550_v19 = vld [vmem:[%s10381_s3 + $0x118] sm:$0xff]   ;;  %v2348_v17 = vpop.permute.xlu1 %2347 }
 0x2eb   : > { %3063 = vmatmul.mubr.bf16.gmra.mrb[20].mxu1 %v8508_v33  ;;  %v8539_v36 = vpack.c.bf16 %v2124_v34, %v2168_v22  ;;  %v2297_v2 = vsel %vm1180_vm3, 0.0, %v2268_v8  ;;  %v8543_v42 = vpack.c.bf16 %v2299_v41, %v2253_v45  ;;  %6372 = vmatprep.subr.bf16.mxu1 %v6550_v19  ;;  %v8568_v8 = vsel %vm2466_vm14, %v8242_v14, %v2348_v17 }
 0x2ec   : > { %2409 = vrot.lane.b32.xlu0 %v8531_v28, %s6799_s30  ;;  %v8547_v49 = vpack.c.bf16 %v2297_v2, %v2252_v21  ;;  %6373 = vmatpush3.bf16.msra.mxu1 %v6550_v19 }
 0x2ed   : > { %2407 = vrot.lane.b32.xlu1 %v8539_v36, %s6799_s30 }
 0x2f0   : > { %2435 = vrot.lane.b32.xlu0 %v8206_v52, %s6799_s30 }
 0x2f1   : > { %2433 = vrot.lane.b32.xlu1 %v8156_v61, %s6799_s30 }
 0x2f4   : > { %2363 = vrot.lane.b32.xlu0 %v8510_v1, %s6799_s30 }
 0x2f5   : > { %2361 = vrot.lane.b32.xlu1 %v8512_v10, %s6799_s30 }
 0x2fc   : > { %v2350_v41 = vpop.permute.xlu1 %2349 }
 0x2fd   : > { %v8577_v14 = vsel %vm2466_vm14, %v8296_v35, %v2350_v41 }
 0x2ff   : > { %v6364_v59 = vpop.f32.mrb[28].mxu0 }
 0x300   : > { %v2042_v45 = vadd.f32 %v6364_v59, %v8107_v5  ;;  %v2396_v12 = vpop.permute.xlu0 %2395  ;;  %v2033_v6 = vpop.f32.mrb[29].mxu0 }
 0x301   : > { %v2556_v34 = vsel %vm2466_vm14, %v8252_v47, %v2396_v12  ;;  %v2034_v21 = vadd.f32 %v8107_v5, %v2033_v6  ;;  %v6365_v22 = vpop.f32.mrb[30].mxu0  ;;  %v2352_v44 = vpop.permute.xlu1 %2351 }
 0x302   : > { %v2078_v55 = vmax.f32 %v2042_v45, 0.0  ;;  %3070 = vmatprep.mubr.bf16.mxu1 %v2556_v34  ;;  %v2045_v2 = vadd.f32 %v6365_v22, %v8107_v5  ;;  %v2036_v19 = vpop.f32.mrb[31].mxu0 }
 0x303   : > { %3071 = vmatmul.mubr.bf16.gmra.mrb[24].mxu1 %v8568_v8  ;;  %v2076_v59 = vmax.f32 %v2034_v21, 0.0  ;;  %v2037_v30 = vadd.f32 %v8107_v5, %v2036_v19 }
 0x304   : > { %v2398_v51 = vpop.permute.xlu0 %2397  ;;  %v2079_v12 = vmax.f32 %v2045_v2, 0.0  ;;  %v2095_v6 = vrot.slane %v2078_v55, 7  ;;  %v2223_v34 = vrot.slane %v2078_v55, 1 }
 0x305   : > { %v2560_v45 = vsel %vm2466_vm14, %v8302_v11, %v2398_v51  ;;  %v2077_v0 = vmax.f32 %v2037_v30, 0.0  ;;  %v2094_v17 = vrot.slane %v2076_v59, 7  ;;  %v2222_v54 = vrot.slane %v2076_v59, 1 }
 0x306   : > { %3078 = vmatprep.mubr.bf16.mxu1 %v2560_v45  ;;  %v2111_v22 = vrot.slane %v2079_v12, 7  ;;  %v8579_v58 = vpack.c.bf16 %v2079_v12, %v2078_v55  ;;  %v2239_v21 = vrot.slane %v2079_v12, 1 }
 0x307   : > { %v2110_v5 = vrot.slane %v2077_v0, 7  ;;  %v8581_v19 = vpack.c.bf16 %v2077_v0, %v2076_v59  ;;  %v2238_v2 = vrot.slane %v2077_v0, 1 }
 0x308   : > { %v2127_v51 = vsel %vm1007_vm0, %v2095_v6, %v2111_v22  ;;  %v2143_v30 = vsel %vm1007_vm0, %v2111_v22, %v2095_v6  ;;  %v2255_v35 = vsel %vm1146_vm2, %v2223_v34, %v2239_v21  ;;  %v2271_v41 = vsel %vm1146_vm2, %v2239_v21, %v2223_v34 }
 0x309   : > { %v2174_v55 = vsel %vm1040_vm1, 0.0, %v2143_v30  ;;  %v2126_v59 = vsel %vm1007_vm0, %v2094_v17, %v2110_v5  ;;  %v2142_v0 = vsel %vm1007_vm0, %v2110_v5, %v2094_v17  ;;  %v2303_v12 = vsel %vm1180_vm3, 0.0, %v2271_v41 }
 0x30a   : > { %v8600_v45 = vpack.c.bf16 %v2127_v51, %v2174_v55  ;;  %v2172_v6 = vsel %vm1040_vm1, 0.0, %v2142_v0  ;;  %v8604_v34 = vpack.c.bf16 %v2303_v12, %v2255_v35  ;;  %v2254_v22 = vsel %vm1146_vm2, %v2222_v54, %v2238_v2 }
 0x30b   : > { %3079 = vmatmul.mubr.bf16.gmra.mrb[28].mxu1 %v8577_v14  ;;  %v8608_v21 = vpack.c.bf16 %v2126_v59, %v2172_v6  ;;  %v2270_v17 = vsel %vm1146_vm2, %v2238_v2, %v2222_v54  ;;  %v8642_v30 = vsel %vm2466_vm14, %v8290_v3, %v2352_v44  ;;  %vm5723_vm0 = vcmask 326656  }
 0x30c   : > { %2413 = vrot.lane.b32.xlu0 %v8600_v45, %s6799_s30  ;;  %v2301_v5 = vsel %vm1180_vm3, 0.0, %v2270_v17  ;;  %vm5726_vm1 = vcmask 359424   ;;  %vm5729_vm2 = vcmask 392192   ;;  %vm5732_vm3 = vcmask 424960  }
 0x30d   : > { %2411 = vrot.lane.b32.xlu1 %v8608_v21, %s6799_s30  ;;  %v8618_v51 = vpack.c.bf16 %v2301_v5, %v2254_v22 }
 0x310   : > { %2439 = vrot.lane.b32.xlu0 %v8254_v62, %s6799_s30 }
 0x311   : > { %2437 = vrot.lane.b32.xlu1 %v8204_v37, %s6799_s30 }
 0x314   : > { %2443 = vrot.lane.b32.xlu0 %v8302_v11, %s6799_s30 }
 0x315   : > { %2365 = vrot.lane.b32.xlu1 %v8581_v19, %s6799_s30 }
 0x318   : > { %2447 = vrot.lane.b32.xlu0 %v8365_v40, %s6799_s30 }
 0x319   : > { %2441 = vrot.lane.b32.xlu1 %v8252_v47, %s6799_s30 }
 0x31b   : > { %v2354_v55 = vpop.permute.xlu1 %2353 }
 0x31c   : > { %2451 = vrot.lane.b32.xlu0 %v8480_v53, %s6799_s30  ;;  %v8657_v3 = vsel %vm2466_vm14, %v8359_v50, %v2354_v55 }
 0x31d   : > { %2445 = vrot.lane.b32.xlu1 %v8300_v23, %s6799_s30 }
 0x31f   : > { %v2400_v54 = vpop.permute.xlu0 %2399  ;;  %v2356_v59 = vpop.permute.xlu1 %2355 }
 0x320   : > { %v2564_v2 = vsel %vm2466_vm14, %v8300_v23, %v2400_v54  ;;  %2455 = vrot.lane.b32.xlu0 %v8547_v49, %s6799_s30  ;;  %v8668_v6 = vsel %vm2466_vm14, %v8347_v9, %v2356_v59 }
 0x321   : > { %3086 = vmatprep.mubr.bf16.mxu1 %v2564_v2  ;;  %2449 = vrot.lane.b32.xlu1 %v8363_v4, %s6799_s30 }
 0x322   : > { %3087 = vmatmul.mubr.bf16.gmra.mrb[32].mxu1 %v8642_v30 }
 0x323   : > { %v2402_v35 = vpop.permute.xlu0 %2401 }
 0x324   : > { %v2568_v41 = vsel %vm2466_vm14, %v8365_v40, %v2402_v35  ;;  %2464 = vrot.lane.b32.xlu0 %v8579_v58, %s6799_s30 }
 0x325   : > { %3094 = vmatprep.mubr.bf16.mxu1 %v2568_v41  ;;  %2453 = vrot.lane.b32.xlu1 %v8474_v38, %s6799_s30 }
 0x328   : > { %2461 = vrot.lane.b32.xlu0 %v8604_v34, %s6799_s30 }
 0x329   : > { %2457 = vrot.lane.b32.xlu1 %v8543_v42, %s6799_s30 }
 0x32a   : > { %3095 = vmatmul.mubr.bf16.gmra.mrb[36].mxu1 %v8657_v3 }
 0x32d   : > { %2459 = vrot.lane.b32.xlu1 %v8618_v51, %s6799_s30 }
 0x33b   : > { %v2358_v17 = vpop.permute.xlu1 %2357 }
 0x33c   : > { %v8677_v54 = vsel %vm2466_vm14, %v8463_v46, %v2358_v17 }
 0x33f   : > { %v2404_v0 = vpop.permute.xlu0 %2403 }
 0x340   : > { %v2572_v12 = vsel %vm2466_vm14, %v8363_v4, %v2404_v0 }
 0x341   : > { %3102 = vmatprep.mubr.bf16.mxu1 %v2572_v12 }
 0x342   : > { %3103 = vmatmul.mubr.bf16.gmra.mrb[40].mxu1 %v8668_v6 }
 0x343   : > { %v2406_v50 = vpop.permute.xlu0 %2405 }
 0x344   : > { %v2576_v22 = vsel %vm2466_vm14, %v8480_v53, %v2406_v50 }
 0x345   : > { %3110 = vmatprep.mubr.bf16.mxu1 %v2576_v22 }
 0x347   : > { %v2432_v5 = vpop.permute.xlu0 %2431 }
 0x348   : > { %v2596_v44 = vsel %vm2466_vm14, %v8124_v15, %v2432_v5 }
 0x349   : > { %3184 = vmatmul.mubr.bf16.vlgmr.msra.gmra.mrb[32].mxu0 %v2596_v44 }
 0x34a   : > { %3111 = vmatmul.mubr.bf16.gmra.mrb[44].mxu1 %v8677_v54  ;;  %3191 = vmatprep.mubr.bf16.mxu0 %v8486_v16 }
 0x34b   : > { %v2360_v9 = vpop.permute.xlu0 %2359 }
 0x34c   : > { %v8685_v55 = vsel %vm2466_vm14, %v8458_v29, %v2360_v9 }
 0x35e   : > { %v2410_v2 = vpop.permute.xlu0 %2409 }
 0x35f   : > { %v2408_v35 = vpop.permute.xlu1 %2407  ;;  %v2584_v15 = vsel %vm2466_vm14, %v8547_v49, %v2410_v2 }
 0x360   : > { %v2580_v41 = vsel %vm2466_vm14, %v8474_v38, %v2408_v35 }
 0x361   : > { %3118 = vmatprep.mubr.bf16.mxu1 %v2580_v41 }
 0x362   : > { %3119 = vmatmul.mubr.bf16.gmra.mrb[48].mxu1 %v8685_v55  ;;  %v2436_v29 = vpop.permute.xlu0 %2435 }
 0x363   : > { %v2434_v46 = vpop.permute.xlu1 %2433  ;;  %3126 = vmatprep.mubr.bf16.mxu1 %v2584_v15  ;;  %v2604_v12 = vsel %vm2466_vm14, %v8172_v13, %v2436_v29 }
 0x364   : > { %v2600_v16 = vsel %vm2466_vm14, %v8122_v48, %v2434_v46 }
 0x365   : > { %3192 = vmatmul.mubr.bf16.gmra.mrb[36].mxu0 %v2600_v16 }
 0x366   : > { %3199 = vmatprep.mubr.bf16.mxu0 %v8499_v56  ;;  %v2364_v50 = vpop.permute.xlu0 %2363 }
 0x367   : > { %v2362_v59 = vpop.permute.xlu1 %2361 }
 0x368   : > { %v8695_v0 = vsel %vm2466_vm14, %v8539_v36, %v2362_v59  ;;  %v8705_v36 = vsel %vm2466_vm14, %v8531_v28, %v2364_v50 }
 0x36a   : > { %3127 = vmatmul.mubr.bf16.gmra.mrb[52].mxu1 %v8695_v0 }
 0x36d   : > { %3200 = vmatmul.mubr.bf16.gmra.mrb[40].mxu0 %v2604_v12 }
 0x36e   : > { %3207 = vmatprep.mubr.bf16.mxu0 %v8508_v33 }
 0x37e   : > { %v2414_v22 = vpop.permute.xlu0 %2413 }
 0x37f   : > { %v2412_v48 = vpop.permute.xlu1 %2411  ;;  %v2592_v17 = vsel %vm2466_vm14, %v8618_v51, %v2414_v22 }
 0x380   : > { %v2588_v56 = vsel %vm2466_vm14, %v8543_v42, %v2412_v48 }
 0x381   : > { %3134 = vmatprep.mubr.bf16.mxu1 %v2588_v56 }
 0x382   : > { %3135 = vmatmul.mubr.bf16.gmra.mrb[56].mxu1 %v8705_v36  ;;  %v2440_v28 = vpop.permute.xlu0 %2439 }
 0x383   : > { %v2438_v13 = vpop.permute.xlu1 %2437  ;;  %3142 = vmatprep.mubr.bf16.mxu1 %v2592_v17 }
 0x384   : > { %v2608_v33 = vsel %vm2466_vm14, %v8170_v63, %v2438_v13  ;;  %v2612_v63 = vsel %vm2466_vm14, %v8220_v20, %v2440_v28 }
 0x385   : > { %3208 = vmatmul.mubr.bf16.gmra.mrb[44].mxu0 %v2608_v33 }
 0x386   : > { %3215 = vmatprep.mubr.bf16.mxu0 %v8568_v8 }
 0x387   : > { %v2366_v5 = vpop.permute.xlu1 %2365 }
 0x388   : > { %v8715_v44 = vsel %vm2466_vm14, %v8608_v21, %v2366_v5 }
 0x38a   : > { %v5988_v9 = vpop.f32.mrb[0].mxu1  ;;  %3143 = vmatmul.mubr.bf16.gmra.mrb[60].mxu1 %v8715_v44 }
 0x38b   : > { %v5989_v2 = vpop.f32.mrb[1].mxu1  ;;  %6374 = vmatprep.mubr.msk.bf16.mxu1 %vm2466_vm14, %v8156_v61  ;;  %v2442_v21 = vpop.permute.xlu1 %2441 }
 0x38c   : > { %v8720_v35 = vadd.f32 %v5989_v2, %v5988_v9  ;;  %v5991_v41 = vpop.f32.mrb[2].mxu1  ;;  %v2616_v20 = vsel %vm2466_vm14, %v8218_v7, %v2442_v21 }
 0x38d   : > { %v5992_v8 = vpop.f32.mrb[3].mxu1  ;;  %3216 = vmatmul.mubr.bf16.gmra.mrb[48].mxu0 %v2612_v63 }
 0x38e   : > { %v8724_v15 = vadd.f32 %v5992_v8, %v5991_v41  ;;  %3223 = vmatprep.mubr.bf16.mxu0 %v8577_v14  ;;  %v2444_v14 = vpop.permute.xlu0 %2443 }
 0x392   : > { %v5994_v46 = vpop.f32.mrb[4].mxu1  ;;  %6375 = vmatmul.mubr.msk.bf16.vlgmr.msra.gmra.mrb[64].mxu1 %vm2466_vm14, %v8206_v52  ;;  %v2620_v52 = vsel %vm2466_vm14, %v8268_v60, %v2444_v14  ;;  %v2448_v33 = vpop.permute.xlu0 %2447 }
 0x393   : > { %v5995_v16 = vpop.f32.mrb[5].mxu1  ;;  %6378 = vmatprep.mubr.msk.bf16.mxu1 %vm2466_vm14, %v8204_v37 }
 0x394   : > { %v8729_v59 = vadd.f32 %v5995_v16, %v5994_v46  ;;  %v5997_v61 = vpop.f32.mrb[6].mxu1 }
 0x395   : > { %v5998_v29 = vpop.f32.mrb[7].mxu1  ;;  %3224 = vmatmul.mubr.bf16.gmra.mrb[52].mxu0 %v2616_v20 }
 0x396   : > { %v8735_v12 = vadd.f32 %v5998_v29, %v5997_v61  ;;  %3231 = vmatprep.mubr.bf16.mxu0 %v8642_v30  ;;  %v2446_v30 = vpop.permute.xlu1 %2445 }
 0x39a   : > { %6379 = vmatmul.mubr.msk.bf16.gmra.mrb[68].mxu1 %vm2466_vm14, %v8254_v62 }
 0x39b   : > { %6382 = vmatprep.mubr.msk.bf16.mxu1 %vm2466_vm14, %v8252_v47  ;;  %v2624_v47 = vsel %vm2466_vm14, %v8266_v31, %v2446_v30  ;;  %v2628_v31 = vsel %vm2466_vm14, %v8322_v39, %v2448_v33 }
 0x39d   : > { %3232 = vmatmul.mubr.bf16.gmra.mrb[56].mxu0 %v2620_v52 }
 0x39e   : > { %v6000_v37 = vpop.f32.mrb[8].mxu1  ;;  %3239 = vmatprep.mubr.bf16.mxu0 %v8657_v3 }
 0x39f   : > { %v6001_v50 = vpop.f32.mrb[9].mxu1 }
 0x3a0   : > { %v8745_v7 = vadd.f32 %v6001_v50, %v6000_v37  ;;  %v6003_v22 = vpop.f32.mrb[10].mxu1 }
 0x3a1   : > { %v6004_v48 = vpop.f32.mrb[11].mxu1 }
 0x3a2   : > { %v8747_v56 = vadd.f32 %v6004_v48, %v6003_v22  ;;  %6383 = vmatmul.mubr.msk.bf16.gmra.mrb[72].mxu1 %vm2466_vm14, %v8302_v11 }
 0x3a3   : > { %6386 = vmatprep.mubr.msk.bf16.mxu1 %vm2466_vm14, %v8300_v23  ;;  %v2450_v23 = vpop.permute.xlu1 %2449 }
 0x3a4   : > { %v2632_v11 = vsel %vm2466_vm14, %v8320_v25, %v2450_v23 }
 0x3a5   : > { %3240 = vmatmul.mubr.bf16.gmra.mrb[60].mxu0 %v2624_v47 }
 0x3a6   : > { %v6006_v62 = vpop.f32.mrb[12].mxu1  ;;  %3247 = vmatprep.mubr.bf16.mxu0 %v8668_v6 }
 0x3a7   : > { %v6007_v60 = vpop.f32.mrb[13].mxu1  ;;  %v2454_v63 = vpop.permute.xlu1 %2453 }
 0x3a8   : > { %v8756_v3 = vadd.f32 %v6007_v60, %v6006_v62  ;;  %v6009_v17 = vpop.f32.mrb[14].mxu1 }
 0x3a9   : > { %v6010_v13 = vpop.f32.mrb[15].mxu1 }
 0x3aa   : > { %v8758_v5 = vadd.f32 %v6010_v13, %v6009_v17  ;;  %6387 = vmatmul.mubr.msk.bf16.gmra.mrb[76].mxu1 %vm2466_vm14, %v8365_v40 }
 0x3ab   : > { %6390 = vmatprep.mubr.msk.bf16.mxu1 %vm2466_vm14, %v8363_v4 }
 0x3ad   : > { %3248 = vmatmul.mubr.bf16.gmra.mrb[64].mxu0 %v2628_v31 }
 0x3ae   : > { %3255 = vmatprep.mubr.bf16.mxu0 %v8677_v54  ;;  %v2452_v54 = vpop.permute.xlu0 %2451 }
 0x3af   : > { %v2636_v25 = vsel %vm2466_vm14, %v8436_v27, %v2452_v54  ;;  %v2640_v27 = vsel %vm2466_vm14, %v8434_v32, %v2454_v63  ;;  %v8856_v63 = vld [vmem:[%s10382_s4] ss:$0 sm:$0xff] }
 0x3b2   : > { %6391 = vmatmul.mubr.msk.bf16.gmra.mrb[80].mxu1 %vm2466_vm14, %v8480_v53 }
 0x3b3   : > { %6394 = vmatprep.mubr.msk.bf16.mxu1 %vm2466_vm14, %v8474_v38 }
 0x3b5   : > { %3256 = vmatmul.mubr.bf16.gmra.mrb[68].mxu0 %v2632_v11 }
 0x3b6   : > { %v6012_v40 = vpop.f32.mrb[16].mxu1  ;;  %3263 = vmatprep.mubr.bf16.mxu0 %v8685_v55 }
 0x3b7   : > { %v6013_v6 = vpop.f32.mrb[17].mxu1 }
 0x3b8   : > { %v8774_v4 = vadd.f32 %v6013_v6, %v6012_v40  ;;  %v6015_v39 = vpop.f32.mrb[18].mxu1  ;;  %v6553_v40 = vld [vmem:[%s10383_s5 + $0x48] sm:$0xff]  }
 0x3b9   : > { %v6016_v28 = vpop.f32.mrb[19].mxu1  ;;  %v6554_v6 = vld [vmem:[%s10383_s5 + $0x8] sm:$0xff]  }
 0x3ba   : > { %v8776_v9 = vadd.f32 %v6016_v28, %v6015_v39  ;;  %6395 = vmatmul.mubr.msk.bf16.gmra.mrb[84].mxu1 %vm2466_vm14, %v8547_v49  ;;  %v2456_v49 = vpop.permute.xlu0 %2455 }
 0x3bb   : > { %6398 = vmatprep.mubr.msk.bf16.mxu1 %vm2466_vm14, %v8543_v42  ;;  %v6800_v42 = vmov 0   ;;  %v2644_v32 = vsel %vm2466_vm14, %v8512_v10, %v2456_v49 }
 0x3bc   : > { %3555 = vrot.lane.b32.xlu0 %v6800_v42, %s6799_s30  ;;  %3532 = vrot.lane.b32.xlu1 %v6800_v42, %s6798_s24 }
 0x3bd   : > { %3264 = vmatmul.mubr.bf16.gmra.mrb[72].mxu0 %v2636_v25  ;;  %6406 = vmatprep.subr.bf16.mxu1 %v6800_v42 }
 0x3be   : > { %v6018_v38 = vpop.f32.mrb[20].mxu1  ;;  %3271 = vmatprep.mubr.bf16.mxu0 %v8695_v0  ;;  %6510 = vset.pattern.permute.xlu1 %v6800_v42 }
 0x3bf   : > { %v6019_v53 = vpop.f32.mrb[21].mxu1  ;;  %6511 = vset.pattern.permute.xlu0 %v6800_v42 }
 0x3c0   : > { %v8785_v55 = vadd.f32 %v6019_v53, %v6018_v38  ;;  %v6021_v2 = vpop.f32.mrb[22].mxu1  ;;  %3580 = vrot.lane.b32.xlu0 %v6800_v42, %s10449_s19 }
 0x3c1   : > { %v6022_v41 = vpop.f32.mrb[23].mxu1 }
 0x3c2   : > { %v8787_v8 = vadd.f32 %v6022_v41, %v6021_v2  ;;  %6399 = vmatmul.mubr.msk.bf16.gmra.mrb[88].mxu1 %vm2466_vm14, %v8618_v51  ;;  %v2465_v51 = vpop.permute.xlu0 %2464  ;;  %v6555_v2 = vld [vmem:[%s10383_s5 + $0x50] sm:$0xff]  }
 0x3c3   : > { %6402 = vmatprep.mubr.msk.bf16.mxu1 %vm2466_vm14, %v8604_v34  ;;  %v2458_v34 = vpop.permute.xlu1 %2457  ;;  %v2660_v21 = vsel %vm2466_vm14, %v8600_v45, %v2465_v51 }
 0x3c4   : > { %v2648_v0 = vsel %vm2466_vm14, %v8510_v1, %v2458_v34  ;;  %v3025_v34 = vadd.f32 %v8720_v35, %v8856_v63  ;;  %v6557_v35 = vld [vmem:[%s10383_s5 + $0x58] sm:$0xff]  }
 0x3c5   : > { %3272 = vmatmul.mubr.bf16.gmra.mrb[76].mxu0 %v2640_v27 }
 0x3c6   : > { %3279 = vmatprep.mubr.bf16.mxu0 %v8705_v36  ;;  %v2462_v37 = vpop.permute.xlu0 %2461 }
 0x3c7   : > { %v2460_v10 = vpop.permute.xlu1 %2459  ;;  %v2656_v22 = vsel %vm2466_vm14, %v8579_v58, %v2462_v37  ;;  %v6560_v37 = vld [vmem:[%s10383_s5 + $0x20] sm:$0xff]  }
 0x3ca   : > { %6403 = vmatmul.mubr.bf16.gmra.mrb[92].mxu1 %v10486_v57 }
 0x3cd   : > { %3280 = vmatmul.mubr.bf16.gmra.mrb[80].mxu0 %v2644_v32  ;;  %v6556_v32 = vld [vmem:[%s10383_s5 + $0x10] sm:$0xff]  }
 0x3ce   : > { %3287 = vmatprep.mubr.bf16.mxu0 %v8715_v44  ;;  %v2652_v44 = vsel %vm2466_vm14, %v8581_v19, %v2460_v10  ;;  %v6551_v19 = vld [vmem:[%s10383_s5 + $0x40] sm:$0xff]  }
 0x3cf   : > { %6216 = vmatprep.subr.bf16.mxu0 %v6551_v19 }
 0x3d5   : > { %3288 = vmatmul.mubr.bf16.gmra.mrb[84].mxu0 %v2648_v0 }
 0x3d6   : > { %v6024_v36 = vpop.f32.mrb[24].mxu1  ;;  %3295 = vmatprep.mubr.bf16.mxu0 %v2660_v21 }
 0x3d7   : > { %v6025_v46 = vpop.f32.mrb[25].mxu1 }
 0x3d8   : > { %v8813_v16 = vadd.f32 %v6025_v46, %v6024_v36  ;;  %v6027_v57 = vpop.f32.mrb[26].mxu1 }
 0x3d9   : > { %v6028_v61 = vpop.f32.mrb[27].mxu1 }
 0x3da   : > { %v8815_v29 = vadd.f32 %v6028_v61, %v6027_v57  ;;  %v3028_v61 = vadd.f32 %v8724_v15, %v8856_v63  ;;  %v6559_v15 = vld [vmem:[%s10383_s5 + $0x60] sm:$0xff]  }
 0x3dd   : > { %3296 = vmatmul.mubr.bf16.gmra.mrb[88].mxu0 %v2652_v44 }
 0x3de   : > { %v6030_v20 = vpop.f32.mrb[28].mxu1  ;;  %3303 = vmatprep.mubr.bf16.mxu0 %v8386_v26  ;;  %v6552_v26 = vld [vmem:[%s10383_s5] sm:$0xff]  }
 0x3df   : > { %v6031_v1 = vpop.f32.mrb[29].mxu1  ;;  %6217 = vmatpush3.bf16.msra.mxu0 %v6552_v26 }
 0x3e0   : > { %v8820_v14 = vadd.f32 %v6031_v1, %v6030_v20  ;;  %v6033_v45 = vpop.f32.mrb[30].mxu1  ;;  %6218 = vmatprep.subr.bf16.mxu0 %v6553_v40 }
 0x3e1   : > { %v6034_v52 = vpop.f32.mrb[31].mxu1 }
 0x3e2   : > { %v8822_v50 = vadd.f32 %v6034_v52, %v6033_v45  ;;  %v6558_v52 = vld [vmem:[%s10383_s5 + $0x18] sm:$0xff]  }
 0x3e3   : > { %6219 = vmatpush3.bf16.msra.mxu0 %v6554_v6  ;;  %v3036_v6 = vadd.f32 %v8735_v12, %v8856_v63 }
 0x3e4   : > { %6220 = vmatprep.subr.bf16.mxu0 %v6555_v2 }
 0x3e5   : > { %3304 = vmatmul.mubr.bf16.gmra.mrb[92].mxu0 %v2656_v22 }
 0x3e7   : > { %6221 = vmatpush3.bf16.msra.mxu0 %v6556_v32 }
 0x3e8   : > { %6222 = vmatprep.subr.bf16.mxu0 %v6557_v35 }
 0x3eb   : > { %6223 = vmatpush3.bf16.msra.mxu0 %v6558_v52 }
 0x3ec   : > { %6224 = vmatprep.subr.bf16.mxu0 %v6559_v15 }
 0x3ef   : > { %6225 = vmatpush3.bf16.msra.mxu0 %v6560_v37  ;;  %v8924_v37 = vld [vmem:[%s10383_s5 + $0x80] sm:$0xff]  }
 0x3f0   : > { %6420 = vmatpush1.bf16.msra.mxu1 %v8924_v37 }
 0x3f1   : > { %6407 = vmatprep.subr.bf16.mxu1 %v6800_v42 }
 0x3f5   : > { %v6036_v48 = vpop.f32.mrb[32].mxu1 }
 0x3f6   : > { %v6037_v30 = vpop.f32.mrb[33].mxu1 }
 0x3f7   : > { %v8832_v47 = vadd.f32 %v6037_v30, %v6036_v48  ;;  %v6039_v62 = vpop.f32.mrb[34].mxu1 }
 0x3f8   : > { %v6040_v60 = vpop.f32.mrb[35].mxu1 }
 0x3f9   : > { %v8834_v17 = vadd.f32 %v6040_v60, %v6039_v62 }
 0x3fd   : > { %v6042_v58 = vpop.f32.mrb[36].mxu1 }
 0x3fe   : > { %v6043_v13 = vpop.f32.mrb[37].mxu1 }
 0x3ff   : > { %v8836_v33 = vadd.f32 %v6043_v13, %v6042_v58  ;;  %v6045_v31 = vpop.f32.mrb[38].mxu1  ;;  %v3033_v13 = vadd.f32 %v8729_v59, %v8856_v63 }
 0x400   : > { %v6046_v23 = vpop.f32.mrb[39].mxu1 }
 0x401   : > { %v8838_v11 = vadd.f32 %v6046_v23, %v6045_v31 }
 0x415   : > { %v6048_v39 = vpop.f32.mrb[40].mxu1 }
 0x416   : > { %v6049_v28 = vpop.f32.mrb[41].mxu1 }
 0x417   : > { %v8846_v54 = vadd.f32 %v6049_v28, %v6048_v39  ;;  %v6051_v25 = vpop.f32.mrb[42].mxu1 }
 0x418   : > { %v6052_v38 = vpop.f32.mrb[43].mxu1 }
 0x419   : > { %v8848_v53 = vadd.f32 %v6052_v38, %v6051_v25 }
 0x41c   : > { %v6100_v41 = vpop.f32.mrb[32].mxu0 }
 0x41d   : > { %v6054_v27 = vpop.f32.mrb[44].mxu1  ;;  %v6101_v49 = vpop.f32.mrb[33].mxu0 }
 0x41e   : > { %v6102_v51 = vadd.f32 %v6101_v49, %v6100_v41  ;;  %v6055_v0 = vpop.f32.mrb[45].mxu1  ;;  %v6103_v36 = vpop.f32.mrb[34].mxu0 }
 0x41f   : > { %v8863_v21 = vadd.f32 %v6055_v0, %v6054_v27  ;;  %v6057_v46 = vpop.f32.mrb[46].mxu1  ;;  %v6104_v57 = vpop.f32.mrb[35].mxu0 }
 0x420   : > { %v6105_v10 = vadd.f32 %v6104_v57, %v6103_v36  ;;  %v6058_v44 = vpop.f32.mrb[47].mxu1  ;;  %v8867_v20 = vadd.f32 %v6102_v51, %v3025_v34  ;;  %v3041_v51 = vadd.f32 %v8745_v7, %v8856_v63  ;;  %v6563_v7 = vld [vmem:[%s10383_s5 + $0x70] sm:$0xff]  }
 0x421   : > { %v8869_v1 = vadd.f32 %v6058_v44, %v6057_v46  ;;  %v3044_v46 = vadd.f32 %v8747_v56, %v8856_v63  ;;  %v6562_v44 = vld [vmem:[%s10383_s5 + $0x28] sm:$0xff]   ;;  %v6564_v56 = vld [vmem:[%s10383_s5 + $0x30] sm:$0xff]  }
 0x422   : > { %v8871_v45 = vadd.f32 %v6105_v10, %v3028_v61  ;;  %v6561_v10 = vld [vmem:[%s10383_s5 + $0x68] sm:$0xff]  }
 0x423   : > { %6226 = vmatprep.subr.bf16.mxu0 %v6561_v10  ;;  %v8965_v10 = vld [vmem:[%s10383_s5 + $0x98] sm:$0xff]  }
 0x424   : > { %6227 = vmatpush3.bf16.msra.mxu0 %v6562_v44  ;;  %v3057_v44 = vadd.f32 %v8774_v4, %v8856_v63 }
 0x425   : > { %6228 = vmatprep.subr.bf16.mxu0 %v6563_v7 }
 0x428   : > { %6229 = vmatpush3.bf16.msra.mxu0 %v6564_v56 }
 0x435   : > { %v6060_v22 = vpop.f32.mrb[48].mxu1 }
 0x436   : > { %v6061_v48 = vpop.f32.mrb[49].mxu1 }
 0x437   : > { %v8885_v30 = vadd.f32 %v6061_v48, %v6060_v22  ;;  %v6063_v19 = vpop.f32.mrb[50].mxu1 }
 0x438   : > { %v6064_v26 = vpop.f32.mrb[51].mxu1  ;;  %v6106_v62 = vpop.f32.mrb[36].mxu0 }
 0x439   : > { %v8887_v60 = vadd.f32 %v6064_v26, %v6063_v19  ;;  %v6107_v58 = vpop.f32.mrb[37].mxu0 }
 0x43a   : > { %v6108_v31 = vadd.f32 %v6107_v58, %v6106_v62  ;;  %v6109_v23 = vpop.f32.mrb[38].mxu0  ;;  %v8932_v62 = vld [vmem:[%s10383_s5 + $0x88] sm:$0xff]  }
 0x43b   : > { %v6110_v40 = vpop.f32.mrb[39].mxu0  ;;  %6421 = vmatpush1.bf16.msra.mxu1 %v8932_v62 }
 0x43c   : > { %v6111_v39 = vadd.f32 %v6110_v40, %v6109_v23  ;;  %v8893_v28 = vadd.f32 %v6108_v31, %v3033_v13  ;;  %v3049_v31 = vadd.f32 %v8756_v3, %v8856_v63  ;;  %6408 = vmatprep.subr.bf16.mxu1 %v6800_v42 }
 0x43d   : > { %v6066_v25 = vpop.f32.mrb[52].mxu1 }
 0x43e   : > { %v6067_v38 = vpop.f32.mrb[53].mxu1  ;;  %v8895_v2 = vadd.f32 %v6111_v39, %v3036_v6  ;;  %v3052_v39 = vadd.f32 %v8758_v5, %v8856_v63 }
 0x43f   : > { %v8897_v41 = vadd.f32 %v6067_v38, %v6066_v25  ;;  %v6069_v27 = vpop.f32.mrb[54].mxu1 }
 0x440   : > { %v6070_v49 = vpop.f32.mrb[55].mxu1  ;;  %v6112_v32 = vpop.f32.mrb[40].mxu0 }
 0x441   : > { %v8899_v34 = vadd.f32 %v6070_v49, %v6069_v27  ;;  %v6113_v59 = vpop.f32.mrb[41].mxu0  ;;  %v8945_v27 = vld [vmem:[%s10383_s5 + $0x90] sm:$0xff]  }
 0x442   : > { %v6114_v0 = vadd.f32 %v6113_v59, %v6112_v32  ;;  %v6115_v12 = vpop.f32.mrb[42].mxu0  ;;  %6422 = vmatpush1.bf16.msra.mxu1 %v8945_v27 }
 0x443   : > { %v6116_v36 = vpop.f32.mrb[43].mxu0  ;;  %6409 = vmatprep.subr.bf16.mxu1 %v6800_v42 }
 0x444   : > { %v6117_v57 = vadd.f32 %v6116_v36, %v6115_v12  ;;  %v8905_v61 = vadd.f32 %v6114_v0, %v3041_v51 }
 0x446   : > { %v8913_v35 = vadd.f32 %v6117_v57, %v3044_v46  ;;  %v6568_v46 = vld [vmem:[%s10383_s5 + $0x78] sm:$0xff]   ;;  %6423 = vmatpush1.bf16.msra.mxu1 %v8965_v10 }
 0x447   : > { %v6569_v57 = vld [vmem:[%s10383_s5 + $0x38] sm:$0xff]   ;;  %6230 = vmatprep.subr.bf16.mxu0 %v6568_v46  ;;  %6410 = vmatprep.subr.bf16.mxu1 %v6800_v42 }
 0x448   : > { %6231 = vmatpush3.bf16.msra.mxu0 %v6569_v57 }
 0x449   : > { %4218 = vmatprep.subr.bf16.mxu0 %v6800_v42 }
 0x455   : > { %v6072_v52 = vpop.f32.mrb[56].mxu1 }
 0x456   : > { %v6073_v15 = vpop.f32.mrb[57].mxu1 }
 0x457   : > { %v8926_v22 = vadd.f32 %v6073_v15, %v6072_v52  ;;  %v6075_v48 = vpop.f32.mrb[58].mxu1  ;;  %v3060_v15 = vadd.f32 %v8776_v9, %v8856_v63  ;;  %v8983_v9 = vld [vmem:[%s10383_s5 + $0xa0] sm:$0xff]  }
 0x458   : > { %v6076_v19 = vpop.f32.mrb[59].mxu1  ;;  %v6118_v26 = vpop.f32.mrb[44].mxu0  ;;  %6424 = vmatpush1.bf16.msra.mxu1 %v8983_v9 }
 0x459   : > { %v8934_v58 = vadd.f32 %v6076_v19, %v6075_v48  ;;  %v6119_v13 = vpop.f32.mrb[45].mxu0  ;;  %6411 = vmatprep.subr.bf16.mxu1 %v6800_v42 }
 0x45a   : > { %v6120_v23 = vadd.f32 %v6119_v13, %v6118_v26  ;;  %v6121_v40 = vpop.f32.mrb[46].mxu0 }
 0x45b   : > { %v6122_v6 = vpop.f32.mrb[47].mxu0 }
 0x45c   : > { %v6123_v25 = vadd.f32 %v6122_v6, %v6121_v40  ;;  %v3210_v38 = vadd.f32 %v6120_v23, %v3049_v31 }
 0x45d   : > { %v6078_v49 = vpop.f32.mrb[60].mxu1 }
 0x45e   : > { %v6079_v32 = vpop.f32.mrb[61].mxu1  ;;  %v8948_v3 = vadd.f32 %v6123_v25, %v3052_v39 }
 0x45f   : > { %v8950_v59 = vadd.f32 %v6079_v32, %v6078_v49  ;;  %v6081_v51 = vpop.f32.mrb[62].mxu1 }
 0x460   : > { %v6082_v0 = vpop.f32.mrb[63].mxu1  ;;  %v6124_v5 = vpop.f32.mrb[48].mxu0 }
 0x461   : > { %v8953_v12 = vadd.f32 %v6082_v0, %v6081_v51  ;;  %v6125_v36 = vpop.f32.mrb[49].mxu0 }
 0x462   : > { %v6126_v7 = vadd.f32 %v6125_v36, %v6124_v5  ;;  %v6127_v56 = vpop.f32.mrb[50].mxu0 }
 0x463   : > { %v6128_v52 = vpop.f32.mrb[51].mxu0 }
 0x464   : > { %v6129_v48 = vadd.f32 %v6128_v52, %v6127_v56  ;;  %v8971_v19 = vadd.f32 %v6126_v7, %v3057_v44 }
 0x465   : > { %v6376_v26 = vpop.f32.mrb[64].mxu1 }
 0x466   : > { %v3355_v4 = vadd.f32 %v6376_v26, %v8893_v28  ;;  %v3346_v13 = vpop.f32.mrb[65].mxu1  ;;  %v8977_v31 = vadd.f32 %v6129_v48, %v3060_v15  ;;  %v3065_v28 = vadd.f32 %v8785_v55, %v8856_v63 }
 0x467   : > { %v3347_v23 = vadd.f32 %v3346_v13, %v8867_v20  ;;  %v6377_v40 = vpop.f32.mrb[66].mxu1  ;;  %v9012_v13 = vld [vmem:[%s10383_s5 + $0xb0] sm:$0xff]  }
 0x468   : > { %v3358_v6 = vadd.f32 %v6377_v40, %v8895_v2  ;;  %v6130_v39 = vpop.f32.mrb[52].mxu0  ;;  %v3349_v25 = vpop.f32.mrb[67].mxu1  ;;  %v3475_v51 = vmax.f32 %v3355_v4, 0.0  ;;  %v8994_v2 = vld [vmem:[%s10383_s5 + $0xa8] sm:$0xff]  }
 0x469   : > { %v3350_v49 = vadd.f32 %v3349_v25, %v8871_v45  ;;  %v6131_v32 = vpop.f32.mrb[53].mxu0  ;;  %v3473_v36 = vmax.f32 %v3347_v23, 0.0  ;;  %v3068_v45 = vadd.f32 %v8787_v8, %v8856_v63  ;;  %6425 = vmatpush1.bf16.msra.mxu1 %v8994_v2  ;;  %v3073_v25 = vadd.f32 %v8813_v16, %v8856_v63 }
 0x46a   : > { %v3476_v20 = vmax.f32 %v3358_v6, 0.0  ;;  %v6132_v0 = vadd.f32 %v6131_v32, %v6130_v39  ;;  %v6133_v5 = vpop.f32.mrb[54].mxu0  ;;  %6412 = vmatprep.subr.bf16.mxu1 %v6800_v42 }
 0x46b   : > { %v3474_v46 = vmax.f32 %v3350_v49, 0.0  ;;  %v6134_v57 = vpop.f32.mrb[55].mxu0 }
 0x46c   : > { %v8998_v44 = vpack.c.bf16 %v3476_v20, %v3475_v51  ;;  %v6135_v55 = vadd.f32 %v6134_v57, %v6133_v5  ;;  %v3226_v7 = vadd.f32 %v6132_v0, %v3065_v28  ;;  %v3076_v0 = vadd.f32 %v8815_v29, %v8856_v63 }
 0x46d   : > { %v9000_v56 = vpack.c.bf16 %v3474_v46, %v3473_v36  ;;  %v6380_v52 = vpop.f32.mrb[68].mxu1  ;;  %6426 = vmatpush1.bf16.msra.mxu1 %v9012_v13 }
 0x46e   : > { %v3371_v15 = vadd.f32 %v6380_v52, %v3210_v38  ;;  %3536 = vrot.lane.b32.xlu1 %v8998_v44, %s6798_s24  ;;  %3584 = vrot.lane.b32.xlu0 %v8998_v44, %s10449_s19  ;;  %v3362_v48 = vpop.f32.mrb[69].mxu1  ;;  %v3229_v26 = vadd.f32 %v6135_v55, %v3068_v45 }
 0x46f   : > { %v3363_v8 = vadd.f32 %v3362_v48, %v8905_v61  ;;  %v6381_v4 = vpop.f32.mrb[70].mxu1  ;;  %v9020_v61 = vld [vmem:[%s10383_s5 + $0xb8] sm:$0xff]   ;;  %6413 = vmatprep.subr.bf16.mxu1 %v6800_v42  ;;  %v9045_v48 = vld [vmem:[%s10383_s5 + $0xc0] sm:$0xff]  }
 0x470   : > { %v3374_v38 = vadd.f32 %v6381_v4, %v8948_v3  ;;  %v6136_v23 = vpop.f32.mrb[56].mxu0  ;;  %v3365_v40 = vpop.f32.mrb[71].mxu1  ;;  %v3479_v49 = vmax.f32 %v3371_v15, 0.0 }
 0x471   : > { %v3366_v6 = vadd.f32 %v3365_v40, %v8913_v35  ;;  %v6137_v39 = vpop.f32.mrb[57].mxu0  ;;  %v3477_v3 = vmax.f32 %v3363_v8, 0.0  ;;  %6427 = vmatpush1.bf16.msra.mxu1 %v9020_v61  ;;  %v3081_v40 = vadd.f32 %v8820_v14, %v8856_v63 }
 0x472   : > { %v3480_v32 = vmax.f32 %v3374_v38, 0.0  ;;  %v6138_v28 = vadd.f32 %v6137_v39, %v6136_v23  ;;  %3559 = vrot.lane.b32.xlu0 %v8998_v44, %s6799_s30  ;;  %3582 = vrot.lane.b32.xlu1 %v9000_v56, %s10449_s19  ;;  %v6139_v35 = vpop.f32.mrb[58].mxu0 }
 0x473   : > { %v3478_v51 = vmax.f32 %v3366_v6, 0.0  ;;  %v6140_v20 = vpop.f32.mrb[59].mxu0  ;;  %6414 = vmatprep.subr.bf16.mxu1 %v6800_v42 }
 0x474   : > { %v9031_v5 = vpack.c.bf16 %v3480_v32, %v3479_v49  ;;  %v6141_v16 = vadd.f32 %v6140_v20, %v6139_v35  ;;  %v3234_v36 = vadd.f32 %v6138_v28, %v3073_v25  ;;  %v3084_v28 = vadd.f32 %v8822_v50, %v8856_v63 }
 0x475   : > { %v9033_v46 = vpack.c.bf16 %v3478_v51, %v3477_v3  ;;  %v6384_v57 = vpop.f32.mrb[72].mxu1  ;;  %6428 = vmatpush1.bf16.msra.mxu1 %v9045_v48 }
 0x476   : > { %v3387_v45 = vadd.f32 %v6384_v57, %v3226_v7  ;;  %3540 = vrot.lane.b32.xlu0 %v9031_v5, %s6798_s24  ;;  %v3378_v55 = vpop.f32.mrb[73].mxu1  ;;  %3557 = vrot.lane.b32.xlu1 %v9000_v56, %s6799_s30  ;;  %v3237_v52 = vadd.f32 %v6141_v16, %v3076_v0 }
 0x477   : > { %v3379_v29 = vadd.f32 %v3378_v55, %v8971_v19  ;;  %v6385_v15 = vpop.f32.mrb[74].mxu1  ;;  %v9052_v19 = vld [vmem:[%s10383_s5 + $0xc8] sm:$0xff]   ;;  %6415 = vmatprep.subr.bf16.mxu1 %v6800_v42  ;;  %v9076_v55 = vld [vmem:[%s10383_s5 + $0xd0] sm:$0xff]  }
 0x478   : > { %v3390_v8 = vadd.f32 %v6385_v15, %v3229_v26  ;;  %v6142_v7 = vpop.f32.mrb[60].mxu0  ;;  %v3381_v4 = vpop.f32.mrb[75].mxu1  ;;  %v3483_v6 = vmax.f32 %v3387_v45, 0.0 }
 0x479   : > { %v3382_v38 = vadd.f32 %v3381_v4, %v8977_v31  ;;  %v6143_v23 = vpop.f32.mrb[61].mxu0  ;;  %v3481_v26 = vmax.f32 %v3379_v29, 0.0  ;;  %6429 = vmatpush1.bf16.msra.mxu1 %v9052_v19 }
 0x47a   : > { %v3484_v39 = vmax.f32 %v3390_v8, 0.0  ;;  %v6144_v25 = vadd.f32 %v6143_v23, %v6142_v7  ;;  %3563 = vrot.lane.b32.xlu0 %v9031_v5, %s6799_s30  ;;  %3534 = vrot.lane.b32.xlu1 %v9000_v56, %s6798_s24  ;;  %v6145_v31 = vpop.f32.mrb[62].mxu0 }
 0x47b   : > { %v3482_v49 = vmax.f32 %v3382_v38, 0.0  ;;  %v6146_v32 = vpop.f32.mrb[63].mxu0  ;;  %6416 = vmatprep.subr.bf16.mxu1 %v6800_v42  ;;  %v9082_v38 = vld [vmem:[%s10383_s5 + $0xd8] sm:$0xff]  }
 0x47c   : > { %v9063_v35 = vpack.c.bf16 %v3484_v39, %v3483_v6  ;;  %v6147_v14 = vadd.f32 %v6146_v32, %v6145_v31  ;;  %v3242_v3 = vadd.f32 %v6144_v25, %v3081_v40 }
 0x47d   : > { %v9065_v51 = vpack.c.bf16 %v3482_v49, %v3481_v26  ;;  %v6388_v20 = vpop.f32.mrb[76].mxu1  ;;  %6430 = vmatpush1.bf16.msra.mxu1 %v9076_v55  ;;  %v3092_v26 = vadd.f32 %v8834_v17, %v8856_v63 }
 0x47e   : > { %v3403_v0 = vadd.f32 %v6388_v20, %v3242_v3  ;;  %v3394_v16 = vpop.f32.mrb[77].mxu1  ;;  %3561 = vrot.lane.b32.xlu0 %v9033_v46, %s6799_s30  ;;  %3588 = vrot.lane.b32.xlu1 %v9031_v5, %s10449_s19  ;;  %v3245_v57 = vadd.f32 %v6147_v14, %v3084_v28  ;;  %v9101_v3 = vld [vmem:[%s10383_s5 + $0xe0] sm:$0xff]  }
 0x47f   : > { %v3395_v45 = vadd.f32 %v3394_v16, %v3234_v36  ;;  %v6389_v50 = vpop.f32.mrb[78].mxu1  ;;  %v3089_v36 = vadd.f32 %v8832_v47, %v8856_v63  ;;  %6417 = vmatprep.subr.bf16.mxu1 %v6800_v42 }
 0x480   : > { %v3406_v29 = vadd.f32 %v6389_v50, %v3245_v57  ;;  %v6148_v15 = vpop.f32.mrb[64].mxu0  ;;  %v3397_v8 = vpop.f32.mrb[79].mxu1  ;;  %v3487_v23 = vmax.f32 %v3403_v0, 0.0 }
 0x481   : > { %v3398_v7 = vadd.f32 %v3397_v8, %v3237_v52  ;;  %v6149_v4 = vpop.f32.mrb[65].mxu0  ;;  %v3485_v39 = vmax.f32 %v3395_v45, 0.0  ;;  %6431 = vmatpush1.bf16.msra.mxu1 %v9082_v38  ;;  %v3097_v8 = vadd.f32 %v8836_v33, %v8856_v63 }
 0x482   : > { %v3488_v40 = vmax.f32 %v3406_v29, 0.0  ;;  %v6150_v6 = vadd.f32 %v6149_v4, %v6148_v15  ;;  %3586 = vrot.lane.b32.xlu1 %v9033_v46, %s10449_s19  ;;  %3592 = vrot.lane.b32.xlu0 %v9063_v35, %s10449_s19  ;;  %v6151_v52 = vpop.f32.mrb[66].mxu0  ;;  %v9112_v15 = vld [vmem:[%s10383_s5 + $0xe8] sm:$0xff]  }
 0x483   : > { %v3486_v25 = vmax.f32 %v3398_v7, 0.0  ;;  %v6152_v31 = vpop.f32.mrb[67].mxu0  ;;  %6418 = vmatprep.subr.bf16.mxu1 %v6800_v42 }
 0x484   : > { %v9093_v49 = vpack.c.bf16 %v3488_v40, %v3487_v23  ;;  %v6153_v47 = vadd.f32 %v6152_v31, %v6151_v52  ;;  %v3250_v32 = vadd.f32 %v6150_v6, %v3089_v36  ;;  %v3100_v6 = vadd.f32 %v8838_v11, %v8856_v63 }
 0x485   : > { %v9095_v28 = vpack.c.bf16 %v3486_v25, %v3485_v39  ;;  %v6392_v14 = vpop.f32.mrb[80].mxu1  ;;  %6432 = vmatpush1.bf16.msra.mxu1 %v9101_v3  ;;  %v3105_v11 = vadd.f32 %v8846_v54, %v8856_v63 }
 0x486   : > { %v3410_v20 = vpop.f32.mrb[81].mxu1  ;;  %3538 = vrot.lane.b32.xlu1 %v9033_v46, %s6798_s24  ;;  %3567 = vrot.lane.b32.xlu0 %v9063_v35, %s6799_s30  ;;  %v3253_v17 = vadd.f32 %v6153_v47, %v3092_v26 }
 0x487   : > { %v3411_v0 = vadd.f32 %v3410_v20, %v3250_v32  ;;  %v6393_v16 = vpop.f32.mrb[82].mxu1  ;;  %6419 = vmatprep.subr.bf16.mxu1 %v6800_v42 }
 0x488   : > { %v6154_v57 = vpop.f32.mrb[68].mxu0  ;;  %v3413_v45 = vpop.f32.mrb[83].mxu1 }
 0x489   : > { %v3414_v50 = vadd.f32 %v3413_v45, %v3253_v17  ;;  %v6155_v29 = vpop.f32.mrb[69].mxu0  ;;  %v3489_v36 = vmax.f32 %v3411_v0, 0.0  ;;  %6433 = vmatpush1.bf16.msra.mxu1 %v9112_v15 }
 0x48a   : > { %v6156_v7 = vadd.f32 %v6155_v29, %v6154_v57  ;;  %3565 = vrot.lane.b32.xlu0 %v9065_v51, %s6799_s30  ;;  %3548 = vrot.lane.b32.xlu1 %v9093_v49, %s6798_s24  ;;  %v6157_v4 = vpop.f32.mrb[70].mxu0 }
 0x48b   : > { %v3490_v23 = vmax.f32 %v3414_v50, 0.0  ;;  %v6158_v40 = vpop.f32.mrb[71].mxu0 }
 0x48c   : > { %v3258_v52 = vadd.f32 %v6156_v7, %v3097_v8  ;;  %v6159_v39 = vadd.f32 %v6158_v40, %v6157_v4  ;;  %v3108_v7 = vadd.f32 %v8848_v53, %v8856_v63 }
 0x48d   : > { %v9123_v25 = vpack.c.bf16 %v3490_v23, %v3489_v36  ;;  %v6396_v33 = vpop.f32.mrb[84].mxu1 }
 0x48e   : > { %v3419_v31 = vadd.f32 %v6392_v14, %v3258_v52  ;;  %v3261_v26 = vadd.f32 %v6159_v39, %v3100_v6  ;;  %v3426_v47 = vpop.f32.mrb[85].mxu1  ;;  %3542 = vrot.lane.b32.xlu0 %v9065_v51, %s6798_s24 }
 0x48f   : > { %v6397_v32 = vpop.f32.mrb[86].mxu1 }
 0x490   : > { %v3422_v20 = vadd.f32 %v6393_v16, %v3261_v26  ;;  %v6160_v17 = vpop.f32.mrb[72].mxu0  ;;  %v3429_v0 = vpop.f32.mrb[87].mxu1  ;;  %v3491_v45 = vmax.f32 %v3419_v31, 0.0 }
 0x491   : > { %v6161_v57 = vpop.f32.mrb[73].mxu0 }
 0x492   : > { %v3492_v50 = vmax.f32 %v3422_v20, 0.0  ;;  %v6162_v29 = vadd.f32 %v6161_v57, %v6160_v17  ;;  %3594 = vrot.lane.b32.xlu0 %v9095_v28, %s10449_s19  ;;  %v6163_v14 = vpop.f32.mrb[74].mxu0  ;;  %v3113_v20 = vadd.f32 %v8863_v21, %v8856_v63 }
 0x493   : > { %v6164_v8 = vpop.f32.mrb[75].mxu0 }
 0x494   : > { %v9134_v4 = vpack.c.bf16 %v3492_v50, %v3491_v45  ;;  %v3266_v16 = vadd.f32 %v6162_v29, %v3105_v11  ;;  %v6165_v36 = vadd.f32 %v6164_v8, %v6163_v14 }
 0x495   : > { %v9136_v23 = vpop.f32.mrb[88].mxu1 }
 0x496   : > { %v3427_v40 = vadd.f32 %v3426_v47, %v3266_v16  ;;  %v3269_v6 = vadd.f32 %v6165_v36, %v3108_v7  ;;  %v3442_v54 = vpop.f32.mrb[89].mxu1  ;;  %3544 = vrot.lane.b32.xlu0 %v9063_v35, %s6798_s24  ;;  %3575 = vrot.lane.b32.xlu1 %v9134_v4, %s6799_s30 }
 0x497   : > { %v9142_v52 = vpop.f32.mrb[90].mxu1 }
 0x498   : > { %v3430_v39 = vadd.f32 %v3429_v0, %v3269_v6  ;;  %v6166_v31 = vpop.f32.mrb[76].mxu0  ;;  %v3445_v53 = vpop.f32.mrb[91].mxu1  ;;  %v3493_v17 = vmax.f32 %v3427_v40, 0.0  ;;  %v3116_v0 = vadd.f32 %v8869_v1, %v8856_v63 }
 0x499   : > { %v6167_v26 = vpop.f32.mrb[77].mxu0 }
 0x49a   : > { %v3494_v57 = vmax.f32 %v3430_v39, 0.0  ;;  %v6168_v47 = vadd.f32 %v6167_v26, %v6166_v31  ;;  %3569 = vrot.lane.b32.xlu0 %v9095_v28, %s6799_s30  ;;  %3573 = vrot.lane.b32.xlu1 %v9123_v25, %s6799_s30  ;;  %v6169_v11 = vpop.f32.mrb[78].mxu0  ;;  %v3121_v31 = vadd.f32 %v8885_v30, %v8856_v63 }
 0x49b   : > { %v6170_v45 = vpop.f32.mrb[79].mxu0 }
 0x49c   : > { %v9152_v50 = vpack.c.bf16 %v3494_v57, %v3493_v17  ;;  %v3274_v29 = vadd.f32 %v6168_v47, %v3113_v20  ;;  %v6171_v14 = vadd.f32 %v6170_v45, %v6169_v11 }
 0x49d   : > { %v9154_v8 = vpop.f32.mrb[92].mxu1 }
 0x49e   : > { %v3435_v21 = vadd.f32 %v6396_v33, %v3274_v29  ;;  %v3277_v7 = vadd.f32 %v6171_v14, %v3116_v0  ;;  %3596 = vrot.lane.b32.xlu0 %v9093_v49, %s10449_s19  ;;  %3590 = vrot.lane.b32.xlu1 %v9065_v51, %s10449_s19  ;;  %v3458_v16 = vpop.f32.mrb[93].mxu1 }
 0x49f   : > { %v9160_v36 = vpop.f32.mrb[94].mxu1 }
 0x4a0   : > { %v3438_v40 = vadd.f32 %v6397_v32, %v3277_v7  ;;  %v6172_v6 = vpop.f32.mrb[80].mxu0  ;;  %v3461_v1 = vpop.f32.mrb[95].mxu1  ;;  %v3495_v26 = vmax.f32 %v3435_v21, 0.0  ;;  %v3124_v32 = vadd.f32 %v8887_v60, %v8856_v63  ;;  %v3129_v7 = vadd.f32 %v8897_v41, %v8856_v63 }
 0x4a1   : > { %v6173_v39 = vpop.f32.mrb[81].mxu0 }
 0x4a2   : > { %v3496_v20 = vmax.f32 %v3438_v40, 0.0  ;;  %v6174_v33 = vadd.f32 %v6173_v39, %v6172_v6  ;;  %3550 = vrot.lane.b32.xlu1 %v9123_v25, %s6798_s24  ;;  %3608 = vrot.lane.b32.xlu0 %v9152_v50, %s6798_s24  ;;  %v6175_v17 = vpop.f32.mrb[82].mxu0 }
 0x4a3   : > { %v6176_v57 = vpop.f32.mrb[83].mxu0 }
 0x4a4   : > { %v9170_v47 = vpack.c.bf16 %v3496_v20, %v3495_v26  ;;  %v3282_v11 = vadd.f32 %v6174_v33, %v3121_v31  ;;  %v6177_v45 = vadd.f32 %v6176_v57, %v6175_v17  ;;  %v3132_v31 = vadd.f32 %v8899_v34, %v8856_v63 }
 0x4a5   : > { %v3137_v34 = vadd.f32 %v8926_v22, %v8856_v63 }
 0x4a6   : > { %v3443_v0 = vadd.f32 %v3442_v54, %v3282_v11  ;;  %v3285_v30 = vadd.f32 %v6177_v45, %v3124_v32  ;;  %3552 = vrot.lane.b32.xlu1 %v9134_v4, %s6798_s24  ;;  %3617 = vrot.lane.b32.xlu0 %v9170_v47, %s6799_s30 }
 0x4a8   : > { %v3446_v29 = vadd.f32 %v3445_v53, %v3285_v30  ;;  %v6178_v14 = vpop.f32.mrb[84].mxu0  ;;  %v3497_v40 = vmax.f32 %v3443_v0, 0.0 }
 0x4a9   : > { %v6179_v21 = vpop.f32.mrb[85].mxu0 }
 0x4aa   : > { %v3498_v60 = vmax.f32 %v3446_v29, 0.0  ;;  %v6180_v6 = vadd.f32 %v6179_v21, %v6178_v14  ;;  %3610 = vrot.lane.b32.xlu0 %v9170_v47, %s6798_s24  ;;  %3577 = vrot.lane.b32.xlu1 %v9152_v50, %s6799_s30  ;;  %v6181_v54 = vpop.f32.mrb[86].mxu0  ;;  %v3140_v29 = vadd.f32 %v8934_v58, %v8856_v63 }
 0x4ab   : > { %v6182_v39 = vpop.f32.mrb[87].mxu0 }
 0x4ac   : > { %v9184_v53 = vpack.c.bf16 %v3498_v60, %v3497_v40  ;;  %v3290_v26 = vadd.f32 %v6180_v6, %v3129_v7  ;;  %v6183_v20 = vadd.f32 %v6182_v39, %v6181_v54  ;;  %v3145_v54 = vadd.f32 %v8950_v59, %v8856_v63 }
 0x4ae   : > { %v3451_v41 = vadd.f32 %v9136_v23, %v3290_v26  ;;  %v3293_v33 = vadd.f32 %v6183_v20, %v3132_v31  ;;  %3600 = vrot.lane.b32.xlu0 %v9134_v4, %s10449_s19  ;;  %3546 = vrot.lane.b32.xlu1 %v9095_v28, %s6798_s24  ;;  %v3148_v20 = vadd.f32 %v8953_v12, %v8856_v63  ;;  %v9238_v12 = vpop.permute.xlu0 %3555 }
 0x4b0   : > { %v3454_v17 = vadd.f32 %v9142_v52, %v3293_v33  ;;  %v6184_v57 = vpop.f32.mrb[88].mxu0  ;;  %v3499_v11 = vmax.f32 %v3451_v41, 0.0 }
 0x4b1   : > { %v6185_v32 = vpop.f32.mrb[89].mxu0 }
 0x4b2   : > { %v3500_v45 = vmax.f32 %v3454_v17, 0.0  ;;  %v6186_v0 = vadd.f32 %v6185_v32, %v6184_v57  ;;  %3571 = vrot.lane.b32.xlu1 %v9093_v49, %s6799_s30  ;;  %v6187_v23 = vpop.f32.mrb[90].mxu0 }
 0x4b3   : > { %v6188_v30 = vpop.f32.mrb[91].mxu0 }
 0x4b4   : > { %v9198_v14 = vpack.c.bf16 %v3500_v45, %v3499_v11  ;;  %v6189_v21 = vadd.f32 %v6188_v30, %v6187_v23  ;;  %v3298_v52 = vadd.f32 %v6186_v0, %v3137_v34 }
 0x4b6   : > { %v3459_v7 = vadd.f32 %v3458_v16, %v3298_v52  ;;  %3598 = vrot.lane.b32.xlu1 %v9123_v25, %s10449_s19  ;;  %3621 = vrot.lane.b32.xlu0 %v9198_v14, %s6799_s30  ;;  %v3301_v22 = vadd.f32 %v6189_v21, %v3140_v29 }
 0x4b8   : > { %v3462_v40 = vadd.f32 %v3461_v1, %v3301_v22  ;;  %v6190_v60 = vpop.f32.mrb[92].mxu0  ;;  %v3501_v39 = vmax.f32 %v3459_v7, 0.0 }
 0x4b9   : > { %v6191_v6 = vpop.f32.mrb[93].mxu0 }
 0x4ba   : > { %v3502_v58 = vmax.f32 %v3462_v40, 0.0  ;;  %v6192_v31 = vadd.f32 %v6191_v6, %v6190_v60  ;;  %3614 = vrot.lane.b32.xlu0 %v9198_v14, %s6798_s24  ;;  %3619 = vrot.lane.b32.xlu1 %v9184_v53, %s6799_s30  ;;  %v6193_v16 = vpop.f32.mrb[94].mxu0 }
 0x4bb   : > { %v6194_v26 = vpop.f32.mrb[95].mxu0 }
 0x4bc   : > { %v9212_v1 = vpack.c.bf16 %v3502_v58, %v3501_v39  ;;  %v3306_v41 = vadd.f32 %v6192_v31, %v3145_v54  ;;  %v6195_v33 = vadd.f32 %v6194_v26, %v6193_v16 }
 0x4be   : > { %v3467_v59 = vadd.f32 %v9154_v8, %v3306_v41  ;;  %v3309_v17 = vadd.f32 %v6195_v33, %v3148_v20  ;;  %3604 = vrot.lane.b32.xlu0 %v9170_v47, %s10449_s19  ;;  %3612 = vrot.lane.b32.xlu1 %v9184_v53, %s6798_s24  ;;  %v9242_v8 = vpop.permute.xlu1 %3532 }
 0x4bf   : > { %v3642_v11 = vsel %vm1790_vm12, 0, %v9242_v8 }
 0x4c0   : > { %v3470_v57 = vadd.f32 %v9160_v36, %v3309_v17  ;;  %v3503_v32 = vmax.f32 %v3467_v59, 0.0  ;;  %v9244_v36 = vpop.permute.xlu0 %3580  ;;  %v9250_v23 = vsel %vm2466_vm14, %v3642_v11, %v9238_v12 }
 0x4c1   : > { %v9255_v21 = vsel %vm3696_vm15, %v9250_v23, %v9244_v36 }
 0x4c2   : > { %v3504_v34 = vmax.f32 %v3470_v57, 0.0  ;;  %3602 = vrot.lane.b32.xlu1 %v9152_v50, %s10449_s19 }
 0x4c4   : > { %v9222_v63 = vpack.c.bf16 %v3504_v34, %v3503_v32 }
 0x4c6   : > { %3623 = vrot.lane.b32.xlu1 %v9212_v1, %s6799_s30  ;;  %3638 = vrot.lane.b32.xlu0 %v9222_v63, %s6799_s30  ;;  %s6805_s30 = smov 52  }
 0x4ca   : > { %3634 = vrot.lane.b32.xlu1 %v9212_v1, %s6798_s24  ;;  %3636 = vrot.lane.b32.xlu0 %v9222_v63, %s6798_s24 }
 0x4ce   : > { %3626 = vrot.lane.b32.xlu1 %v9184_v53, %s10449_s19  ;;  %3630 = vrot.lane.b32.xlu0 %v9212_v1, %s10449_s19 }
 0x4d2   : > { %3628 = vrot.lane.b32.xlu1 %v9198_v14, %s10449_s19 }
 0x4d6   : > { %3632 = vrot.lane.b32.xlu1 %v9222_v63, %s10449_s19  ;;  %s6804_s19 = smov 48  }
 0x4e0   : > { %v3537_v45 = vpop.permute.xlu1 %3536  ;;  %v3585_v0 = vpop.permute.xlu0 %3584 }
 0x4e1   : > { %v3647_v31 = vsel %vm1790_vm12, %v9000_v56, %v3537_v45 }
 0x4e4   : > { %v3583_v30 = vpop.permute.xlu1 %3582  ;;  %v3560_v29 = vpop.permute.xlu0 %3559 }
 0x4e5   : > { %v9259_v52 = vsel %vm3696_vm15, %v9250_v23, %v3583_v30 }
 0x4e6   : > { %4089 = vmatprep.mubr.bf16.mxu0 %v9259_v52 }
 0x4e7   : > { %4090 = vmatmul.mubr.bf16.vlgmr.msra.gmra.mrb[96].mxu0 %v9255_v21 }
 0x4e8   : > { %v3558_v7 = vpop.permute.xlu1 %3557  ;;  %v3541_v22 = vpop.permute.xlu0 %3540  ;;  %4219 = vmatpush1.bf16.msra.mxu0 %v8924_v37 }
 0x4e9   : > { %v3675_v40 = vsel %vm2466_vm14, %v3642_v11, %v3558_v7  ;;  %4220 = vmatprep.subr.bf16.mxu0 %v6800_v42 }
 0x4ea   : > { %v9267_v60 = vsel %vm3696_vm15, %v3675_v40, %v3585_v0 }
 0x4eb   : > { %4097 = vmatprep.mubr.bf16.mxu0 %v9267_v60 }
 0x4ec   : > { %v3535_v6 = vpop.permute.xlu1 %3534  ;;  %v3564_v54 = vpop.permute.xlu0 %3563  ;;  %4221 = vmatpush1.bf16.msra.mxu0 %v8932_v62 }
 0x4ed   : > { %4222 = vmatprep.subr.bf16.mxu0 %v6800_v42  ;;  %v3644_v37 = vsel %vm1790_vm12, 0, %v3535_v6 }
 0x4ee   : > { %v3677_v62 = vsel %vm2466_vm14, %v3644_v37, %v3560_v29 }
 0x4ef   : > { %4098 = vmatmul.mubr.bf16.gmra.mrb[100].mxu0 %v9255_v21 }
 0x4f0   : > { %v3589_v39 = vpop.permute.xlu1 %3588  ;;  %v3562_v58 = vpop.permute.xlu0 %3561  ;;  %4223 = vmatpush1.bf16.msra.mxu0 %v8945_v27 }
 0x4f1   : > { %4224 = vmatprep.subr.bf16.mxu0 %v6800_v42  ;;  %v3679_v16 = vsel %vm2466_vm14, %v3647_v31, %v3562_v58 }
 0x4f2   : > { %v9288_v27 = vsel %vm3696_vm15, %v3679_v16, %v3589_v39 }
 0x4f4   : > { %v3587_v26 = vpop.permute.xlu1 %3586  ;;  %v3593_v20 = vpop.permute.xlu0 %3592  ;;  %4225 = vmatpush1.bf16.msra.mxu0 %v8965_v10 }
 0x4f5   : > { %v9282_v41 = vsel %vm3696_vm15, %v3677_v62, %v3587_v26  ;;  %4226 = vmatprep.subr.bf16.mxu0 %v6800_v42 }
 0x4f6   : > { %4105 = vmatprep.mubr.bf16.mxu0 %v9282_v41 }
 0x4f7   : > { %4106 = vmatmul.mubr.bf16.gmra.mrb[104].mxu0 %v9255_v21 }
 0x4f8   : > { %4113 = vmatprep.mubr.bf16.mxu0 %v9288_v27  ;;  %v3568_v56 = vpop.permute.xlu0 %3567  ;;  %4227 = vmatpush1.bf16.msra.mxu0 %v8983_v9  ;;  %v3539_v33 = vpop.permute.xlu1 %3538 }
 0x4f9   : > { %4228 = vmatprep.subr.bf16.mxu0 %v6800_v42 }
 0x4fc   : > { %v3566_v10 = vpop.permute.xlu0 %3565  ;;  %4229 = vmatpush1.bf16.msra.mxu0 %v8994_v2  ;;  %v3549_v17 = vpop.permute.xlu1 %3548  ;;  %v3653_v2 = vsel %vm1790_vm12, %v9033_v46, %v3541_v22 }
 0x4fd   : > { %4230 = vmatprep.subr.bf16.mxu0 %v6800_v42  ;;  %v3683_v34 = vsel %vm2466_vm14, %v3653_v2, %v3566_v10 }
 0x4ff   : > { %4114 = vmatmul.mubr.bf16.gmra.mrb[108].mxu0 %v9255_v21 }
 0x500   : > { %v3543_v59 = vpop.permute.xlu0 %3542  ;;  %4231 = vmatpush1.bf16.msra.mxu0 %v9012_v13  ;;  %v3665_v13 = vsel %vm1790_vm12, %v9095_v28, %v3549_v17 }
 0x501   : > { %4232 = vmatprep.subr.bf16.mxu0 %v6800_v42  ;;  %v3656_v30 = vsel %vm1790_vm12, %v9031_v5, %v3543_v59 }
 0x502   : > { %v3685_v22 = vsel %vm2466_vm14, %v3656_v30, %v3568_v56 }
 0x504   : > { %v3595_v57 = vpop.permute.xlu0 %3594  ;;  %4233 = vmatpush1.bf16.msra.mxu0 %v9020_v61  ;;  %v3650_v61 = vsel %vm1790_vm12, %v8998_v44, %v3539_v33 }
 0x505   : > { %4234 = vmatprep.subr.bf16.mxu0 %v6800_v42  ;;  %v3681_v28 = vsel %vm2466_vm14, %v3650_v61, %v3564_v54  ;;  %v9339_v5 = vsel %vm3696_vm15, %v3685_v22, %v3595_v57 }
 0x508   : > { %v3576_v9 = vpop.permute.xlu1 %3575  ;;  %v3545_v32 = vpop.permute.xlu0 %3544  ;;  %4235 = vmatpush1.bf16.msra.mxu0 %v9045_v48  ;;  %v9315_v48 = vsel %vm3696_vm15, %v3683_v34, %v3593_v20 }
 0x509   : > { %4236 = vmatprep.subr.bf16.mxu0 %v6800_v42  ;;  %v3659_v6 = vsel %vm1790_vm12, %v9065_v51, %v3545_v32 }
 0x50c   : > { %v3574_v11 = vpop.permute.xlu1 %3573  ;;  %v3570_v45 = vpop.permute.xlu0 %3569  ;;  %4237 = vmatpush1.bf16.msra.mxu0 %v9052_v19 }
 0x50d   : > { %v9311_v0 = vsel %vm2466_vm14, %v3665_v13, %v3574_v11  ;;  %4238 = vmatprep.subr.bf16.mxu0 %v6800_v42 }
 0x50e   : > { %5930 = vmatprep.mubr.msk.bf16.mxu1 %vm3696_vm15, %v9311_v0 }
 0x50f   : > { %4259 = vmatmul.mubr.bf16.vlgmr.msra.gmra.mrb[96].mxu1 %v9315_v48 }
 0x510   : > { %v3591_v46 = vpop.permute.xlu1 %3590  ;;  %4239 = vmatpush1.bf16.msra.mxu0 %v9076_v55  ;;  %v3597_v19 = vpop.permute.xlu0 %3596 }
 0x511   : > { %v9323_v44 = vsel %vm3696_vm15, %v3681_v28, %v3591_v46  ;;  %4240 = vmatprep.subr.bf16.mxu0 %v6800_v42  ;;  %v3775_v28 = vsel %vm1790_vm12, %v9222_v63, %v9242_v8 }
 0x512   : > { %4121 = vmatprep.mubr.bf16.mxu0 %v9323_v44 }
 0x513   : > { %4122 = vmatmul.mubr.bf16.gmra.mrb[112].mxu0 %v9259_v52 }
 0x514   : > { %v3551_v29 = vpop.permute.xlu1 %3550  ;;  %4129 = vmatprep.mubr.bf16.mxu0 %v9315_v48  ;;  %4241 = vmatpush1.bf16.msra.mxu0 %v9082_v38  ;;  %v3609_v40 = vpop.permute.xlu0 %3608 }
 0x515   : > { %v3668_v55 = vsel %vm1790_vm12, %v9093_v49, %v3551_v29  ;;  %4242 = vmatprep.subr.bf16.mxu0 %v6800_v42 }
 0x516   : > { %v3693_v7 = vsel %vm2466_vm14, %v3668_v55, %v3576_v9 }
 0x517   : > { %5931 = vmatprep.mubr.msk.bf16.mxu1 %vm3696_vm15, %v3693_v7 }
 0x518   : > { %v3553_v52 = vpop.permute.xlu1 %3552  ;;  %4267 = vmatmul.mubr.bf16.gmra.mrb[100].mxu1 %v9339_v5  ;;  %4243 = vmatpush1.bf16.msra.mxu0 %v9101_v3  ;;  %v3618_v54 = vpop.permute.xlu0 %3617  ;;  %v3687_v3 = vsel %vm2466_vm14, %v3659_v6, %v3570_v45 }
 0x519   : > { %4244 = vmatprep.subr.bf16.mxu0 %v6800_v42  ;;  %v3671_v38 = vsel %vm1790_vm12, %v9123_v25, %v3553_v52  ;;  %v3738_v42 = vsel %vm1790_vm12, %v9134_v4, %v3609_v40  ;;  %v3722_v25 = vsel %vm3696_vm15, %v3687_v3, %v3597_v19 }
 0x51b   : > { %4130 = vmatmul.mubr.bf16.gmra.mrb[116].mxu0 %v9267_v60  ;;  %v3749_v60 = vsel %vm2466_vm14, %v3738_v42, %v3618_v54 }
 0x51c   : > { %v3578_v49 = vpop.permute.xlu1 %3577  ;;  %4137 = vmatprep.mubr.bf16.mxu0 %v9339_v5  ;;  %4245 = vmatpush1.bf16.msra.mxu0 %v9112_v15  ;;  %v3611_v51 = vpop.permute.xlu0 %3610 }
 0x51d   : > { %v3695_v39 = vsel %vm2466_vm14, %v3671_v38, %v3578_v49  ;;  %v3741_v20 = vsel %vm1790_vm12, %v9152_v50, %v3611_v51 }
 0x51e   : > { %5932 = vmatprep.mubr.msk.bf16.mxu1 %vm3696_vm15, %v3695_v39 }
 0x520   : > { %v3547_v58 = vpop.permute.xlu1 %3546  ;;  %4275 = vmatmul.mubr.bf16.gmra.mrb[104].mxu1 %v3722_v25  ;;  %v3601_v26 = vpop.permute.xlu0 %3600 }
 0x521   : > { %5933 = vmatprep.mubr.msk.bf16.mxu1 %vm3696_vm15, %v3749_v60  ;;  %v3662_v37 = vsel %vm1790_vm12, %v9063_v35, %v3547_v58  ;;  %v3728_v33 = vsel %vm3696_vm15, %v9311_v0, %v3601_v26  ;;  %v9433_v26 = vld [vmem:[%s10384_s6] ss:$0 sm:$0xff] }
 0x523   : > { %4138 = vmatmul.mubr.bf16.gmra.mrb[120].mxu0 %v9282_v41 }
 0x524   : > { %v3572_v15 = vpop.permute.xlu1 %3571  ;;  %4145 = vmatprep.mubr.bf16.mxu0 %v3722_v25 }
 0x525   : > { %v9363_v31 = vsel %vm2466_vm14, %v3662_v37, %v3572_v15 }
 0x528   : > { %v3599_v4 = vpop.permute.xlu1 %3598  ;;  %v3622_v56 = vpop.permute.xlu0 %3621 }
 0x529   : > { %v3725_v16 = vsel %vm3696_vm15, %v9363_v31, %v3599_v4 }
 0x52a   : > { %4283 = vmatmul.mubr.bf16.gmra.mrb[108].mxu1 %v3725_v16 }
 0x52b   : > { %4146 = vmatmul.mubr.bf16.gmra.mrb[124].mxu0 %v9288_v27 }
 0x52c   : > { %v3620_v62 = vpop.permute.xlu1 %3619  ;;  %4153 = vmatprep.mubr.bf16.mxu0 %v3725_v16  ;;  %v3615_v50 = vpop.permute.xlu0 %3614 }
 0x52d   : > { %v3751_v41 = vsel %vm2466_vm14, %v3741_v20, %v3620_v62  ;;  %v3747_v17 = vsel %vm1790_vm12, %v9184_v53, %v3615_v50 }
 0x52e   : > { %5934 = vmatprep.mubr.msk.bf16.mxu1 %vm3696_vm15, %v3751_v41 }
 0x530   : > { %v3613_v35 = vpop.permute.xlu1 %3612  ;;  %v3605_v32 = vpop.permute.xlu0 %3604 }
 0x531   : > { %v3744_v10 = vsel %vm1790_vm12, %v9170_v47, %v3613_v35  ;;  %v3734_v11 = vsel %vm3696_vm15, %v3695_v39, %v3605_v32 }
 0x532   : > { %4291 = vmatmul.mubr.bf16.gmra.mrb[112].mxu1 %v3728_v33  ;;  %v3753_v27 = vsel %vm2466_vm14, %v3744_v10, %v3622_v56 }
 0x533   : > { %4154 = vmatmul.mubr.bf16.gmra.mrb[128].mxu0 %v9323_v44  ;;  %5935 = vmatprep.mubr.msk.bf16.mxu1 %vm3696_vm15, %v3753_v27 }
 0x534   : > { %v3603_v59 = vpop.permute.xlu1 %3602  ;;  %4161 = vmatprep.mubr.bf16.mxu0 %v3728_v33 }
 0x535   : > { %v3731_v47 = vsel %vm3696_vm15, %v3693_v7, %v3603_v59 }
 0x538   : > { %v3624_v57 = vpop.permute.xlu1 %3623  ;;  %v3639_v34 = vpop.permute.xlu0 %3638 }
 0x539   : > { %v3755_v9 = vsel %vm2466_vm14, %v3747_v17, %v3624_v57  ;;  %v4414_v17 = vsub.s32 0, %v6980_v18 }
 0x53a   : > { %4299 = vmatmul.mubr.bf16.gmra.mrb[116].mxu1 %v3731_v47 }
 0x53b   : > { %4162 = vmatmul.mubr.bf16.gmra.mrb[132].mxu0 %v9315_v48  ;;  %5936 = vmatprep.mubr.msk.bf16.mxu1 %vm3696_vm15, %v3755_v9 }
 0x53c   : > { %v3635_v2 = vpop.permute.xlu1 %3634  ;;  %4169 = vmatprep.mubr.bf16.mxu0 %v3731_v47  ;;  %v3637_v45 = vpop.permute.xlu0 %3636 }
 0x53d   : > { %v3770_v13 = vsel %vm1790_vm12, %v9198_v14, %v3635_v2  ;;  %v3773_v0 = vsel %vm1790_vm12, %v9212_v1, %v3637_v45  ;;  %v3779_v1 = vsel %vm2466_vm14, %v3775_v28, %v9238_v12  ;;  %v4447_v2 = vsub.s32 1, %v6980_v18 }
 0x53e   : > { %v3777_v53 = vsel %vm2466_vm14, %v3770_v13, %v3639_v34  ;;  %v3778_v14 = vsel %vm2466_vm14, %v3773_v0, %v9238_v12  ;;  %v3784_v7 = vsel %vm3696_vm15, %v3779_v1, %v9244_v36 }
 0x53f   : > { %v3780_v12 = vsel %vm3696_vm15, %v3777_v53, %v9244_v36  ;;  %v3782_v55 = vsel %vm3696_vm15, %v3778_v14, %v9244_v36 }
 0x540   : > { %v3627_v61 = vpop.permute.xlu1 %3626  ;;  %v3631_v30 = vpop.permute.xlu0 %3630 }
 0x541   : > { %v3757_v48 = vsel %vm3696_vm15, %v3749_v60, %v3627_v61  ;;  %v3763_v29 = vsel %vm3696_vm15, %v3753_v27, %v3631_v30 }
 0x542   : > { %4307 = vmatmul.mubr.bf16.gmra.mrb[120].mxu1 %v3734_v11 }
 0x543   : > { %4170 = vmatmul.mubr.bf16.gmra.mrb[136].mxu0 %v9339_v5  ;;  %5937 = vmatprep.mubr.msk.bf16.mxu1 %vm3696_vm15, %v3777_v53 }
 0x544   : > { %4177 = vmatprep.mubr.bf16.mxu0 %v3734_v11  ;;  %v3629_v46 = vpop.permute.xlu1 %3628 }
 0x545   : > { %v3760_v19 = vsel %vm3696_vm15, %v3751_v41, %v3629_v46 }
 0x548   : > { %v3633_v63 = vpop.permute.xlu1 %3632 }
 0x549   : > { %v3766_v8 = vsel %vm3696_vm15, %v3755_v9, %v3633_v63 }
 0x54a   : > { %4315 = vmatmul.mubr.bf16.gmra.mrb[124].mxu1 %v3757_v48 }
 0x54b   : > { %4178 = vmatmul.mubr.bf16.gmra.mrb[140].mxu0 %v3722_v25  ;;  %5938 = vmatprep.mubr.msk.bf16.mxu1 %vm3696_vm15, %v3778_v14 }
 0x54c   : > { %4185 = vmatprep.mubr.bf16.mxu0 %v3757_v48 }
 0x552   : > { %4323 = vmatmul.mubr.bf16.gmra.mrb[128].mxu1 %v3760_v19 }
 0x553   : > { %4186 = vmatmul.mubr.bf16.gmra.mrb[144].mxu0 %v3725_v16  ;;  %5939 = vmatprep.mubr.msk.bf16.mxu1 %vm3696_vm15, %v3779_v1 }
 0x554   : > { %4193 = vmatprep.mubr.bf16.mxu0 %v3760_v19 }
 0x55a   : > { %4331 = vmatmul.mubr.bf16.gmra.mrb[132].mxu1 %v3763_v29 }
 0x55b   : > { %4194 = vmatmul.mubr.bf16.gmra.mrb[148].mxu0 %v3728_v33  ;;  %5940 = vmatprep.mubr.msk.bf16.mxu1 %vm3696_vm15, %v9250_v23 }
 0x55c   : > { %4201 = vmatprep.mubr.bf16.mxu0 %v3763_v29 }
 0x562   : > { %4339 = vmatmul.mubr.bf16.gmra.mrb[136].mxu1 %v3766_v8 }
 0x563   : > { %4202 = vmatmul.mubr.bf16.gmra.mrb[152].mxu0 %v3731_v47  ;;  %5941 = vmatprep.mubr.msk.bf16.mxu1 %vm3696_vm15, %v9250_v23  ;;  %v9441_v47 = vld [vmem:[%s10385_s7] sm:$0x1f] }
 0x564   : > { %4209 = vmatprep.mubr.bf16.mxu0 %v3766_v8  ;;  %v9448_v45 = vrot.slane %v9441_v47, %v4414_v17  ;;  %v9452_v46 = vrot.slane %v9441_v47, %v4447_v2 }
 0x56a   : > { %4347 = vmatmul.mubr.bf16.gmra.mrb[140].mxu1 %v3780_v12 }
 0x56b   : > { %4210 = vmatmul.mubr.bf16.gmra.mrb[156].mxu0 %v3734_v11  ;;  %5942 = vmatprep.mubr.msk.bf16.mxu1 %vm3696_vm15, %v9250_v23 }
 0x56c   : > { %5929 = vmatprep.mubr.msk.bf16.mxu0 %vm3696_vm15, %v9363_v31 }
 0x572   : > { %4355 = vmatmul.mubr.bf16.gmra.mrb[144].mxu1 %v3782_v55 }
 0x573   : > { %4251 = vmatmul.mubr.bf16.vlgmr.msra.gmra.mrb[160].mxu0 %v9323_v44  ;;  %5943 = vmatprep.mubr.msk.bf16.mxu1 %vm3696_vm15, %v9250_v23 }
 0x57a   : > { %4363 = vmatmul.mubr.bf16.gmra.mrb[148].mxu1 %v3784_v7 }
 0x57b   : > { %5944 = vmatprep.mubr.msk.bf16.mxu1 %vm3696_vm15, %v9250_v23 }
 0x582   : > { %4371 = vmatmul.mubr.bf16.gmra.mrb[152].mxu1 %v9255_v21 }
 0x5ba   : > { %v6232_v22 = vpop.f32.mrb[96].mxu0 }
 0x5bb   : > { %v6233_v40 = vpop.f32.mrb[97].mxu0 }
 0x5bc   : > { %v9426_v5 = vadd.f32 %v6233_v40, %v6232_v22  ;;  %v6235_v52 = vpop.f32.mrb[98].mxu0  ;;  %v4513_v40 = vsub.s32 2, %v6980_v18 }
 0x5bd   : > { %v6236_v38 = vpop.f32.mrb[99].mxu0 }
 0x5be   : > { %v9428_v49 = vadd.f32 %v6236_v38, %v6235_v52 }
 0x5c2   : > { %v6238_v44 = vpop.f32.mrb[100].mxu0 }
 0x5c3   : > { %v6239_v6 = vpop.f32.mrb[101].mxu0 }
 0x5c4   : > { %v6240_v54 = vadd.f32 %v6239_v6, %v6238_v44  ;;  %v6241_v39 = vpop.f32.mrb[102].mxu0 }
 0x5c5   : > { %v6242_v3 = vpop.f32.mrb[103].mxu0 }
 0x5c6   : > { %v6243_v36 = vadd.f32 %v6242_v3, %v6241_v39  ;;  %v4100_v20 = vadd.f32 %v6240_v54, %v9433_v26 }
 0x5c8   : > { %v4103_v35 = vadd.f32 %v6243_v36, %v9433_v26 }
 0x5ca   : > { %v6244_v42 = vpop.f32.mrb[104].mxu0 }
 0x5cb   : > { %v6245_v25 = vpop.f32.mrb[105].mxu0 }
 0x5cc   : > { %v6246_v60 = vadd.f32 %v6245_v25, %v6244_v42  ;;  %v6247_v23 = vpop.f32.mrb[106].mxu0 }
 0x5cd   : > { %v6248_v58 = vpop.f32.mrb[107].mxu0 }
 0x5ce   : > { %v6249_v21 = vadd.f32 %v6248_v58, %v6247_v23  ;;  %v4108_v13 = vadd.f32 %v6246_v60, %v9433_v26  ;;  %v9474_v58 = vrot.slane %v9441_v47, %v4513_v40 }
 0x5d0   : > { %v4111_v48 = vadd.f32 %v6249_v21, %v9433_v26 }
 0x5d2   : > { %v6250_v51 = vpop.f32.mrb[108].mxu0 }
 0x5d3   : > { %v6251_v15 = vpop.f32.mrb[109].mxu0 }
 0x5d4   : > { %v6252_v37 = vadd.f32 %v6251_v15, %v6250_v51  ;;  %v6253_v31 = vpop.f32.mrb[110].mxu0 }
 0x5d5   : > { %v6254_v4 = vpop.f32.mrb[111].mxu0 }
 0x5d6   : > { %v6255_v16 = vadd.f32 %v6254_v4, %v6253_v31  ;;  %v4116_v38 = vadd.f32 %v6252_v37, %v9433_v26 }
 0x5d8   : > { %v4119_v25 = vadd.f32 %v6255_v16, %v9433_v26 }
 0x5e2   : > { %v4260_v62 = vpop.f32.mrb[96].mxu1 }
 0x5e3   : > { %v4261_v41 = vadd.f32 %v4260_v62, %v4100_v20  ;;  %v4262_v56 = vpop.f32.mrb[97].mxu1 }
 0x5e4   : > { %v4263_v10 = vpop.f32.mrb[98].mxu1 }
 0x5e5   : > { %v4264_v33 = vadd.f32 %v4263_v10, %v4103_v35  ;;  %v4265_v27 = vpop.f32.mrb[99].mxu1  ;;  %v9445_v53 = vmax.f32 %v4261_v41, 0.0 }
 0x5e6   : > { %v6256_v50 = vpop.f32.mrb[112].mxu0 }
 0x5e7   : > { %v6257_v59 = vpop.f32.mrb[113].mxu0  ;;  %v9454_v28 = vmax.f32 %v4264_v33, 0.0  ;;  %v4419_v8 = vmul.f32 %v9448_v45, %v9445_v53 }
 0x5e8   : > { %v6258_v57 = vadd.f32 %v6257_v59, %v6256_v50  ;;  %v6259_v9 = vpop.f32.mrb[114].mxu0 }
 0x5e9   : > { %v6260_v32 = vpop.f32.mrb[115].mxu0  ;;  %v4420_v44 = vmul.f32 %v9448_v45, %v9454_v28 }
 0x5ea   : > { %v6261_v34 = vadd.f32 %v6260_v32, %v6259_v9  ;;  %v4124_v9 = vadd.f32 %v6258_v57, %v9433_v26  ;;  %v4581_v32 = vsub.s32 3, %v6980_v18 }
 0x5eb   : > { %v4268_v11 = vpop.f32.mrb[100].mxu1 }
 0x5ec   : > { %v4269_v61 = vadd.f32 %v4268_v11, %v4108_v13  ;;  %v4270_v0 = vpop.f32.mrb[101].mxu1  ;;  %v9504_v57 = vrot.slane %v9441_v47, %v4581_v32 }
 0x5ed   : > { %v4271_v14 = vpop.f32.mrb[102].mxu1 }
 0x5ee   : > { %v9456_v19 = vmax.f32 %v4269_v61, 0.0  ;;  %v4272_v1 = vadd.f32 %v4271_v14, %v4111_v48  ;;  %v6262_v30 = vpop.f32.mrb[116].mxu0  ;;  %v4273_v29 = vpop.f32.mrb[103].mxu1  ;;  %v4127_v14 = vadd.f32 %v6261_v34, %v9433_v26 }
 0x5ef   : > { %v6263_v63 = vpop.f32.mrb[117].mxu0 }
 0x5f0   : > { %v9460_v12 = vmax.f32 %v4272_v1, 0.0  ;;  %v6264_v55 = vadd.f32 %v6263_v63, %v6262_v30  ;;  %v6265_v7 = vpop.f32.mrb[118].mxu0  ;;  %v4454_v22 = vmul.f32 %v9452_v46, %v9456_v19  ;;  %v4421_v35 = vmul.f32 %v9448_v45, %v9456_v19 }
 0x5f1   : > { %v6266_v52 = vpop.f32.mrb[119].mxu0 }
 0x5f2   : > { %v9468_v6 = vadd.f32 %v6266_v52, %v6265_v7  ;;  %v4485_v54 = vadd.f32 %v4454_v22, %v4419_v8  ;;  %v4455_v39 = vmul.f32 %v9452_v46, %v9460_v12  ;;  %v4422_v59 = vmul.f32 %v9448_v45, %v9460_v12 }
 0x5f3   : > { %v4276_v3 = vpop.f32.mrb[104].mxu1 }
 0x5f4   : > { %v4277_v36 = vadd.f32 %v4276_v3, %v4116_v38  ;;  %v4278_v42 = vpop.f32.mrb[105].mxu1  ;;  %v4486_v60 = vadd.f32 %v4455_v39, %v4420_v44  ;;  %v4648_v44 = vsub.s32 4, %v6980_v18 }
 0x5f5   : > { %v4279_v23 = vpop.f32.mrb[106].mxu1 }
 0x5f6   : > { %v9476_v21 = vmax.f32 %v4277_v36, 0.0  ;;  %v4280_v51 = vadd.f32 %v4279_v23, %v4119_v25  ;;  %v6268_v15 = vpop.f32.mrb[120].mxu0  ;;  %v4281_v37 = vpop.f32.mrb[107].mxu1  ;;  %v4132_v36 = vadd.f32 %v6264_v55, %v9433_v26  ;;  %v4135_v55 = vadd.f32 %v9468_v6, %v9433_v26 }
 0x5f7   : > { %v6269_v31 = vpop.f32.mrb[121].mxu0 }
 0x5f8   : > { %v9478_v4 = vmax.f32 %v4280_v51, 0.0  ;;  %v9480_v20 = vadd.f32 %v6269_v31, %v6268_v15  ;;  %v6271_v62 = vpop.f32.mrb[122].mxu0  ;;  %v4521_v41 = vmul.f32 %v9474_v58, %v9476_v21  ;;  %v4456_v16 = vmul.f32 %v9452_v46, %v9476_v21 }
 0x5f9   : > { %v6272_v56 = vpop.f32.mrb[123].mxu0  ;;  %v4423_v39 = vmul.f32 %v9448_v45, %v9476_v21  ;;  %v9790_v43 = vmul.f32 %v9504_v57, %v9476_v21 }
 0x5fa   : > { %v9488_v10 = vadd.f32 %v6272_v56, %v6271_v62  ;;  %v4553_v33 = vadd.f32 %v4521_v41, %v4485_v54  ;;  %v4522_v27 = vmul.f32 %v9474_v58, %v9478_v4  ;;  %v4487_v50 = vadd.f32 %v4456_v16, %v4421_v35 }
 0x5fb   : > { %v4457_v17 = vmul.f32 %v9452_v46, %v9478_v4  ;;  %v4424_v15 = vmul.f32 %v9448_v45, %v9478_v4 }
 0x5fc   : > { %v4554_v2 = vadd.f32 %v4522_v27, %v4486_v60 }
 0x5fd   : > { %v4284_v13 = vpop.f32.mrb[108].mxu1  ;;  %v4488_v11 = vadd.f32 %v4457_v17, %v4422_v59 }
 0x5fe   : > { %v4285_v61 = vadd.f32 %v4284_v13, %v4124_v9  ;;  %v6274_v0 = vpop.f32.mrb[124].mxu0  ;;  %v4286_v48 = vpop.f32.mrb[109].mxu1  ;;  %v9533_v13 = vrot.slane %v9441_v47, %v4648_v44 }
 0x5ff   : > { %v6275_v1 = vpop.f32.mrb[125].mxu0  ;;  %v4287_v30 = vpop.f32.mrb[110].mxu1 }
 0x600   : > { %v9499_v29 = vmax.f32 %v4285_v61, 0.0  ;;  %v9501_v63 = vadd.f32 %v6275_v1, %v6274_v0  ;;  %v4288_v8 = vadd.f32 %v4287_v30, %v4127_v14  ;;  %v6277_v7 = vpop.f32.mrb[126].mxu0  ;;  %v4289_v22 = vpop.f32.mrb[111].mxu1 }
 0x601   : > { %v6278_v40 = vpop.f32.mrb[127].mxu0 }
 0x602   : > { %v9506_v52 = vmax.f32 %v4288_v8, 0.0  ;;  %v9508_v38 = vadd.f32 %v6278_v40, %v6277_v7  ;;  %v4589_v34 = vmul.f32 %v9504_v57, %v9499_v29  ;;  %v4523_v54 = vmul.f32 %v9474_v58, %v9499_v29 }
 0x603   : > { %v4458_v3 = vmul.f32 %v9452_v46, %v9499_v29  ;;  %v4425_v1 = vmul.f32 %v9448_v45, %v9499_v29 }
 0x604   : > { %v4620_v42 = vadd.f32 %v4589_v34, %v4553_v33  ;;  %v4590_v25 = vmul.f32 %v9504_v57, %v9506_v52  ;;  %v4524_v60 = vmul.f32 %v9474_v58, %v9506_v52  ;;  %v4555_v18 = vadd.f32 %v4523_v54, %v4487_v50 }
 0x605   : > { %v4292_v23 = vpop.f32.mrb[112].mxu1  ;;  %v4489_v51 = vadd.f32 %v4458_v3, %v4423_v39  ;;  %v4459_v37 = vmul.f32 %v9452_v46, %v9506_v52  ;;  %v4143_v34 = vadd.f32 %v9488_v10, %v9433_v26 }
 0x606   : > { %v4293_v31 = vadd.f32 %v4292_v23, %v4132_v36  ;;  %v6280_v62 = vpop.f32.mrb[128].mxu0  ;;  %v4294_v41 = vpop.f32.mrb[113].mxu1  ;;  %v4621_v16 = vadd.f32 %v4590_v25, %v4554_v2  ;;  %v4556_v56 = vadd.f32 %v4524_v60, %v4488_v11  ;;  %v4140_v11 = vadd.f32 %v9480_v20, %v9433_v26 }
 0x607   : > { %v6281_v35 = vpop.f32.mrb[129].mxu0  ;;  %v4295_v33 = vpop.f32.mrb[114].mxu1  ;;  %v4490_v27 = vadd.f32 %v4459_v37, %v4424_v15  ;;  %v4426_v37 = vmul.f32 %v9448_v45, %v9506_v52 }
 0x608   : > { %v4389_v59 = vmax.f32 %v4293_v31, 0.0  ;;  %v9530_v50 = vadd.f32 %v6281_v35, %v6280_v62  ;;  %v4296_v17 = vadd.f32 %v4295_v33, %v4135_v55  ;;  %v6283_v9 = vpop.f32.mrb[130].mxu0  ;;  %v4297_v32 = vpop.f32.mrb[115].mxu1 }
 0x609   : > { %v6284_v61 = vpop.f32.mrb[131].mxu0  ;;  %v4148_v32 = vadd.f32 %v9501_v63, %v9433_v26 }
 0x60a   : > { %v9535_v0 = vmax.f32 %v4296_v17, 0.0  ;;  %v9537_v48 = vadd.f32 %v6284_v61, %v6283_v9  ;;  %v4656_v6 = vmul.f32 %v9533_v13, %v4389_v59  ;;  %v4591_v2 = vmul.f32 %v9504_v57, %v4389_v59 }
 0x60b   : > { %v4525_v14 = vmul.f32 %v9474_v58, %v4389_v59  ;;  %v4460_v47 = vmul.f32 %v9452_v46, %v4389_v59 }
 0x60c   : > { %v4685_v30 = vadd.f32 %v4656_v6, %v4620_v42  ;;  %v4657_v8 = vmul.f32 %v9533_v13, %v9535_v0  ;;  %v4622_v7 = vadd.f32 %v4591_v2, %v4555_v18  ;;  %v4592_v22 = vmul.f32 %v9504_v57, %v9535_v0 }
 0x60d   : > { %v4300_v40 = vpop.f32.mrb[116].mxu1  ;;  %v4557_v20 = vadd.f32 %v4525_v14, %v4489_v51  ;;  %v4526_v44 = vmul.f32 %v9474_v58, %v9535_v0  ;;  %v4491_v54 = vadd.f32 %v4460_v47, %v4425_v1  ;;  %v4461_v10 = vmul.f32 %v9452_v46, %v9535_v0 }
 0x60e   : > { %v4301_v39 = vadd.f32 %v4300_v40, %v4140_v11  ;;  %v6286_v3 = vpop.f32.mrb[132].mxu0  ;;  %v4302_v36 = vpop.f32.mrb[117].mxu1  ;;  %v4729_v42 = vsel %vm1658_vm8, %v4685_v30, 0.0  ;;  %v4686_v25 = vadd.f32 %v4657_v8, %v4621_v16  ;;  %v4623_v60 = vadd.f32 %v4592_v22, %v4556_v56 }
 0x60f   : > { %4730 = vadd.xlane.f32.xlu0 %v4729_v42  ;;  %v6287_v23 = vpop.f32.mrb[133].mxu0  ;;  %v4303_v18 = vpop.f32.mrb[118].mxu1  ;;  %v4558_v15 = vadd.f32 %v4526_v44, %v4490_v27  ;;  %v4492_v56 = vadd.f32 %v4461_v10, %v4426_v37  ;;  %v4427_v6 = vmul.f32 %v9448_v45, %v4389_v59  ;;  %v4151_v8 = vadd.f32 %v9508_v38, %v9433_v26 }
 0x610   : > { %v4391_v51 = vmax.f32 %v4301_v39, 0.0  ;;  %v9560_v31 = vadd.f32 %v6287_v23, %v6286_v3  ;;  %v4304_v62 = vadd.f32 %v4303_v18, %v4143_v34  ;;  %v6289_v41 = vpop.f32.mrb[134].mxu0  ;;  %v4305_v55 = vpop.f32.mrb[119].mxu1  ;;  %v4732_v16 = vsel %vm1658_vm8, %v4686_v25, 0.0 }
 0x611   : > { %v6290_v35 = vpop.f32.mrb[135].mxu0  ;;  %v4428_v25 = vmul.f32 %v9448_v45, %v9535_v0  ;;  %v9595_v55 = vmul.f32 0.0, %v9448_v45  ;;  %v4449_v0 = vmul.f32 0.0, %v9452_v46 }
 0x612   : > { %v9563_v33 = vmax.f32 %v4304_v62, 0.0  ;;  %v9565_v17 = vadd.f32 %v6290_v35, %v6289_v41  ;;  %v4658_v27 = vmul.f32 %v9533_v13, %v4391_v51  ;;  %v4593_v9 = vmul.f32 %v9504_v57, %v4391_v51 }
 0x613   : > { %4733 = vadd.xlane.f32.xlu0 %v4732_v16  ;;  %v4527_v61 = vmul.f32 %v9474_v58, %v4391_v51  ;;  %v4462_v2 = vmul.f32 %v9452_v46, %v4391_v51 }
 0x614   : > { %v4687_v11 = vadd.f32 %v4658_v27, %v4622_v7  ;;  %v4659_v14 = vmul.f32 %v9533_v13, %v9563_v33  ;;  %v4624_v1 = vadd.f32 %v4593_v9, %v4557_v20  ;;  %v4594_v47 = vmul.f32 %v9504_v57, %v9563_v33 }
 0x615   : > { %v4308_v30 = vpop.f32.mrb[120].mxu1  ;;  %v4559_v22 = vadd.f32 %v4527_v61, %v4491_v54  ;;  %v4528_v63 = vmul.f32 %v9474_v58, %v9563_v33  ;;  %v4493_v40 = vadd.f32 %v4462_v2, %v4427_v6  ;;  %v4463_v38 = vmul.f32 %v9452_v46, %v9563_v33 }
 0x616   : > { %v4309_v59 = vadd.f32 %v4308_v30, %v4148_v32  ;;  %v6292_v34 = vpop.f32.mrb[136].mxu0  ;;  %v4310_v44 = vpop.f32.mrb[121].mxu1  ;;  %v4735_v7 = vsel %vm1658_vm8, %v4687_v11, 0.0  ;;  %v4688_v39 = vadd.f32 %v4659_v14, %v4623_v60  ;;  %v4625_v3 = vadd.f32 %v4594_v47, %v4558_v15 }
 0x617   : > { %v6293_v20 = vpop.f32.mrb[137].mxu0  ;;  %4736 = vadd.xlane.f32.xlu1 %v4735_v7  ;;  %v4311_v36 = vpop.f32.mrb[122].mxu1  ;;  %v4560_v42 = vadd.f32 %v4528_v63, %v4492_v56  ;;  %v9591_v60 = vadd.f32 %v9426_v5, %v9433_v26  ;;  %v4494_v41 = vadd.f32 %v4463_v38, %v4428_v25  ;;  %v4156_v5 = vadd.f32 %v9530_v50, %v9433_v26 }
 0x618   : > { %v4393_v54 = vmax.f32 %v4309_v59, 0.0  ;;  %v9587_v23 = vadd.f32 %v6293_v20, %v6292_v34  ;;  %v4312_v18 = vadd.f32 %v4311_v36, %v4151_v8  ;;  %v6295_v37 = vpop.f32.mrb[138].mxu0  ;;  %v4313_v10 = vpop.f32.mrb[123].mxu1  ;;  %v4738_v62 = vsel %vm1658_vm8, %v4688_v39, 0.0 }
 0x619   : > { %v6296_v15 = vpop.f32.mrb[139].mxu0  ;;  %v4429_v32 = vmul.f32 %v9448_v45, %v4391_v51  ;;  %v4159_v30 = vadd.f32 %v9537_v48, %v9433_v26  ;;  %v4430_v36 = vmul.f32 %v9448_v45, %v9563_v33  ;;  %v9633_v10 = vmul.f32 %v9452_v46, %v9445_v53 }
 0x61a   : > { %v9598_v35 = vmax.f32 %v4312_v18, 0.0  ;;  %v9600_v16 = vadd.f32 %v6296_v15, %v6295_v37  ;;  %v4660_v56 = vmul.f32 %v9533_v13, %v4393_v54  ;;  %v4595_v27 = vmul.f32 %v9504_v57, %v4393_v54 }
 0x61b   : > { %4739 = vadd.xlane.f32.xlu1 %v4738_v62  ;;  %v4529_v9 = vmul.f32 %v9474_v58, %v4393_v54  ;;  %v4464_v61 = vmul.f32 %v9452_v46, %v4393_v54  ;;  %v9629_v37 = vadd.f32 %v4449_v0, %v9595_v55 }
 0x61c   : > { %v4689_v6 = vadd.f32 %v4660_v56, %v4624_v1  ;;  %v4661_v2 = vmul.f32 %v9533_v13, %v9598_v35  ;;  %v4626_v11 = vadd.f32 %v4595_v27, %v4559_v22  ;;  %v4596_v14 = vmul.f32 %v9504_v57, %v9598_v35 }
 0x61d   : > { %v4316_v47 = vpop.f32.mrb[124].mxu1  ;;  %v4561_v8 = vadd.f32 %v4529_v9, %v4493_v40  ;;  %v4530_v50 = vmul.f32 %v9474_v58, %v9598_v35  ;;  %v4495_v63 = vadd.f32 %v4464_v61, %v4429_v32  ;;  %v4465_v48 = vmul.f32 %v9452_v46, %v9598_v35 }
 0x61e   : > { %v4317_v51 = vadd.f32 %v4316_v47, %v4156_v5  ;;  %v6298_v59 = vpop.f32.mrb[140].mxu0  ;;  %v4318_v34 = vpop.f32.mrb[125].mxu1  ;;  %v4741_v1 = vsel %vm1658_vm8, %v4689_v6, 0.0  ;;  %v4690_v44 = vadd.f32 %v4661_v2, %v4625_v3  ;;  %v4627_v7 = vadd.f32 %v4596_v14, %v4560_v42 }
 0x61f   : > { %4742 = vadd.xlane.f32.xlu0 %v4741_v1  ;;  %v6299_v22 = vpop.f32.mrb[141].mxu0  ;;  %v4319_v39 = vpop.f32.mrb[126].mxu1  ;;  %v4562_v20 = vadd.f32 %v4530_v50, %v4494_v41  ;;  %v9624_v40 = vadd.f32 %v9428_v49, %v9433_v26  ;;  %v4496_v62 = vadd.f32 %v4465_v48, %v4430_v36  ;;  %v9637_v49 = vmul.f32 0.0, %v9504_v57 }
 0x620   : > { %v4395_v25 = vmax.f32 %v4317_v51, 0.0  ;;  %v9626_v38 = vadd.f32 %v6299_v22, %v6298_v59  ;;  %v4320_v18 = vadd.f32 %v4319_v39, %v4159_v30  ;;  %v6301_v3 = vpop.f32.mrb[142].mxu0  ;;  %v4321_v42 = vpop.f32.mrb[127].mxu1  ;;  %v4744_v15 = vsel %vm1658_vm8, %v4690_v44, 0.0 }
 0x621   : > { %v6302_v33 = vpop.f32.mrb[143].mxu0  ;;  %v4164_v5 = vadd.f32 %v9560_v31, %v9433_v26  ;;  %v4431_v32 = vmul.f32 %v9448_v45, %v4393_v54  ;;  %v4167_v50 = vadd.f32 %v9565_v17, %v9433_v26 }
 0x622   : > { %v9639_v41 = vmax.f32 %v4320_v18, 0.0  ;;  %v9641_v56 = vadd.f32 %v6302_v33, %v6301_v3  ;;  %v4662_v27 = vmul.f32 %v9533_v13, %v4395_v25  ;;  %v4597_v0 = vmul.f32 %v9504_v57, %v4395_v25 }
 0x623   : > { %4745 = vadd.xlane.f32.xlu0 %v4744_v15  ;;  %v4531_v9 = vmul.f32 %v9474_v58, %v4395_v25  ;;  %v4466_v61 = vmul.f32 %v9452_v46, %v4395_v25  ;;  %v9671_v33 = vmul.f32 %v9504_v57, %v9445_v53  ;;  %v9675_v15 = vmul.f32 %v9452_v46, %v9454_v28 }
 0x624   : > { %v4691_v6 = vadd.f32 %v4662_v27, %v4626_v11  ;;  %v4663_v2 = vmul.f32 %v9533_v13, %v9639_v41  ;;  %v4628_v14 = vadd.f32 %v4597_v0, %v4561_v8  ;;  %v4598_v47 = vmul.f32 %v9504_v57, %v9639_v41 }
 0x625   : > { %v4324_v30 = vpop.f32.mrb[128].mxu1  ;;  %v4563_v51 = vadd.f32 %v4531_v9, %v4495_v63  ;;  %v4532_v31 = vmul.f32 %v9474_v58, %v9639_v41  ;;  %v4497_v59 = vadd.f32 %v4466_v61, %v4431_v32  ;;  %v9661_v8 = vmul.f32 %v9474_v58, %v9445_v53 }
 0x626   : > { %v4325_v54 = vadd.f32 %v4324_v30, %v4164_v5  ;;  %v6304_v34 = vpop.f32.mrb[144].mxu0  ;;  %v4326_v1 = vpop.f32.mrb[129].mxu1  ;;  %v4747_v11 = vsel %vm1658_vm8, %v4691_v6, 0.0  ;;  %v4692_v44 = vadd.f32 %v4663_v2, %v4627_v7  ;;  %v4629_v22 = vadd.f32 %v4598_v47, %v4562_v20 }
 0x627   : > { %v6305_v39 = vpop.f32.mrb[145].mxu0  ;;  %4748 = vadd.xlane.f32.xlu1 %v4747_v11  ;;  %v4327_v36 = vpop.f32.mrb[130].mxu1  ;;  %v4564_v17 = vadd.f32 %v4532_v31, %v4496_v62  ;;  %v4432_v63 = vmul.f32 %v9448_v45, %v9598_v35  ;;  %v4467_v48 = vmul.f32 %v9452_v46, %v9639_v41  ;;  %v9679_v35 = vmul.f32 %v9474_v58, %v9454_v28 }
 0x628   : > { %v4397_v18 = vmax.f32 %v4325_v54, 0.0  ;;  %v9667_v3 = vadd.f32 %v6305_v39, %v6304_v34  ;;  %v4328_v42 = vadd.f32 %v4327_v36, %v4167_v50  ;;  %v6307_v7 = vpop.f32.mrb[146].mxu0  ;;  %v4329_v20 = vpop.f32.mrb[131].mxu1  ;;  %v4750_v27 = vsel %vm1658_vm8, %v4692_v44, 0.0 }
 0x629   : > { %v6308_v62 = vpop.f32.mrb[147].mxu0  ;;  %v4498_v0 = vadd.f32 %v4467_v48, %v4432_v63  ;;  %v4172_v61 = vadd.f32 %v9587_v23, %v9433_v26  ;;  %v4433_v2 = vmul.f32 %v9448_v45, %v4395_v25  ;;  %v4175_v1 = vadd.f32 %v9600_v16, %v9433_v26 }
 0x62a   : > { %v9682_v5 = vmax.f32 %v4328_v42, 0.0  ;;  %v9684_v9 = vadd.f32 %v6308_v62, %v6307_v7  ;;  %v4664_v32 = vmul.f32 %v9533_v13, %v4397_v18  ;;  %v4599_v53 = vmul.f32 %v9504_v57, %v4397_v18 }
 0x62b   : > { %4751 = vadd.xlane.f32.xlu1 %v4750_v27  ;;  %v4533_v6 = vmul.f32 %v9474_v58, %v4397_v18  ;;  %v4468_v47 = vmul.f32 %v9452_v46, %v4397_v18  ;;  %v4434_v20 = vmul.f32 %v9448_v45, %v9639_v41 }
 0x62c   : > { %v4693_v30 = vadd.f32 %v4664_v32, %v4628_v14  ;;  %v4665_v50 = vmul.f32 %v9533_v13, %v9682_v5  ;;  %v4630_v31 = vadd.f32 %v4599_v53, %v4563_v51  ;;  %v4600_v54 = vmul.f32 %v9504_v57, %v9682_v5 }
 0x62d   : > { %v4332_v34 = vpop.f32.mrb[132].mxu1  ;;  %v4565_v11 = vadd.f32 %v4533_v6, %v4497_v59  ;;  %v4534_v23 = vmul.f32 %v9474_v58, %v9682_v5  ;;  %v4499_v44 = vadd.f32 %v4468_v47, %v4433_v2  ;;  %v4469_v16 = vmul.f32 %v9452_v46, %v9682_v5 }
 0x62e   : > { %v4333_v25 = vadd.f32 %v4332_v34, %v4172_v61  ;;  %v6310_v39 = vpop.f32.mrb[148].mxu0  ;;  %v4334_v36 = vpop.f32.mrb[133].mxu1  ;;  %v4753_v14 = vsel %vm1658_vm8, %v4693_v30, 0.0  ;;  %v4694_v63 = vadd.f32 %v4665_v50, %v4629_v22  ;;  %v4631_v48 = vadd.f32 %v4600_v54, %v4564_v17 }
 0x62f   : > { %v6311_v51 = vpop.f32.mrb[149].mxu0  ;;  %4754 = vadd.xlane.f32.xlu0 %v4753_v14  ;;  %v4335_v42 = vpop.f32.mrb[134].mxu1  ;;  %v4566_v7 = vadd.f32 %v4534_v23, %v4498_v0  ;;  %v9708_v59 = vmul.f32 %v9504_v57, %v9454_v28  ;;  %v9714_v53 = vmul.f32 %v9504_v57, %v9456_v19  ;;  %v4500_v61 = vadd.f32 %v4469_v16, %v4434_v20 }
 0x630   : > { %v4399_v62 = vmax.f32 %v4333_v25, 0.0  ;;  %v9710_v27 = vadd.f32 %v6311_v51, %v6310_v39  ;;  %v4336_v32 = vadd.f32 %v4335_v42, %v4175_v1  ;;  %v6313_v22 = vpop.f32.mrb[150].mxu0  ;;  %v4337_v17 = vpop.f32.mrb[135].mxu1  ;;  %v4756_v41 = vsel %vm1658_vm8, %v4694_v63, 0.0 }
 0x631   : > { %v6314_v0 = vpop.f32.mrb[151].mxu0  ;;  %v9719_v6 = vmul.f32 %v9533_v13, %v9456_v19  ;;  %v9723_v28 = vmul.f32 %v9474_v58, %v9456_v19  ;;  %v4180_v54 = vadd.f32 %v9626_v38, %v9433_v26  ;;  %v4435_v1 = vmul.f32 %v9448_v45, %v4397_v18 }
 0x632   : > { %v9725_v2 = vmax.f32 %v4336_v32, 0.0  ;;  %v9727_v47 = vadd.f32 %v6314_v0, %v6313_v22  ;;  %v4666_v30 = vmul.f32 %v9533_v13, %v4399_v62  ;;  %v4601_v50 = vmul.f32 %v9504_v57, %v4399_v62 }
 0x633   : > { %4757 = vadd.xlane.f32.xlu0 %v4756_v41  ;;  %v4535_v34 = vmul.f32 %v9474_v58, %v4399_v62  ;;  %v4470_v23 = vmul.f32 %v9452_v46, %v4399_v62  ;;  %v4183_v63 = vadd.f32 %v9641_v56, %v9433_v26  ;;  %v4436_v41 = vmul.f32 %v9448_v45, %v9682_v5 }
 0x634   : > { %v4695_v19 = vadd.f32 %v4666_v30, %v4630_v31  ;;  %v4667_v25 = vmul.f32 %v9533_v13, %v9725_v2  ;;  %v4632_v39 = vadd.f32 %v4601_v50, %v4565_v11  ;;  %v4602_v36 = vmul.f32 %v9504_v57, %v9725_v2 }
 0x635   : > { %v4340_v14 = vpop.f32.mrb[136].mxu1  ;;  %v4567_v51 = vadd.f32 %v4535_v34, %v4499_v44  ;;  %v4536_v38 = vmul.f32 %v9474_v58, %v9725_v2  ;;  %v4501_v42 = vadd.f32 %v4470_v23, %v4435_v1  ;;  %v4471_v56 = vmul.f32 %v9452_v46, %v9725_v2 }
 0x636   : > { %v4341_v18 = vadd.f32 %v4340_v14, %v4180_v54  ;;  %v6316_v20 = vpop.f32.mrb[152].mxu0  ;;  %v4342_v16 = vpop.f32.mrb[137].mxu1  ;;  %v4759_v31 = vsel %vm1658_vm8, %v4695_v19, 0.0  ;;  %v4696_v32 = vadd.f32 %v4667_v25, %v4631_v48  ;;  %v4633_v22 = vadd.f32 %v4602_v36, %v4566_v7 }
 0x637   : > { %v4343_v11 = vpop.f32.mrb[138].mxu1  ;;  %4760 = vadd.xlane.f32.xlu1 %v4759_v31  ;;  %v6317_v17 = vpop.f32.mrb[153].mxu0  ;;  %v4568_v0 = vadd.f32 %v4536_v38, %v4500_v61  ;;  %v9751_v44 = vmul.f32 %v9533_v13, %v9460_v12  ;;  %v9757_v34 = vmul.f32 %v9504_v57, %v9460_v12  ;;  %v4502_v1 = vadd.f32 %v4471_v56, %v4436_v41 }
 0x638   : > { %v4401_v30 = vmax.f32 %v4341_v18, 0.0  ;;  %v4344_v50 = vadd.f32 %v4343_v11, %v4183_v63  ;;  %v9753_v54 = vadd.f32 %v6317_v17, %v6316_v20  ;;  %v6319_v48 = vpop.f32.mrb[154].mxu0  ;;  %v4345_v7 = vpop.f32.mrb[139].mxu1  ;;  %v4762_v5 = vsel %vm1658_vm8, %v4696_v32, 0.0 }
 0x639   : > { %v6320_v61 = vpop.f32.mrb[155].mxu0  ;;  %v9762_v23 = vmul.f32 %v9533_v13, %v9476_v21  ;;  %v9766_v19 = vmul.f32 %v9474_v58, %v9460_v12  ;;  %v4188_v38 = vadd.f32 %v9667_v3, %v9433_v26  ;;  %v4437_v20 = vmul.f32 %v9448_v45, %v4399_v62 }
 0x63a   : > { %v9768_v25 = vmax.f32 %v4344_v50, 0.0  ;;  %v9770_v36 = vadd.f32 %v6320_v61, %v6319_v48  ;;  %v4668_v14 = vmul.f32 %v9533_v13, %v4401_v30  ;;  %v4603_v63 = vmul.f32 %v9504_v57, %v4401_v30 }
 0x63b   : > { %4763 = vadd.xlane.f32.xlu1 %v4762_v5  ;;  %v4537_v18 = vmul.f32 %v9474_v58, %v4401_v30  ;;  %v4472_v16 = vmul.f32 %v9452_v46, %v4401_v30  ;;  %v4191_v41 = vadd.f32 %v9684_v9, %v9433_v26  ;;  %v4438_v9 = vmul.f32 %v9448_v45, %v9725_v2 }
 0x63c   : > { %v4697_v12 = vadd.f32 %v4668_v14, %v4632_v39  ;;  %v4669_v31 = vmul.f32 %v9533_v13, %v9768_v25  ;;  %v4634_v32 = vadd.f32 %v4603_v63, %v4567_v51  ;;  %v4604_v11 = vmul.f32 %v9504_v57, %v9768_v25 }
 0x63d   : > { %v4348_v17 = vpop.f32.mrb[140].mxu1  ;;  %v4569_v56 = vadd.f32 %v4537_v18, %v4501_v42  ;;  %v4538_v3 = vmul.f32 %v9474_v58, %v9768_v25  ;;  %v4503_v50 = vadd.f32 %v4472_v16, %v4437_v20  ;;  %v4473_v42 = vmul.f32 %v9452_v46, %v9768_v25 }
 0x63e   : > { %v4349_v62 = vadd.f32 %v4348_v17, %v4188_v38  ;;  %v6322_v48 = vpop.f32.mrb[156].mxu0  ;;  %v4350_v7 = vpop.f32.mrb[141].mxu1  ;;  %v4765_v39 = vsel %vm1658_vm8, %v4697_v12, 0.0  ;;  %v4698_v61 = vadd.f32 %v4669_v31, %v4633_v22  ;;  %v4635_v5 = vadd.f32 %v4604_v11, %v4568_v0 }
 0x63f   : > { %v4351_v51 = vpop.f32.mrb[142].mxu1  ;;  %4766 = vadd.xlane.f32.xlu0 %v4765_v39  ;;  %v6323_v14 = vpop.f32.mrb[157].mxu0  ;;  %v4570_v63 = vadd.f32 %v4538_v3, %v4502_v1  ;;  %v9800_v16 = vmul.f32 %v9533_v13, %v9478_v4  ;;  %v9805_v12 = vmul.f32 %v9533_v13, %v9499_v29  ;;  %v9809_v2 = vmul.f32 %v9504_v57, %v9478_v4 }
 0x640   : > { %v9796_v38 = vmax.f32 %v4349_v62, 0.0  ;;  %v4352_v18 = vadd.f32 %v4351_v51, %v4191_v41  ;;  %v6324_v20 = vadd.f32 %v6323_v14, %v6322_v48  ;;  %v6325_v22 = vpop.f32.mrb[158].mxu0  ;;  %v4353_v0 = vpop.f32.mrb[143].mxu1  ;;  %v4768_v21 = vsel %vm1658_vm8, %v4698_v61, 0.0 }
 0x641   : > { %v6326_v1 = vpop.f32.mrb[159].mxu0  ;;  %v4504_v31 = vadd.f32 %v4473_v42, %v4438_v9  ;;  %v4196_v29 = vadd.f32 %v9710_v27, %v9433_v26  ;;  %v4439_v4 = vmul.f32 %v9448_v45, %v4401_v30  ;;  %v4199_v27 = vadd.f32 %v9727_v47, %v9433_v26 }
 0x642   : > { %v9811_v11 = vmax.f32 %v4352_v18, 0.0  ;;  %v9813_v17 = vadd.f32 %v6326_v1, %v6325_v22  ;;  %v4670_v41 = vmul.f32 %v9533_v13, %v9796_v38  ;;  %v4605_v3 = vmul.f32 %v9504_v57, %v9796_v38 }
 0x643   : > { %4769 = vadd.xlane.f32.xlu0 %v4768_v21  ;;  %v4539_v62 = vmul.f32 %v9474_v58, %v9796_v38  ;;  %v4474_v48 = vmul.f32 %v9452_v46, %v9796_v38  ;;  %v4440_v47 = vmul.f32 %v9448_v45, %v9768_v25  ;;  %v4207_v25 = vadd.f32 %v9770_v36, %v9433_v26 }
 0x644   : > { %v4699_v7 = vadd.f32 %v4670_v41, %v4634_v32  ;;  %v4671_v39 = vmul.f32 %v9533_v13, %v9811_v11  ;;  %v4636_v61 = vadd.f32 %v4605_v3, %v4569_v56  ;;  %v4606_v51 = vmul.f32 %v9504_v57, %v9811_v11 }
 0x645   : > { %v4356_v14 = vpop.f32.mrb[144].mxu1  ;;  %v4571_v9 = vadd.f32 %v4539_v62, %v4503_v50  ;;  %v9832_v42 = vadd.f32 %v4474_v48, %v4439_v4  ;;  %v4540_v30 = vmul.f32 %v9474_v58, %v9811_v11  ;;  %v4475_v50 = vmul.f32 %v9452_v46, %v9811_v11 }
 0x646   : > { %v4357_v18 = vadd.f32 %v4356_v14, %v4196_v29  ;;  %v4252_v22 = vpop.f32.mrb[160].mxu0  ;;  %v4358_v32 = vpop.f32.mrb[145].mxu1  ;;  %v4771_v0 = vsel %vm1658_vm8, %v4699_v7, 0.0  ;;  %v4700_v1 = vadd.f32 %v4671_v39, %v4635_v5  ;;  %v4637_v56 = vadd.f32 %v4606_v51, %v4570_v63 }
 0x647   : > { %v4253_v21 = vadd.f32 %v4252_v22, %v9591_v60  ;;  %v4359_v41 = vpop.f32.mrb[146].mxu1  ;;  %4772 = vadd.xlane.f32.xlu1 %v4771_v0  ;;  %v4254_v3 = vpop.f32.mrb[161].mxu0  ;;  %v9838_v24 = vadd.f32 %v4540_v30, %v4504_v31  ;;  %v4204_v5 = vadd.f32 %v9753_v54, %v9433_v26  ;;  %v9850_v60 = vmul.f32 %v9533_v13, %v9506_v52 }
 0x648   : > { %v9844_v29 = vmax.f32 %v4357_v18, 0.0  ;;  %v4360_v62 = vadd.f32 %v4359_v41, %v4199_v27  ;;  %v4255_v4 = vpop.f32.mrb[162].mxu0  ;;  %v4361_v48 = vpop.f32.mrb[147].mxu1  ;;  %v9855_v39 = vadd.f32 %v4475_v50, %v4440_v47  ;;  %v4774_v14 = vsel %vm1658_vm8, %v4700_v1, 0.0 }
 0x649   : > { %v4379_v63 = vmax.f32 %v4253_v21, 0.0  ;;  %v4256_v31 = vadd.f32 %v4255_v4, %v9624_v40  ;;  %v4257_v7 = vpop.f32.mrb[163].mxu0  ;;  %v4212_v32 = vadd.f32 %v6324_v20, %v9433_v26 }
 0x64a   : > { %v9857_v51 = vmax.f32 %v4360_v62, 0.0  ;;  %v4672_v54 = vmul.f32 %v9533_v13, %v9844_v29  ;;  %v4607_v52 = vmul.f32 %v9504_v57, %v9844_v29 }
 0x64b   : > { %v4417_v27 = vmul.f32 %v9448_v45, %v4379_v63  ;;  %v4450_v40 = vmul.f32 %v9452_v46, %v4379_v63  ;;  %v4515_v30 = vmul.f32 %v9474_v58, %v4379_v63  ;;  %v4380_v18 = vmax.f32 %v4256_v31, 0.0  ;;  %4775 = vadd.xlane.f32.xlu1 %v4774_v14 }
 0x64c   : > { %v4701_v36 = vadd.f32 %v4672_v54, %v4636_v61  ;;  %v4673_v22 = vmul.f32 %v9533_v13, %v9857_v51  ;;  %v4638_v0 = vadd.f32 %v4607_v52, %v4571_v9 }
 0x64d   : > { %v4481_v1 = vadd.f32 %v4450_v40, %v9595_v55  ;;  %v4483_v21 = vadd.f32 %v9633_v10, %v4417_v27  ;;  %v4547_v41 = vadd.f32 %v4515_v30, %v9629_v37  ;;  %v4418_v3 = vmul.f32 %v9448_v45, %v4380_v18  ;;  %v4364_v47 = vpop.f32.mrb[148].mxu1 }
 0x64e   : > { %v4451_v50 = vmul.f32 %v9452_v46, %v4380_v18  ;;  %v4516_v62 = vmul.f32 %v9474_v58, %v4380_v18  ;;  %v4365_v61 = vadd.f32 %v4364_v47, %v4204_v5  ;;  %v4366_v4 = vpop.f32.mrb[149].mxu1  ;;  %v4777_v48 = vsel %vm1658_vm8, %v4701_v36, 0.0 }
 0x64f   : > { %v4484_v20 = vadd.f32 %v9675_v15, %v4418_v3  ;;  %v4367_v9 = vpop.f32.mrb[150].mxu1  ;;  %4778 = vadd.xlane.f32.xlu0 %v4777_v48  ;;  %v4702_v63 = vadd.f32 %v4673_v22, %v4637_v56  ;;  %v4549_v10 = vadd.f32 %v9661_v8, %v4481_v1  ;;  %v4614_v31 = vadd.f32 %v9671_v33, %v4547_v41 }
 0x650   : > { %v4548_v7 = vadd.f32 %v4516_v62, %v9629_v37  ;;  %v4407_v14 = vmax.f32 %v4365_v61, 0.0  ;;  %v4368_v54 = vadd.f32 %v4367_v9, %v4207_v25  ;;  %v4369_v52 = vpop.f32.mrb[151].mxu1  ;;  %v4443_v5 = vmul.f32 %v9448_v45, %v9844_v29 }
 0x651   : > { %v4482_v27 = vadd.f32 %v4451_v50, %v9595_v55  ;;  %v4616_v40 = vadd.f32 %v9714_v53, %v4549_v10  ;;  %v4679_v15 = vadd.f32 %v9719_v6, %v4614_v31  ;;  %v4551_v56 = vadd.f32 %v9723_v28, %v4483_v21 }
 0x652   : > { %v4478_v8 = vmul.f32 %v9452_v46, %v4407_v14  ;;  %v4408_v30 = vmax.f32 %v4368_v54, 0.0  ;;  %v4780_v33 = vsel %vm1658_vm8, %v4702_v63, 0.0  ;;  %v4615_v37 = vadd.f32 %v9708_v59, %v4548_v7 }
 0x653   : > { %4781 = vadd.xlane.f32.xlu0 %v4780_v33  ;;  %v4681_v25 = vadd.f32 %v9762_v23, %v4616_v40  ;;  %v4215_v18 = vadd.f32 %v9813_v17, %v9433_v26  ;;  %v4618_v55 = vadd.f32 %v9790_v43, %v4551_v56  ;;  %v4674_v53 = vmul.f32 %v9533_v13, %v4407_v14 }
 0x654   : > { %v4479_v6 = vmul.f32 %v9452_v46, %v4408_v30  ;;  %v4509_v28 = vadd.f32 %v4478_v8, %v4443_v5  ;;  %v4444_v36 = vmul.f32 %v9448_v45, %v9857_v51  ;;  %v4680_v22 = vadd.f32 %v9751_v44, %v4615_v37 }
 0x655   : > { %v4372_v1 = vpop.f32.mrb[152].mxu1  ;;  %v4717_v59 = vsel %vm1658_vm8, %v4681_v25, 0.0  ;;  %v4683_v23 = vadd.f32 %v9805_v12, %v4618_v55  ;;  %v4703_v21 = vadd.f32 %v4674_v53, %v4638_v0  ;;  %v4550_v26 = vadd.f32 %v9679_v35, %v4482_v27 }
 0x656   : > { %v4373_v17 = vadd.f32 %v4372_v1, %v4212_v32  ;;  %v4374_v43 = vpop.f32.mrb[153].mxu1  ;;  %4718 = vadd.xlane.f32.xlu1 %v4717_v59  ;;  %v4510_v41 = vadd.f32 %v4479_v6, %v4444_v36  ;;  %v4711_v3 = vsel %vm1658_vm8, %v4679_v15, 0.0  ;;  %v4552_v47 = vadd.f32 %v9766_v19, %v4484_v20 }
 0x657   : > { %v4375_v50 = vpop.f32.mrb[154].mxu1  ;;  %4712 = vadd.xlane.f32.xlu0 %v4711_v3  ;;  %v4714_v44 = vsel %vm1658_vm8, %v4680_v22, 0.0  ;;  %v4617_v62 = vadd.f32 %v9757_v34, %v4550_v26  ;;  %v4541_v12 = vmul.f32 %v9474_v58, %v9844_v29  ;;  %v4441_v35 = vmul.f32 %v9448_v45, %v9796_v38 }
 0x658   : > { %v4409_v32 = vmax.f32 %v4373_v17, 0.0  ;;  %v4376_v0 = vadd.f32 %v4375_v50, %v4215_v18  ;;  %v4377_v61 = vpop.f32.mrb[155].mxu1  ;;  %v4619_v4 = vadd.f32 %v9809_v2, %v4552_v47  ;;  %v4609_v48 = vmul.f32 %v9504_v57, %v4407_v14  ;;  %v5945_v47 = vld [vmem:[#allocation2] ss:$0 sm:$0xff] }
 0x659   : > { %v4682_v19 = vadd.f32 %v9800_v16, %v4617_v62  ;;  %v4573_v20 = vadd.f32 %v4541_v12, %v9832_v42  ;;  %v4608_v34 = vmul.f32 %v9504_v57, %v9857_v51  ;;  %v4675_v9 = vmul.f32 %v9533_v13, %v4408_v30 }
 0x65a   : > { %v4545_v63 = vmul.f32 %v9474_v58, %v4409_v32  ;;  %v4676_v38 = vmul.f32 %v9533_v13, %v4409_v32  ;;  %v4410_v10 = vmax.f32 %v4376_v0, 0.0  ;;  %4715 = vadd.xlane.f32.xlu1 %v4714_v44  ;;  %v4723_v31 = vsel %vm1658_vm8, %v4683_v23, 0.0 }
 0x65b   : > { %4724 = vadd.xlane.f32.xlu0 %v4723_v31  ;;  %v4684_v2 = vadd.f32 %v9850_v60, %v4619_v4  ;;  %v4640_v7 = vadd.f32 %v4609_v48, %v4573_v20  ;;  %v4639_v16 = vadd.f32 %v4608_v34, %v9838_v24  ;;  %v4442_v42 = vmul.f32 %v9448_v45, %v9811_v11 }
 0x65c   : > { %v4543_v54 = vmul.f32 %v9474_v58, %v4407_v14  ;;  %v4577_v52 = vadd.f32 %v4545_v63, %v4509_v28  ;;  %v4546_v5 = vmul.f32 %v9474_v58, %v4410_v10  ;;  %v4783_v27 = vsel %vm1658_vm8, %v4703_v21, 0.0 }
 0x65d   : > { %v4720_v40 = vsel %vm1658_vm8, %v4682_v19, 0.0  ;;  %v4705_v15 = vadd.f32 %v4676_v38, %v4640_v7  ;;  %v4704_v56 = vadd.f32 %v4675_v9, %v4639_v16  ;;  %v4476_v60 = vmul.f32 %v9452_v46, %v9844_v29 }
 0x65e   : > { %v4578_v8 = vadd.f32 %v4546_v5, %v4510_v41  ;;  %4784 = vadd.xlane.f32.xlu1 %v4783_v27  ;;  %v4644_v24 = vadd.f32 %v9637_v49, %v4577_v52  ;;  %v4542_v45 = vmul.f32 %v9474_v58, %v9857_v51  ;;  %v4610_v11 = vmul.f32 %v9504_v57, %v4408_v30 }
 0x65f   : > { %v4544_v14 = vmul.f32 %v9474_v58, %v4408_v30  ;;  %v4611_v33 = vmul.f32 %v9504_v57, %v4409_v32  ;;  %4721 = vadd.xlane.f32.xlu0 %v4720_v40  ;;  %v4507_v37 = vadd.f32 %v4476_v60, %v4441_v35  ;;  %v4477_v25 = vmul.f32 %v9452_v46, %v9857_v51 }
 0x660   : > { %v4677_v29 = vmul.f32 %v9533_v13, %v4410_v10  ;;  %v4678_v18 = vmul.f32 0.0, %v9533_v13  ;;  %v4574_v55 = vadd.f32 %v4542_v45, %v9855_v39  ;;  %v4612_v53 = vmul.f32 %v9504_v57, %v4410_v10 }
 0x661   : > { %v4726_v6 = vsel %vm1658_vm8, %v4684_v2, 0.0  ;;  %v4575_v28 = vadd.f32 %v4543_v54, %v4507_v37  ;;  %v4508_v36 = vadd.f32 %v4477_v25, %v4442_v42  ;;  %v4789_v58 = vsel %vm1658_vm8, %v4705_v15, 0.0 }
 0x662   : > { %4727 = vadd.xlane.f32.xlu1 %v4726_v6  ;;  %v4709_v30 = vadd.f32 %v4678_v18, %v4644_v24  ;;  %v4641_v22 = vadd.f32 %v4610_v11, %v4574_v55  ;;  %v4786_v59 = vsel %vm1658_vm8, %v4704_v56, 0.0  ;;  %v4645_v39 = vadd.f32 %v9637_v49, %v4578_v8 }
 0x663   : > { %4790 = vadd.xlane.f32.xlu0 %v4789_v58  ;;  %v4642_v1 = vadd.f32 %v4611_v33, %v4575_v28  ;;  %v4576_v46 = vadd.f32 %v4544_v14, %v4508_v36 }
 0x664   : > { %v4706_v51 = vadd.f32 %v4677_v29, %v4641_v22  ;;  %v4801_v57 = vsel %vm1658_vm8, %v4709_v30, 0.0  ;;  %v4710_v43 = vadd.f32 %v4678_v18, %v4645_v39 }
 0x665   : > { %v4707_v13 = vadd.f32 %v4678_v18, %v4642_v1  ;;  %v4643_v23 = vadd.f32 %v4612_v53, %v4576_v46 }
 0x666   : > { %4787 = vadd.xlane.f32.xlu1 %v4786_v59  ;;  %v4792_v17 = vsel %vm1658_vm8, %v4706_v51, 0.0  ;;  %v4804_v3 = vsel %vm1658_vm8, %v4710_v43, 0.0 }
 0x667   : > { %4802 = vadd.xlane.f32.xlu0 %v4801_v57  ;;  %v4795_v21 = vsel %vm1658_vm8, %v4707_v13, 0.0  ;;  %v4708_v26 = vadd.f32 %v4678_v18, %v4643_v23 }
 0x669   : > { %v4798_v41 = vsel %vm1658_vm8, %v4708_v26, 0.0 }
 0x66a   : > { %4796 = vadd.xlane.f32.xlu1 %v4795_v21 }
 0x66b   : > { %4793 = vadd.xlane.f32.xlu0 %v4792_v17 }
 0x66e   : > { %4799 = vadd.xlane.f32.xlu1 %v4798_v41 }
 0x66f   : > { %4805 = vadd.xlane.f32.xlu0 %v4804_v3 }
 0x67f   : > { %4814 = vperm.xlu1 %6510, %v5945_v47  }
 0x69c   : > { %v4731_v44 = vpop.xlane.xlu0 %4730 }
 0x6a0   : > { %v9953_v62 = vpop.xlane.xlu0 %4733 }
 0x6a4   : > { %v4737_v50 = vpop.xlane.xlu1 %4736 }
 0x6a8   : > { %v9951_v49 = vpop.xlane.xlu1 %4739 }
 0x6ac   : > { %v4743_v35 = vpop.xlane.xlu0 %4742 }
 0x6b0   : > { %v9957_v0 = vpop.xlane.xlu0 %4745 }
 0x6b4   : > { %v4749_v12 = vpop.xlane.xlu1 %4748 }
 0x6b8   : > { %v9955_v32 = vpop.xlane.xlu1 %4751 }
 0x6bc   : > { %v4755_v4 = vpop.xlane.xlu0 %4754 }
 0x6c0   : > { %v9961_v19 = vpop.xlane.xlu0 %4757 }
 0x6c4   : > { %v4761_v61 = vpop.xlane.xlu1 %4760 }
 0x6c8   : > { %v9959_v48 = vpop.xlane.xlu1 %4763 }
 0x6cc   : > { %v4767_v34 = vpop.xlane.xlu0 %4766 }
 0x6d0   : > { %v9965_v63 = vpop.xlane.xlu0 %4769 }
 0x6d4   : > { %v4773_v20 = vpop.xlane.xlu1 %4772 }
 0x6d8   : > { %v9963_v9 = vpop.xlane.xlu1 %4775 }
 0x6dc   : > { %v4779_v10 = vpop.xlane.xlu0 %4778 }
 0x6e0   : > { %v9969_v7 = vpop.xlane.xlu0 %4781 }
 0x6e3   : > { %v4719_v38 = vpop.xlane.xlu1 %4718 }
 0x6e4   : > { %v4713_v42 = vpop.xlane.xlu0 %4712 }
 0x6e7   : > { %v9967_v31 = vpop.xlane.xlu1 %4715 }
 0x6e8   : > { %v4725_v5 = vpop.xlane.xlu0 %4724 }
 0x6eb   : > { %v4785_v2 = vpop.xlane.xlu1 %4784 }
 0x6ec   : > { %v9977_v40 = vpop.xlane.xlu0 %4721 }
 0x6ef   : > { %v9971_v16 = vpop.xlane.xlu1 %4727 }
 0x6f0   : > { %v4791_v1 = vpop.xlane.xlu0 %4790 }
 0x6f3   : > { %v9973_v54 = vpop.xlane.xlu1 %4787 }
 0x6f7   : > { %v4797_v52 = vpop.xlane.xlu1 %4796 }
 0x6fb   : > { %v9975_v27 = vpop.xlane.xlu1 %4799 }
 0x6ff   : > { %v9979_v15 = vpop.permute.xlu1 %4814 }
 0x700   : > { %v4817_v56 = vadd.f32 %v9979_v15, %v4713_v42  ;;  %v4819_v60 = vadd.f32 %v9979_v15, %v4719_v38  ;;  %v4821_v8 = vadd.f32 %v9979_v15, %v4725_v5  ;;  %v4823_v24 = vadd.f32 %v9979_v15, %v4731_v44 }
 0x701   : > { %v4825_v45 = vadd.f32 %v9979_v15, %v4737_v50  ;;  %v4827_v11 = vadd.f32 %v9979_v15, %v4743_v35  ;;  %v4829_v14 = vadd.f32 %v9979_v15, %v4749_v12  ;;  %v4831_v33 = vadd.f32 %v9979_v15, %v4755_v4  ;;  %v4803_v12 = vpop.xlane.xlu0 %4802 }
 0x702   : > { %v4849_v37 = vsub.f32 0.0, %v4817_v56  ;;  %v4851_v25 = vsub.f32 0.0, %v4819_v60  ;;  %v4853_v29 = vsub.f32 0.0, %v4821_v8  ;;  %v4855_v18 = vsub.f32 0.0, %v4823_v24 }
 0x703   : > { %v4857_v55 = vsub.f32 0.0, %v4825_v45  ;;  %v4859_v53 = vsub.f32 0.0, %v4827_v11  ;;  %v4861_v6 = vsub.f32 0.0, %v4829_v14  ;;  %v4863_v28 = vsub.f32 0.0, %v4831_v33 }
 0x704   : > { %v4881_v36 = vmul.f32 1.442695, %v4849_v37  ;;  %v4885_v58 = vmul.f32 1.442695, %v4851_v25  ;;  %v4889_v30 = vmul.f32 1.442695, %v4853_v29  ;;  %v4833_v22 = vadd.f32 %v9979_v15, %v4761_v61 }
 0x705   : > { %v4893_v46 = vmul.f32 1.442695, %v4855_v18  ;;  %v4897_v51 = vmul.f32 1.442695, %v4857_v55  ;;  %v4835_v59 = vadd.f32 %v9979_v15, %v4767_v34  ;;  %v4901_v13 = vmul.f32 1.442695, %v4859_v53 }
 0x706   : > { %6581 = vpow2.f32 %v4881_v36  ;;  %v4905_v23 = vmul.f32 1.442695, %v4861_v6  ;;  %v4837_v57 = vadd.f32 %v9979_v15, %v4773_v20  ;;  %v4909_v39 = vmul.f32 1.442695, %v4863_v28 }
 0x707   : > { %6583 = vpow2.f32 %v4885_v58  ;;  %v4839_v21 = vadd.f32 %v9979_v15, %v4779_v10  ;;  %v4841_v26 = vadd.f32 %v9979_v15, %v4785_v2  ;;  %v4843_v17 = vadd.f32 %v9979_v15, %v4791_v1 }
 0x708   : > { %6585 = vpow2.f32 %v4889_v30  ;;  %v4845_v43 = vadd.f32 %v9979_v15, %v4797_v52  ;;  %v4865_v41 = vsub.f32 0.0, %v4833_v22  ;;  %v4867_v3 = vsub.f32 0.0, %v4835_v59 }
 0x709   : > { %6587 = vpow2.f32 %v4893_v46  ;;  %v4869_v47 = vsub.f32 0.0, %v4837_v57  ;;  %v4871_v50 = vsub.f32 0.0, %v4839_v21  ;;  %v4873_v44 = vsub.f32 0.0, %v4841_v26 }
 0x70a   : > { %6589 = vpow2.f32 %v4897_v51  ;;  %v4913_v35 = vmul.f32 1.442695, %v4865_v41  ;;  %v4917_v61 = vmul.f32 1.442695, %v4867_v3  ;;  %v4847_v4 = vadd.f32 %v9979_v15, %v4803_v12 }
 0x70b   : > { %6591 = vpow2.f32 %v4901_v13  ;;  %v4921_v20 = vmul.f32 1.442695, %v4869_v47  ;;  %v4875_v34 = vsub.f32 0.0, %v4843_v17  ;;  %v4877_v38 = vsub.f32 0.0, %v4845_v43 }
 0x70c   : > { %6593 = vpow2.f32 %v4905_v23  ;;  %v4925_v10 = vmul.f32 1.442695, %v4871_v50  ;;  %v4929_v2 = vmul.f32 1.442695, %v4873_v44  ;;  %v4879_v52 = vsub.f32 0.0, %v4847_v4  ;;  %v4794_v44 = vpop.xlane.xlu0 %4793 }
 0x70d   : > { %6595 = vpow2.f32 %v4909_v39  ;;  %v4933_v60 = vmul.f32 1.442695, %v4875_v34  ;;  %v4937_v8 = vmul.f32 1.442695, %v4877_v38  ;;  %v4818_v11 = vadd.f32 %v9979_v15, %v9967_v31 }
 0x70e   : > { %6597 = vpow2.f32 %v4913_v35  ;;  %v4820_v14 = vadd.f32 %v9979_v15, %v9977_v40  ;;  %v4822_v25 = vadd.f32 %v9979_v15, %v9971_v16  ;;  %v4824_v29 = vadd.f32 %v9979_v15, %v9953_v62 }
 0x70f   : > { %6599 = vpow2.f32 %v4917_v61  ;;  %v4826_v53 = vadd.f32 %v9979_v15, %v9951_v49  ;;  %v4828_v31 = vadd.f32 %v9979_v15, %v9957_v0  ;;  %v4830_v28 = vadd.f32 %v9979_v15, %v9955_v32 }
 0x710   : > { %v6582_v42 = vpop.eup %6581  ;;  %6601 = vpow2.f32 %v4921_v20  ;;  %v4832_v16 = vadd.f32 %v9979_v15, %v9961_v19  ;;  %v4850_v58 = vsub.f32 0.0, %v4818_v11  ;;  %v4852_v30 = vsub.f32 0.0, %v4820_v14  ;;  %v10491_v14 = vld [vmem:[#allocation14_spill] sm:$0xff] }
 0x711   : > { %v6584_v5 = vpop.eup %6583  ;;  %v4945_v56 = vadd.f32 1.0, %v6582_v42  ;;  %6603 = vpow2.f32 %v4925_v10  ;;  %v4854_v49 = vsub.f32 0.0, %v4822_v25  ;;  %v4856_v46 = vsub.f32 0.0, %v4824_v29  ;;  %v10492_v29 = vld [vmem:[#allocation16_spill] sm:$0xff] }
 0x712   : > { %v6586_v24 = vpop.eup %6585  ;;  %v4947_v45 = vadd.f32 1.0, %v6584_v5  ;;  %6605 = vpow2.f32 %v4929_v2  ;;  %v4858_v59 = vsub.f32 0.0, %v4826_v53  ;;  %v4860_v13 = vsub.f32 0.0, %v4828_v31  ;;  %v10489_v2 = vld [vmem:[#allocation9_spill] sm:$0xff]  ;;  %v4806_v53 = vpop.xlane.xlu0 %4805  ;;  %v10493_v31 = vld [vmem:[#allocation18_spill] sm:$0xff] }
 0x713   : > { %v6588_v33 = vpop.eup %6587  ;;  %v4949_v37 = vadd.f32 1.0, %v6586_v24  ;;  %6607 = vrcp.f32 %v4945_v56  ;;  %v4941_v32 = vmul.f32 1.442695, %v4879_v52  ;;  %v4862_v57 = vsub.f32 0.0, %v4830_v28  ;;  %v10494_v28 = vld [vmem:[#allocation20_spill] sm:$0xff] }
 0x714   : > { %v6590_v18 = vpop.eup %6589  ;;  %v4951_v55 = vadd.f32 1.0, %v6588_v33  ;;  %6609 = vrcp.f32 %v4947_v45  ;;  %v4864_v19 = vsub.f32 0.0, %v4832_v16  ;;  %v4883_v26 = vmul.f32 1.442695, %v4850_v58 }
 0x715   : > { %v6592_v6 = vpop.eup %6591  ;;  %v4953_v40 = vadd.f32 1.0, %v6590_v18  ;;  %6611 = vrcp.f32 %v4949_v37  ;;  %v4887_v17 = vmul.f32 1.442695, %v4852_v30  ;;  %v4891_v3 = vmul.f32 1.442695, %v4854_v49  ;;  %v10495_v30 = vld [vmem:[#allocation22_spill] sm:$0xff] }
 0x716   : > { %v6594_v36 = vpop.eup %6593  ;;  %v4955_v62 = vadd.f32 1.0, %v6592_v6  ;;  %6613 = vrcp.f32 %v4951_v55  ;;  %v4895_v47 = vmul.f32 1.442695, %v4856_v46  ;;  %v10013_v35 = vmul.f32 1.442695, %v4858_v59 }
 0x717   : > { %v6596_v22 = vpop.eup %6595  ;;  %v4957_v1 = vadd.f32 1.0, %v6594_v36  ;;  %6615 = vrcp.f32 %v4953_v40  ;;  %v10015_v61 = vmul.f32 1.442695, %v4860_v13  ;;  %v10017_v34 = vmul.f32 1.442695, %v4862_v57 }
 0x718   : > { %v6598_v0 = vpop.eup %6597  ;;  %v4959_v51 = vadd.f32 1.0, %v6596_v22  ;;  %6617 = vrcp.f32 %v4955_v62  ;;  %v10019_v38 = vmul.f32 1.442695, %v4864_v19  ;;  %v10024_v5 = vadd.f32 %v9979_v15, %v9959_v48 }
 0x719   : > { %v6600_v23 = vpop.eup %6599  ;;  %6619 = vrcp.f32 %v4957_v1  ;;  %v4961_v21 = vadd.f32 1.0, %v6598_v0  ;;  %v10029_v24 = vadd.f32 %v9979_v15, %v9965_v63  ;;  %v10033_v45 = vadd.f32 %v9979_v15, %v9963_v9  ;;  %v10497_v0 = vld [vmem:[#allocation24_spill] sm:$0xff] }
 0x71a   : > { %v6602_v39 = vpop.eup %6601  ;;  %6621 = vrcp.f32 %v4959_v51  ;;  %v4963_v41 = vadd.f32 1.0, %v6600_v23  ;;  %v10038_v48 = vadd.f32 %v9979_v15, %v9969_v7  ;;  %v10042_v37 = vadd.f32 %v9979_v15, %v9973_v54 }
 0x71b   : > { %v6604_v43 = vpop.eup %6603  ;;  %6623 = vpow2.f32 %v4933_v60  ;;  %v4965_v12 = vadd.f32 1.0, %v6602_v39  ;;  %v10490_v60 = vld [vmem:[#allocation12_spill] sm:$0xff]  ;;  %v10046_v18 = vadd.f32 %v9979_v15, %v4794_v44  ;;  %v10050_v9 = vadd.f32 %v9979_v15, %v9975_v27  ;;  %v10496_v27 = vld [vmem:[#allocation7_spill] sm:$0xff] }
 0x71c   : > { %v6606_v50 = vpop.eup %6605  ;;  %6625 = vpow2.f32 %v4937_v8  ;;  %v4967_v20 = vadd.f32 1.0, %v6604_v43  ;;  %v10055_v62 = vadd.f32 %v9979_v15, %v4806_v53 }
 0x71d   : > { %v6608_v4 = vpop.eup %6607  ;;  %6627 = vpow2.f32 %v4941_v32  ;;  %v4969_v52 = vadd.f32 1.0, %v6606_v50 }
 0x71e   : > { %v6610_v10 = vpop.eup %6609  ;;  %v5009_v42 = vmul.f32 %v6608_v4, %v10489_v2  ;;  %6629 = vrcp.f32 %v4961_v21  ;;  %v10498_v4 = vld [vmem:[#allocation8_spill] sm:$0xff]  ;;  %v10499_v2 = vld [vmem:[#allocation25_spill] sm:$0xff] }
 0x71f   : > { %v6612_v56 = vpop.eup %6611  ;;  %v5011_v8 = vmul.f32 %v6610_v10, %v10490_v60  ;;  %6631 = vrcp.f32 %v4963_v41 }
 0x720   : > { %v6614_v11 = vpop.eup %6613  ;;  %v5013_v33 = vmul.f32 %v6612_v56, %v10491_v14  ;;  %6633 = vrcp.f32 %v4965_v12 }
 0x721   : > { %v6616_v25 = vpop.eup %6615  ;;  %v5015_v63 = vmul.f32 %v6614_v11, %v10492_v29  ;;  %6635 = vrcp.f32 %v4967_v20 }
 0x722   : > { %v6618_v55 = vpop.eup %6617  ;;  %v5017_v7 = vmul.f32 %v6616_v25, %v10493_v31  ;;  %v5041_v6 = vcombine.low %v5009_v42, %v5013_v33  ;;  %6637 = vrcp.f32 %v4969_v52  ;;  %v5042_v40 = vcombine.high %v5009_v42, %v5013_v33  ;;  %v10500_v52 = vld [vmem:[#allocation28_spill] sm:$0xff]  ;;  %v10501_v25 = vld [vmem:[#allocation30_spill] sm:$0xff] }
 0x723   : > { %v6620_v54 = vpop.eup %6619  ;;  %v5019_v16 = vmul.f32 %v6618_v55, %v10494_v28  ;;  %v5057_v36 = vcombine.low %v5011_v8, %v5015_v63  ;;  %6639 = vpow2.f32 %v4883_v26  ;;  %v5058_v49 = vcombine.high %v5011_v8, %v5015_v63  ;;  %v10502_v55 = vld [vmem:[#allocation33_spill] sm:$0xff] }
 0x724   : > { %v6622_v58 = vpop.eup %6621  ;;  %v5021_v22 = vmul.f32 %v6620_v54, %v10495_v30  ;;  %v5049_v1 = vrot.slane %v5041_v6, %v10496_v27  ;;  %6641 = vpow2.f32 %v4887_v17  ;;  %v10062_v13 = vrot.slane %v5042_v40, %v10496_v27 }
 0x725   : > { %v6624_v46 = vpop.eup %6623  ;;  %v5023_v51 = vmul.f32 %v6622_v58, %v10497_v0  ;;  %v5065_v59 = vrot.slane %v5057_v36, %v10496_v27  ;;  %6643 = vpow2.f32 %v4891_v3  ;;  %v10066_v44 = vrot.slane %v5058_v49, %v10496_v27 }
 0x726   : > { %v6626_v23 = vpop.eup %6625  ;;  %v5073_v32 = vcombine.low %v5017_v7, %v5021_v22  ;;  %v4971_v15 = vadd.f32 1.0, %v6624_v46  ;;  %v5074_v57 = vcombine.high %v5017_v7, %v5021_v22  ;;  %6645 = vpow2.f32 %v4895_v47 }
 0x727   : > { %v6628_v19 = vpop.eup %6627  ;;  %v5089_v39 = vcombine.low %v5019_v16, %v5023_v51  ;;  %v5106_v21 = vcombine.high %v5049_v1, %v5065_v59  ;;  %v5105_v26 = vcombine.low %v5049_v1, %v5065_v59  ;;  %v4973_v43 = vadd.f32 1.0, %v6626_v23 }
 0x728   : > { %v6630_v17 = vpop.eup %6629  ;;  %v5081_v41 = vrot.slane %v5073_v32, %v10496_v27  ;;  %v4975_v50 = vadd.f32 1.0, %v6628_v19  ;;  %6647 = vrcp.f32 %v4971_v15  ;;  %v10071_v47 = vrot.slane %v5074_v57, %v10496_v27 }
 0x729   : > { %v6632_v12 = vpop.eup %6631  ;;  %v5097_v3 = vrot.slane %v5089_v39, %v10496_v27  ;;  %v5120_v20 = vrot.slane %v5106_v21, %v10498_v4  ;;  %6649 = vrcp.f32 %v4973_v43  ;;  %v5025_v42 = vmul.f32 %v6630_v17, %v10499_v2  ;;  %v10503_v21 = vld [vmem:[#allocation35_spill] sm:$0xff] }
 0x72a   : > { %v6634_v10 = vpop.eup %6633  ;;  %6651 = vrcp.f32 %v4975_v50  ;;  %v5027_v56 = vmul.f32 %v6632_v12, %v10500_v52  ;;  %v5090_v60 = vcombine.high %v5019_v16, %v5023_v51  ;;  %v10076_v14 = vrot.slane %v5105_v26, %v10498_v4 }
 0x72b   : > { %v6636_v8 = vpop.eup %6635  ;;  %v5138_v11 = vcombine.high %v5081_v41, %v5097_v3  ;;  %v5137_v33 = vcombine.low %v5081_v41, %v5097_v3  ;;  %v5029_v29 = vmul.f32 %v6634_v10, %v10501_v25  ;;  %6653 = vpow2.f32 %v10013_v35  ;;  %v10504_v3 = vld [vmem:[#allocation37_spill] sm:$0xff] }
 0x72c   : > { %v6638_v63 = vpop.eup %6637  ;;  %v5031_v53 = vmul.f32 %v6636_v8, %v10502_v55  ;;  %v10081_v31 = vrot.slane %v5090_v60, %v10496_v27  ;;  %v4866_v7 = vsub.f32 0.0, %v10024_v5  ;;  %v4868_v16 = vsub.f32 0.0, %v10029_v24 }
 0x72d   : > { %v6640_v6 = vpop.eup %6639  ;;  %v5152_v40 = vrot.slane %v5138_v11, %v10498_v4  ;;  %v10087_v54 = vrot.slane %v5137_v33, %v10498_v4  ;;  %v5177_v28 = vcombine.low %v5025_v42, %v5029_v29  ;;  %v5121_v30 = vcombine.low %v10062_v13, %v10066_v44 }
 0x72e   : > { %v6642_v36 = vpop.eup %6641  ;;  %v5193_v58 = vcombine.low %v5027_v56, %v5031_v53  ;;  %v5153_v22 = vcombine.low %v10071_v47, %v10081_v31  ;;  %v4870_v35 = vsub.f32 0.0, %v10033_v45  ;;  %v4872_v46 = vsub.f32 0.0, %v10038_v48 }
 0x72f   : > { %v6644_v5 = vpop.eup %6643  ;;  %v5171_v1 = vcombine.low %v5120_v20, %v5152_v40  ;;  %v5170_v49 = vcombine.high %v10076_v14, %v10087_v54  ;;  %v4874_v0 = vsub.f32 0.0, %v10042_v37  ;;  %v5178_v51 = vcombine.high %v5025_v42, %v5029_v29 }
 0x730   : > { %v6646_v24 = vpop.eup %6645  ;;  %v4876_v59 = vsub.f32 0.0, %v10046_v18  ;;  %v4878_v23 = vsub.f32 0.0, %v10050_v9  ;;  %v4880_v32 = vsub.f32 0.0, %v10055_v62  ;;  %v10105_v15 = vrot.slane %v5177_v28, %v10496_v27  ;;  %v10514_v9 = vld [vmem:[#allocation13_spill] sm:$0xff] }
 0x731   : > { %5595 = vrot.lane.b32.xlu1 %v5171_v1, %s6790_s28  ;;  %5587 = vrot.lane.b32.xlu0 %v5170_v49, %s6789_s0  ;;  %v10108_v57 = vrot.slane %v5193_v58, %v10496_v27  ;;  %6655 = vpow2.f32 %v10015_v61  ;;  %v4915_v19 = vmul.f32 1.442695, %v4866_v7  ;;  %v5033_v26 = vmul.f32 %v6638_v63, %v10503_v21  ;;  %v10505_v61 = vld [vmem:[#allocation39_spill] sm:$0xff] }
 0x732   : > { %v6648_v39 = vpop.eup %6647  ;;  %v5129_v43 = vrot.slane %v5121_v30, %v10498_v4  ;;  %v5161_v17 = vrot.slane %v5153_v22, %v10498_v4  ;;  %v5194_v41 = vcombine.high %v5027_v56, %v5031_v53  ;;  %v5172_v12 = vcombine.high %v5120_v20, %v5152_v40  ;;  %v10507_v20 = vld [vmem:[#allocation41_spill] sm:$0xff] }
 0x733   : > { %v6650_v50 = vpop.eup %6649  ;;  %v5035_v10 = vmul.f32 %v6648_v39, %v10504_v3  ;;  %v5122_v2 = vcombine.high %v10062_v13, %v10066_v44  ;;  %6657 = vpow2.f32 %v10017_v34  ;;  %v10120_v60 = vrot.slane %v5178_v51, %v10496_v27 }
 0x734   : > { %v6652_v42 = vpop.eup %6651  ;;  %v5037_v52 = vmul.f32 %v6650_v50, %v10505_v61  ;;  %v5154_v8 = vcombine.high %v10071_v47, %v10081_v31  ;;  %v4946_v11 = vadd.f32 1.0, %v6640_v6  ;;  %v5242_v33 = vcombine.high %v10105_v15, %v10108_v57 }
 0x735   : > { %5603 = vrot.lane.b32.xlu1 %v5172_v12, %s10506_s10  ;;  %v5039_v56 = vmul.f32 %v6652_v42, %v10507_v20  ;;  %6659 = vpow2.f32 %v10019_v38  ;;  %v4948_v34 = vadd.f32 1.0, %v6642_v36  ;;  %v6654_v13 = vpop.eup %6653  ;;  %v5173_v25 = vcombine.low %v5129_v43, %v5161_v17 }
 0x736   : > { %v5209_v44 = vcombine.low %v5033_v26, %v5037_v52  ;;  %v10130_v29 = vrot.slane %v5194_v41, %v10496_v27  ;;  %v5210_v63 = vcombine.high %v5033_v26, %v5037_v52  ;;  %v4950_v53 = vadd.f32 1.0, %v6644_v5 }
 0x737   : > { %v5225_v55 = vcombine.low %v5035_v10, %v5039_v56  ;;  %v5226_v47 = vcombine.high %v5035_v10, %v5039_v56  ;;  %v4952_v31 = vadd.f32 1.0, %v6646_v24  ;;  %v4954_v6 = vadd.f32 1.0, %v6654_v13  ;;  %v10512_v56 = vld [vmem:[#allocation11_spill] sm:$0xff] }
 0x738   : > { %v5217_v7 = vrot.slane %v5209_v44, %v10496_v27  ;;  %6661 = vrcp.f32 %v4946_v11  ;;  %v4919_v40 = vmul.f32 1.442695, %v4868_v16  ;;  %v5136_v38 = vrot.slane %v5122_v2, %v10498_v4  ;;  %v10511_v11 = vld [vmem:[#allocation10_spill] sm:$0xff] }
 0x739   : > { %v5233_v28 = vrot.slane %v5225_v55, %v10496_v27  ;;  %5611 = vrot.lane.b32.xlu1 %v5173_v25, %s10508_s27  ;;  %v5168_v36 = vrot.slane %v5154_v8, %v10498_v4  ;;  %6663 = vrcp.f32 %v4948_v34  ;;  %v5174_v58 = vcombine.high %v5129_v43, %v5161_v17 }
 0x73a   : > { %v5224_v30 = vrot.slane %v5210_v63, %v10496_v27  ;;  %v5240_v22 = vrot.slane %v5226_v47, %v10496_v27  ;;  %6665 = vrcp.f32 %v4950_v53  ;;  %v5256_v1 = vrot.slane %v5242_v33, %v10498_v4  ;;  %v10515_v63 = vld [vmem:[#allocation15_spill] sm:$0xff] }
 0x73b   : > { %v6656_v5 = vpop.eup %6655  ;;  %v5274_v49 = vcombine.high %v5217_v7, %v5233_v28  ;;  %v5257_v16 = vcombine.low %v10120_v60, %v10130_v29  ;;  %6667 = vrcp.f32 %v4952_v31  ;;  %v4923_v51 = vmul.f32 1.442695, %v4870_v35 }
 0x73c   : > { %v4956_v24 = vadd.f32 1.0, %v6656_v5  ;;  %6669 = vrcp.f32 %v4954_v6  ;;  %v5241_v39 = vcombine.low %v10105_v15, %v10108_v57  ;;  %v5175_v43 = vcombine.low %v5136_v38, %v5168_v36 }
 0x73d   : > { %v6658_v21 = vpop.eup %6657  ;;  %v5288_v26 = vrot.slane %v5274_v49, %v10498_v4  ;;  %5619 = vrot.lane.b32.xlu1 %v5174_v58, %s10509_s29  ;;  %v5258_v17 = vcombine.high %v10120_v60, %v10130_v29  ;;  %6671 = vpow2.f32 %v4915_v19  ;;  %v5289_v41 = vcombine.low %v5224_v30, %v5240_v22 }
 0x73e   : > { %v4958_v50 = vadd.f32 1.0, %v6658_v21  ;;  %6673 = vrcp.f32 %v4956_v24  ;;  %v5273_v12 = vcombine.low %v5217_v7, %v5233_v28  ;;  %v10151_v35 = vrot.slane %v5257_v16, %v10498_v4  ;;  %v10516_v28 = vld [vmem:[#allocation17_spill] sm:$0xff]  ;;  %v10517_v24 = vld [vmem:[#allocation19_spill] sm:$0xff] }
 0x73f   : > { %v6660_v3 = vpop.eup %6659  ;;  %v5307_v45 = vcombine.low %v5256_v1, %v5288_v26  ;;  %v5176_v15 = vcombine.high %v5136_v38, %v5168_v36  ;;  %v10154_v57 = vrot.slane %v5241_v39, %v10498_v4  ;;  %v4927_v2 = vmul.f32 1.442695, %v4872_v46  ;;  %v10518_v39 = vld [vmem:[#allocation21_spill] sm:$0xff] }
 0x740   : > { %v4960_v10 = vadd.f32 1.0, %v6660_v3  ;;  %6675 = vrcp.f32 %v4958_v50  ;;  %v4931_v19 = vmul.f32 1.442695, %v4874_v0  ;;  %v4935_v42 = vmul.f32 1.442695, %v4876_v59 }
 0x741   : > { %5597 = vrot.lane.b32.xlu0 %v5307_v45, %s6790_s28  ;;  %5627 = vrot.lane.b32.xlu1 %v5175_v43, %s10510_s22  ;;  %6677 = vpow2.f32 %v4919_v40  ;;  %v10165_v61 = vrot.slane %v5273_v12, %v10498_v4  ;;  %v5169_v52 = vcombine.low %v10076_v14, %v10087_v54  ;;  %v5297_v48 = vrot.slane %v5289_v41, %v10498_v4  ;;  %v10519_v12 = vld [vmem:[#allocation23_spill] sm:$0xff] }
 0x742   : > { %v6662_v60 = vpop.eup %6661  ;;  %v5290_v46 = vcombine.high %v5224_v30, %v5240_v22  ;;  %6679 = vrcp.f32 %v4960_v10  ;;  %v4939_v37 = vmul.f32 1.442695, %v4878_v23  ;;  %v5308_v8 = vcombine.high %v5256_v1, %v5288_v26 }
 0x743   : > { %v6664_v0 = vpop.eup %6663  ;;  %v5010_v20 = vmul.f32 %v6662_v60, %v10511_v11  ;;  %6681 = vpow2.f32 %v4923_v51  ;;  %v5305_v18 = vcombine.low %v10154_v57, %v10165_v61  ;;  %v4943_v34 = vmul.f32 1.442695, %v4880_v32 }
 0x744   : > { %v6666_v59 = vpop.eup %6665  ;;  %v5012_v33 = vmul.f32 %v6664_v0, %v10512_v56  ;;  %6683 = vpow2.f32 %v4927_v2  ;;  %v10182_v25 = vrot.slane %v5258_v17, %v10498_v4  ;;  %v10185_v29 = vrot.slane %v5290_v46, %v10498_v4 }
 0x745   : > { %v6668_v13 = vpop.eup %6667  ;;  %5605 = vrot.lane.b32.xlu0 %v5308_v8, %s10506_s10  ;;  %5635 = vrot.lane.b32.xlu1 %v5176_v15, %s10513_s23  ;;  %v5014_v23 = vmul.f32 %v6666_v59, %v10514_v9  ;;  %6685 = vpow2.f32 %v4931_v19  ;;  %v5309_v32 = vcombine.low %v10151_v35, %v5297_v48  ;;  %v5310_v49 = vcombine.high %v10151_v35, %v5297_v48  ;;  %s327_s10 = scalar_lea.vmem [#allocation3], %s5823_s26 }
 0x746   : > { %v6670_v44 = vpop.eup %6669  ;;  %v5016_v55 = vmul.f32 %v6668_v13, %v10515_v63  ;;  %6687 = vpow2.f32 %v4935_v42  ;;  %v5311_v16 = vcombine.low %v10182_v25, %v10185_v29  ;;  %v5312_v17 = vcombine.high %v10182_v25, %v10185_v29 }
 0x747   : > { %v6672_v62 = vpop.eup %6671  ;;  %v5313_v47 = vcombine.low %v5010_v20, %v5014_v23  ;;  %6689 = vpow2.f32 %v4939_v37  ;;  %v5314_v53 = vcombine.high %v5010_v20, %v5014_v23  ;;  %v5018_v38 = vmul.f32 %v6670_v44, %v10516_v28 }
 0x748   : > { %v6674_v31 = vpop.eup %6673  ;;  %v5329_v7 = vcombine.low %v5012_v33, %v5016_v55  ;;  %6691 = vpow2.f32 %v4943_v34  ;;  %v4962_v6 = vadd.f32 1.0, %v6672_v62  ;;  %v5330_v40 = vcombine.high %v5012_v33, %v5016_v55 }
 0x749   : > { %5613 = vrot.lane.b32.xlu0 %v5309_v32, %s10508_s27  ;;  %v5321_v36 = vrot.slane %v5313_v47, %v10496_v27  ;;  %v5328_v22 = vrot.slane %v5314_v53, %v10496_v27  ;;  %v5020_v51 = vmul.f32 %v6674_v31, %v10517_v24  ;;  %s5757_s27 = sshll.u32 %s327_s10, 4  ;;  %s10324_s27 = int_to_ptr.vmem [resolvable:$true] %s5757_s27 }
 0x74a   : > { %v6676_v58 = vpop.eup %6675  ;;  %v5337_v30 = vrot.slane %v5329_v7, %v10496_v27  ;;  %v5344_v5 = vrot.slane %v5330_v40, %v10496_v27  ;;  %6693 = vrcp.f32 %v4962_v6 }
 0x74b   : > { %v6678_v1 = vpop.eup %6677  ;;  %v5022_v21 = vmul.f32 %v6676_v58, %v10518_v39  ;;  %v10521_v39 = vld [vmem:[#allocation29_spill] sm:$0xff] }
 0x74c   : > { %v6680_v26 = vpop.eup %6679  ;;  %v5377_v43 = vcombine.low %v5321_v36, %v5337_v30  ;;  %v4964_v41 = vadd.f32 1.0, %v6678_v1  ;;  %v5378_v35 = vcombine.high %v5321_v36, %v5337_v30  ;;  %v5393_v19 = vcombine.low %v5328_v22, %v5344_v5 }
 0x74d   : > { %v6682_v50 = vpop.eup %6681  ;;  %5621 = vrot.lane.b32.xlu0 %v5310_v49, %s10509_s29  ;;  %v5024_v3 = vmul.f32 %v6680_v26, %v10519_v12  ;;  %v5345_v45 = vcombine.low %v5018_v38, %v5022_v21  ;;  %v5346_v15 = vcombine.high %v5018_v38, %v5022_v21  ;;  %v5394_v42 = vcombine.high %v5328_v22, %v5344_v5  ;;  %s5952_s29 = sshll.u32 %s6884_s8, 8  ;;  %s6709_s8 = scalar_lea.vmem %s10324_s27, 256 }
 0x74e   : > { %v6684_v10 = vpop.eup %6683  ;;  %v4966_v2 = vadd.f32 1.0, %v6682_v50  ;;  %6695 = vrcp.f32 %v4964_v41  ;;  %v5385_v37 = vrot.slane %v5377_v43, %v10498_v4  ;;  %v10210_v13 = vrot.slane %v5378_v35, %v10498_v4  ;;  %v10522_v43 = vld [vmem:[#allocation31_spill] sm:$0xff]  ;;  %v10523_v50 = vld [vmem:[#allocation34_spill] sm:$0xff]  ;;  %p6710_p11 = scmp.ne.s32.totalorder %s10324_s27, %s6709_s8 }
 0x74f   : > { %v6686_v60 = vpop.eup %6685  ;;  %v5353_v48 = vrot.slane %v5345_v45, %v10496_v27  ;;  %v5361_v46 = vcombine.low %v5020_v51, %v5024_v3  ;;  %v4968_v0 = vadd.f32 1.0, %v6684_v10  ;;  %v5360_v20 = vrot.slane %v5346_v15, %v10496_v27  ;;  %v10524_v45 = vld [vmem:[#allocation36_spill] sm:$0xff] }
 0x750   : > { %v6688_v8 = vpop.eup %6687  ;;  %v4970_v11 = vadd.f32 1.0, %v6686_v60  ;;  %6697 = vrcp.f32 %v4966_v2  ;;  %v5362_v59 = vcombine.high %v5020_v51, %v5024_v3  ;;  %v10214_v25 = vrot.slane %v5393_v19, %v10498_v4  ;;  %v10525_v19 = vld [vmem:[#allocation38_spill] sm:$0xff]  ;;  %p6711_p12 = pnand %p6710_p11, %p6901_p5 }
 0x751   : > { %v6690_v56 = vpop.eup %6689  ;;  %5629 = vrot.lane.b32.xlu0 %v5311_v16, %s10510_s22  ;;  %v5369_v33 = vrot.slane %v5361_v46, %v10496_v27  ;;  %v4972_v34 = vadd.f32 1.0, %v6688_v8  ;;  %6699 = vrcp.f32 %v4968_v0  ;;  %v10217_v32 = vrot.slane %v5394_v42, %v10498_v4  ;;  %v10520_v16 = vld [vmem:[#allocation26_spill] sm:$0xff] }
 0x752   : > { %v6692_v9 = vpop.eup %6691  ;;  %v4974_v23 = vadd.f32 1.0, %v6690_v56  ;;  %6701 = vrcp.f32 %v4970_v11  ;;  %v5376_v44 = vrot.slane %v5362_v59, %v10496_v27  ;;  %p6712_p13 = pneg %p6711_p12 }
 0x753   : > { %v5409_v29 = vcombine.low %v5353_v48, %v5369_v33  ;;  %v4976_v63 = vadd.f32 1.0, %v6692_v9  ;;  %6703 = vrcp.f32 %v4972_v34  ;;  %v5410_v55 = vcombine.high %v5353_v48, %v5369_v33 }
 0x754   : > { %6705 = vrcp.f32 %v4974_v23  ;;  %v5425_v62 = vcombine.low %v5360_v20, %v5376_v44  ;;  %v5426_v47 = vcombine.high %v5360_v20, %v5376_v44  ;;  %v6694_v7 = vpop.eup %6693  ;;  %v10527_v20 = vld [vmem:[#allocation42_spill] sm:$0xff] }
 0x755   : > { %v5417_v53 = vrot.slane %v5409_v29, %v10498_v4  ;;  %5637 = vrot.lane.b32.xlu0 %v5312_v17, %s10513_s23  ;;  %6707 = vrcp.f32 %v4976_v63  ;;  %v5424_v31 = vrot.slane %v5410_v55, %v10498_v4  ;;  %v5026_v24 = vmul.f32 %v6694_v7, %v10520_v16 }
 0x756   : > { %v10223_v6 = vrot.slane %v5425_v62, %v10498_v4  ;;  %v10226_v40 = vrot.slane %v5426_v47, %v10498_v4 }
 0x757   : > { %v5441_v28 = vcombine.low %v5385_v37, %v5417_v53  ;;  %v5442_v38 = vcombine.high %v5385_v37, %v5417_v53  ;;  %v5443_v36 = vcombine.low %v10210_v13, %v5424_v31  ;;  %v5444_v58 = vcombine.high %v10210_v13, %v5424_v31  ;;  %v10526_v37 = vld [vmem:[#allocation40_spill] sm:$0xff] }
 0x758   : > { %v6696_v30 = vpop.eup %6695  ;;  %v5445_v22 = vcombine.low %v10214_v25, %v10223_v6  ;;  %v5446_v5 = vcombine.high %v10214_v25, %v10223_v6  ;;  %v5447_v1 = vcombine.low %v10217_v32, %v10226_v40  ;;  %v5448_v49 = vcombine.high %v10217_v32, %v10226_v40 }
 0x759   : > { %5643 = vrot.lane.b32.xlu1 %v5441_v28, %s6798_s24  ;;  %v5028_v21 = vmul.f32 %v6696_v30, %v10521_v39 }
 0x75a   : > { %v6698_v51 = vpop.eup %6697 }
 0x75b   : > { %v6700_v26 = vpop.eup %6699  ;;  %v5030_v17 = vmul.f32 %v6698_v51, %v10522_v43 }
 0x75c   : > { %v6702_v41 = vpop.eup %6701  ;;  %v5032_v12 = vmul.f32 %v6700_v26, %v10523_v50 }
 0x75d   : > { %v6704_v3 = vpop.eup %6703  ;;  %5651 = vrot.lane.b32.xlu1 %v5442_v38, %s6801_s15  ;;  %v5034_v35 = vmul.f32 %v6702_v41, %v10524_v45  ;;  %v5449_v15 = vcombine.low %v5026_v24, %v5030_v17  ;;  %v5450_v10 = vcombine.high %v5026_v24, %v5030_v17  ;;  %v5306_v24 = vcombine.high %v10154_v57, %v10165_v61 }
 0x75e   : > { %v6706_v2 = vpop.eup %6705  ;;  %v5036_v42 = vmul.f32 %v6704_v3, %v10525_v19  ;;  %v5465_v60 = vcombine.low %v5028_v21, %v5032_v12  ;;  %v5466_v48 = vcombine.high %v5028_v21, %v5032_v12 }
 0x75f   : > { %v6708_v46 = vpop.eup %6707  ;;  %v5038_v0 = vmul.f32 %v6706_v2, %v10526_v37  ;;  %v5457_v8 = vrot.slane %v5449_v15, %v10496_v27  ;;  %v5464_v11 = vrot.slane %v5450_v10, %v10496_v27 }
 0x760   : > { %v5040_v59 = vmul.f32 %v6708_v46, %v10527_v20  ;;  %v5473_v56 = vrot.slane %v5465_v60, %v10496_v27  ;;  %v5480_v33 = vrot.slane %v5466_v48, %v10496_v27 }
 0x761   : > { %v5481_v34 = vcombine.low %v5034_v35, %v5038_v0  ;;  %5659 = vrot.lane.b32.xlu1 %v5443_v36, %s6802_s18  ;;  %v5482_v13 = vcombine.high %v5034_v35, %v5038_v0 }
 0x762   : > { %v5497_v9 = vcombine.low %v5036_v42, %v5040_v59  ;;  %v5513_v23 = vcombine.low %v5457_v8, %v5473_v56  ;;  %v5514_v44 = vcombine.high %v5457_v8, %v5473_v56  ;;  %v5498_v29 = vcombine.high %v5036_v42, %v5040_v59 }
 0x763   : > { %v5489_v63 = vrot.slane %v5481_v34, %v10496_v27  ;;  %v5496_v55 = vrot.slane %v5482_v13, %v10496_v27  ;;  %v5529_v62 = vcombine.low %v5464_v11, %v5480_v33  ;;  %v5530_v47 = vcombine.high %v5464_v11, %v5480_v33 }
 0x764   : > { %v5505_v53 = vrot.slane %v5497_v9, %v10496_v27  ;;  %v5512_v31 = vrot.slane %v5498_v29, %v10496_v27  ;;  %v5521_v7 = vrot.slane %v5513_v23, %v10498_v4  ;;  %v5528_v28 = vrot.slane %v5514_v44, %v10498_v4 }
 0x765   : > { %5667 = vrot.lane.b32.xlu1 %v5444_v58, %s6803_s17  ;;  %v5537_v51 = vrot.slane %v5529_v62, %v10498_v4  ;;  %v5544_v39 = vrot.slane %v5530_v47, %v10498_v4 }
 0x766   : > { %v5545_v38 = vcombine.low %v5489_v63, %v5505_v53  ;;  %v5546_v36 = vcombine.high %v5489_v63, %v5505_v53  ;;  %v5561_v30 = vcombine.low %v5496_v55, %v5512_v31  ;;  %v5562_v16 = vcombine.high %v5496_v55, %v5512_v31 }
 0x768   : > { %v5553_v27 = vrot.slane %v5545_v38, %v10498_v4  ;;  %v5560_v21 = vrot.slane %v5546_v36, %v10498_v4  ;;  %v5569_v26 = vrot.slane %v5561_v30, %v10498_v4  ;;  %v5576_v58 = vrot.slane %v5562_v16, %v10498_v4 }
 0x769   : > { %5589 = vrot.lane.b32.xlu1 %v5306_v24, %s6789_s0  ;;  %s6806_s0 = smov 56  }
 0x76a   : > { %v5577_v43 = vcombine.low %v5521_v7, %v5553_v27  ;;  %v5578_v17 = vcombine.high %v5521_v7, %v5553_v27  ;;  %v5579_v41 = vcombine.low %v5528_v28, %v5560_v21  ;;  %v5580_v50 = vcombine.high %v5528_v28, %v5560_v21 }
 0x76b   : > { %v5581_v12 = vcombine.low %v5537_v51, %v5569_v26  ;;  %v5582_v3 = vcombine.high %v5537_v51, %v5569_v26  ;;  %v5583_v45 = vcombine.low %v5544_v39, %v5576_v58  ;;  %v5584_v35 = vcombine.high %v5544_v39, %v5576_v58 }
 0x76c   : > { %5645 = vrot.lane.b32.xlu0 %v5577_v43, %s6798_s24  ;;  %s6807_s24 = smov 60  }
 0x76d   : > { %5675 = vrot.lane.b32.xlu1 %v5445_v22, %s6804_s19 }
 0x770   : > { %5653 = vrot.lane.b32.xlu0 %v5578_v17, %s6801_s15  ;;  %s10330_s15 = scalar_lea.hbm %s10387_s9, %s5952_s29 }
 0x771   : > { %5683 = vrot.lane.b32.xlu1 %v5446_v5, %s6805_s30 }
 0x774   : > { %5661 = vrot.lane.b32.xlu0 %v5579_v41, %s6802_s18  ;;  %s10336_s18 = scalar_lea.sflag [#allocation4], %s325_s25 }
 0x775   : > { %5691 = vrot.lane.b32.xlu1 %v5447_v1, %s6806_s0 }
 0x778   : > { %5669 = vrot.lane.b32.xlu0 %v5580_v50, %s6803_s17  ;;  %s6808_s17 = smov [#allocation3]  }
 0x779   : > { %5699 = vrot.lane.b32.xlu1 %v5448_v49, %s6807_s24 }
 0x77c   : > { %5677 = vrot.lane.b32.xlu0 %v5581_v12, %s6804_s19  ;;  %s6713_s19 = sshll.u32 %s6808_s17, 4  ;;  %s6714_s19 = int_to_ptr.vmem [resolvable:$false] %s6713_s19 }
 0x77d   : > { %p6716_p0 = scmp.lt.s32.totalorder %s10324_s27, %s6714_s19 }
 0x780   : > { %5685 = vrot.lane.b32.xlu0 %v5582_v3, %s6805_s30  ;;  %s6715_s30 = scalar_lea.vmem %s6714_s19, 512 }
 0x781   : > { %p6717_p1 = scmp.lt.s32.totalorder %s6715_s30, %s6709_s8 }
 0x783   : > { %p6718_p2 = por %p6717_p1, %p6716_p0 }
 0x784   : > { %5693 = vrot.lane.b32.xlu0 %v5583_v45, %s6806_s0 }
 0x785   : > { %p6719_p3 = pnand %p6718_p2, %p6712_p13 }
 0x788   : > { %5701 = vrot.lane.b32.xlu0 %v5584_v35, %s6807_s24 }
 0x7a3   : > { %v5596_v4 = vpop.permute.xlu1 %5595  ;;  %v5588_v22 = vpop.permute.xlu0 %5587 }
 0x7a4   : > { %v5705_v0 = vsel %vm1543_vm5, %v5169_v52, %v5588_v22 }
 0x7a5   : > { %v5707_v56 = vsel %vm1592_vm6, %v5705_v0, %v5596_v4 }
 0x7a7   : > { %v5604_v25 = vpop.permute.xlu1 %5603 }
 0x7a8   : > { %v5709_v14 = vsel %vm1625_vm7, %v5707_v56, %v5604_v25 }
 0x7ab   : > { %v5612_v6 = vpop.permute.xlu1 %5611 }
 0x7ac   : > { %v5711_v52 = vsel %vm1658_vm8, %v5709_v14, %v5612_v6 }
 0x7af   : > { %v5620_v5 = vpop.permute.xlu1 %5619 }
 0x7b0   : > { %v5713_v57 = vsel %vm1691_vm9, %v5711_v52, %v5620_v5 }
 0x7b3   : > { %v5598_v15 = vpop.permute.xlu0 %5597  ;;  %v5628_v10 = vpop.permute.xlu1 %5627 }
 0x7b4   : > { %v5715_v13 = vsel %vm1724_vm10, %v5713_v57, %v5628_v10 }
 0x7b7   : > { %v5606_v2 = vpop.permute.xlu0 %5605  ;;  %v5636_v1 = vpop.permute.xlu1 %5635 }
 0x7b8   : > { %v5717_v23 = vsel %vm1757_vm11, %v5715_v13, %v5636_v1 }
 0x7bb   : > { %v5614_v19 = vpop.permute.xlu0 %5613 }
 0x7bf   : > { %v5622_v60 = vpop.permute.xlu0 %5621 }
 0x7c3   : > { %v5630_v46 = vpop.permute.xlu0 %5629 }
 0x7c7   : > { %v5638_v49 = vpop.permute.xlu0 %5637 }
 0x7cb   : > { %v5644_v42 = vpop.permute.xlu1 %5643 }
 0x7cc   : > { %v5719_v44 = vsel %vm1790_vm12, %v5717_v23, %v5644_v42 }
 0x7cf   : > { %v5652_v48 = vpop.permute.xlu1 %5651 }
 0x7d0   : > { %v5721_v63 = vsel %vm1850_vm13, %v5719_v44, %v5652_v48 }
 0x7d3   : > { %v5660_v32 = vpop.permute.xlu1 %5659 }
 0x7d4   : > { %v5724_v62 = vsel %vm5723_vm0, %v5721_v63, %v5660_v32 }
 0x7d7   : > { %v5668_v40 = vpop.permute.xlu1 %5667 }
 0x7d8   : > { %v5727_v53 = vsel %vm5726_vm1, %v5724_v62, %v5668_v40 }
 0x7db   : > { %v5590_v37 = vpop.permute.xlu1 %5589 }
 0x7dc   : > { %v5706_v8 = vsel %vm1543_vm5, %v5305_v18, %v5590_v37  ;;  %vm5738_vm5 = vcmask 490496  }
 0x7dd   : > { %v5708_v11 = vsel %vm1592_vm6, %v5706_v8, %v5598_v15 }
 0x7de   : > { %v5646_v20 = vpop.permute.xlu0 %5645  ;;  %v5710_v59 = vsel %vm1625_vm7, %v5708_v11, %v5606_v2 }
 0x7df   : > { %v5712_v33 = vsel %vm1658_vm8, %v5710_v59, %v5614_v19  ;;  %v5676_v34 = vpop.permute.xlu1 %5675 }
 0x7e0   : > { %v5714_v54 = vsel %vm1691_vm9, %v5712_v33, %v5622_v60  ;;  %v5730_v7 = vsel %vm5729_vm2, %v5727_v53, %v5676_v34 }
 0x7e1   : > { %v5716_v18 = vsel %vm1724_vm10, %v5714_v54, %v5630_v46 }
 0x7e2   : > { %v5654_v61 = vpop.permute.xlu0 %5653  ;;  %v5718_v29 = vsel %vm1757_vm11, %v5716_v18, %v5638_v49 }
 0x7e3   : > { %v5684_v9 = vpop.permute.xlu1 %5683  ;;  %v5720_v31 = vsel %vm1790_vm12, %v5718_v29, %v5646_v20 }
 0x7e4   : > { %v5733_v38 = vsel %vm5732_vm3, %v5730_v7, %v5684_v9  ;;  %v5722_v36 = vsel %vm1850_vm13, %v5720_v31, %v5654_v61 }
 0x7e6   : > { %v5662_v55 = vpop.permute.xlu0 %5661 }
 0x7e7   : > { %v5692_v47 = vpop.permute.xlu1 %5691  ;;  %v5725_v51 = vsel %vm5723_vm0, %v5722_v36, %v5662_v55 }
 0x7e8   : > { %v5736_v30 = vsel %vm5735_vm4, %v5733_v38, %v5692_v47 }
 0x7ea   : > { %v5670_v28 = vpop.permute.xlu0 %5669 }
 0x7eb   : > { %v5700_v16 = vpop.permute.xlu1 %5699  ;;  %v5728_v27 = vsel %vm5726_vm1, %v5725_v51, %v5670_v28 }
 0x7ec   : > { %v5739_v24 = vsel %vm5738_vm5, %v5736_v30, %v5700_v16 }
 0x7ed   : > { %5741 = vst.msk [vmem:[%s327_s10] sm:$0xff] %vm2466_vm14, %v5739_v24 }
 0x7ee   : > { %v5678_v39 = vpop.permute.xlu0 %5677 }
 0x7ef   : > { %v5731_v26 = vsel %vm5729_vm2, %v5728_v27, %v5678_v39 }
 0x7f2   : > { %v5686_v21 = vpop.permute.xlu0 %5685 }
 0x7f3   : > { %v5734_v43 = vsel %vm5732_vm3, %v5731_v26, %v5686_v21 }
 0x7f6   : > { %v5694_v58 = vpop.permute.xlu0 %5693 }
 0x7f7   : > { %v5737_v17 = vsel %vm5735_vm4, %v5734_v43, %v5694_v58 }
 0x7fa   : > { %v5702_v41 = vpop.permute.xlu0 %5701 }
 0x7fb   : > { %v5740_v50 = vsel %vm5738_vm5, %v5737_v17, %v5702_v41 }
 0x7fc   : > { %5742 = vst.msk [vmem:[%s327_s10 + $0x8] sm:$0xff] %vm2466_vm14, %v5740_v50 }
 0x7fd   : > { %6722 = shalt.err (!%p6719_p3)
}
 0x7fe   : > { %s6723_s0 = scalar_lea.hbm %s10330_s15, 256  ;;  %s6727_s26 = scalar_lea.hbm %s10387_s9, 512 }
 0x7ff   : > { %p6724_p4 = scmp.ne.s32.totalorder %s10330_s15, %s6723_s0  ;;  %p6728_p9 = scmp.lt.u32.totalorder %s10330_s15, %s10387_s9 }
 0x800   : > { %p6729_p10 = scmp.lt.u32.totalorder %s6727_s26, %s6723_s0  ;;  %p6731_p12 = scmp.lt.u32.totalorder %s6723_s0, %s10330_s15 }
 0x801   : > { %p6725_p7 = pnand %p6724_p4, %p6901_p5 }
 0x802   : > { %p6730_p11 = por %p6729_p10, %p6728_p9 }
 0x803   : > { %p6726_p8 = pneg %p6725_p7 }
 0x804   : > { %p6732_p13 = por %p6731_p12, %p6730_p11 }
 0x806   : > { %p6733_p0 = pnand %p6732_p13, %p6726_p8 }
 0x808   : > { %6736 = shalt.err (!%p6733_p0)
}
 0x809   : > { %s6809_s22 = smov 128  }
 0x80a   : > { %6435 = dma.vmem_to_hbm [thread:$0]  (%p6901_p5), %s10324_s27, 256, %s10330_s15, %s10336_s18, %s6809_s22, %s6809_s22, %s6790_s28  }
 0x80b PF: > { %p6441_p1 = scmp.ge.s32.totalorder %s6771_s14, 2  ;;  %s5772_s23 = sand.u32 1, %s6759_s11  }
 0x80c   : > { %s5773_s8 = scalar_lea.sflag [#allocation4], %s5772_s23 }
 0x80d   : > { %p6438_p2 = pnand %p6441_p1, %p6905_p6 }
 0x80f   : > { %6754 = dma.done.wait (!%p6438_p2), %s5773_s8, 256  }
 0x810   : > { %6756 = vsyncadd (!%p6438_p2), %s5773_s8, 4294967040  ;;  %s10528_s20 = sld [smem:[#allocation6_spill]]  ;;  %p21_p3 = scmp.ge.s32.totalorder %s6888_s16, 4  }
 0x811   : > { %s10529_s11 = smov %s6763_s12  ;;  %s10530_s12 = smov %s6767_s13 }
 0x812   : > { %s10532_s14 = smov %s6888_s16  ;;  %23 = sbr.rel (!%p21_p3) target bundleno = 6 (0x6), region = 91 }
 0x816   : > { %s10531_s13 = smov %s10528_s20 }
 0x819   :  { %5778 = vsyncpa [#allocation4], 1 }
 0x81a   :  { %5780 = vsyncpa [#allocation4 + $0x1], 1 }

</bundles_post_ra>
